<compile_context>
chip_gen: v7x
topology: tpu7x:2x2x1
jax: 0.10.0
libtpu: 0.0.40
codegen_flags: <defaults>
</compile_context>

<pallas_src>
import functools
import math

import jax
import jax.numpy as jnp
from jax.experimental import pallas as pl
from jax.experimental.pallas import tpu as pltpu


def _layernorm(x, gamma, beta, eps=1e-5):
    # Matches torch.nn.LayerNorm (biased variance, eps inside rsqrt).
    mu = jnp.mean(x, axis=-1, keepdims=True)
    xc = x - mu
    var = jnp.mean(xc * xc, axis=-1, keepdims=True)
    return xc * jax.lax.rsqrt(var + eps) * gamma + beta


def _gelu_exact(x):
    # torch.nn.GELU() default: exact erf-based GELU.
    return 0.5 * x * (1.0 + jax.lax.erf(x * (1.0 / math.sqrt(2.0))))


def vit_kernel(
    patches_ref,                # (Bt*N, P) bf16 (row 0 of each image = zero "cls patch")
    xadd_ref,                   # (Bt*N, D) f32  pos (+ cls at cls rows, + conv bias at patch rows)
    w_patch_ref,                # (P, D)   bf16
    ln1_g_ref, ln1_b_ref,       # (depth, 1, D) f32
    w_qkv_ref,                  # (depth, D, 3*H*dh) bf16 (q columns pre-scaled by dh^-0.5)
    w_o_ref, b_o_ref,           # (depth, H*dh, D) bf16, (depth, 1, D) f32
    ln2_g_ref, ln2_b_ref,       # (depth, 1, D) f32
    w1_ref, b1_ref,             # (depth, D, mlp) bf16, (depth, 1, mlp) f32
    w2_ref, b2_ref,             # (depth, mlp, D) bf16, (depth, 1, D) f32
    lnh_g_ref, lnh_b_ref,       # (1, D) f32
    w_head_ref, b_head_ref,     # (D, Cpad) bf16, (1, Cpad) f32
    out_ref,                    # (Bt, Cpad) f32
    *, depth, heads, dim_head, n_tok, imgs,
):
    f32, bf16 = jnp.float32, jnp.bfloat16
    inner = heads * dim_head

    # Patch embedding + cls + pos in one matmul + one add (bias/cls/pos folded
    # into xadd; zero cls-patch rows contribute nothing to the matmul).
    x = jnp.dot(patches_ref[...], w_patch_ref[...],
                preferred_element_type=f32) + xadd_ref[...]       # (T, D) f32

    # depth is tiny here -> static unroll keeps the LLO schedule tight.
    # (Switch to lax.fori_loop / a depth grid axis for deep models.)
    for l in range(depth):
        # ---- PreNorm + multi-head self-attention ----
        xn = _layernorm(x, ln1_g_ref[l], ln1_b_ref[l])            # (T, D) f32
        qkv = jnp.dot(xn.astype(bf16), w_qkv_ref[l],
                      preferred_element_type=f32)                 # (T, 3*inner) f32

        def head_block(sec, b, h):
            # Static sublane/lane slice: tokens of image b, head h, section sec in {q,k,v}.
            lo = sec * inner + h * dim_head
            return qkv[b * n_tok:(b + 1) * n_tok, lo:lo + dim_head]

        q_g = jnp.stack([head_block(0, b, h) for b in range(imgs)
                         for h in range(heads)], axis=0).astype(bf16)   # (G, N, dh)
        k_g = jnp.stack([head_block(1, b, h) for b in range(imgs)
                         for h in range(heads)], axis=0).astype(bf16)
        v_g = jnp.stack([head_block(2, b, h) for b in range(imgs)
                         for h in range(heads)], axis=0).astype(bf16)

        dots = jnp.einsum("gnd,gmd->gnm", q_g, k_g,
                          preferred_element_type=f32)             # (G, N, N) f32, scale pre-folded
        dots = dots - jnp.max(dots, axis=-1, keepdims=True)
        e = jnp.exp(dots)
        attn = e * pl.reciprocal(jnp.sum(e, axis=-1, keepdims=True), approx=True)
        o_g = jnp.einsum("gnm,gmd->gnd", attn.astype(bf16), v_g,
                         preferred_element_type=f32)              # (G, N, dh) f32

        # concat heads back to token-major layout -> ONE output projection (K = H*dh).
        o_cat = jnp.concatenate(
            [jnp.concatenate([o_g[b * heads + h] for h in range(heads)], axis=-1)
             for b in range(imgs)], axis=0).astype(bf16)           # (T, inner) bf16
        x = x + jnp.dot(o_cat, w_o_ref[l],
                        preferred_element_type=f32) + b_o_ref[l]   # residual

        # ---- PreNorm + FeedForward (exact GELU, dropout p=0 -> identity) ----
        yn = _layernorm(x, ln2_g_ref[l], ln2_b_ref[l])
        h1 = jnp.dot(yn.astype(bf16), w1_ref[l],
                     preferred_element_type=f32) + b1_ref[l]
        h1 = _gelu_exact(h1)
        x = x + jnp.dot(h1.astype(bf16), w2_ref[l],
                        preferred_element_type=f32) + b2_ref[l]    # residual

    # ---- cls pooling + mlp_head (LayerNorm -> Linear), lane-dense padded store ----
    cls_tok = jnp.concatenate([x[b * n_tok:b * n_tok + 1, :] for b in range(imgs)],
                              axis=0)                              # (Bt, D)
    cls_n = _layernorm(cls_tok, lnh_g_ref[...], lnh_b_ref[...])
    out_ref[...] = jnp.dot(cls_n.astype(bf16), w_head_ref[...],
                           preferred_element_type=f32) + b_head_ref[...]


def init_vit_params(key, *, patch_dim, dim, depth, heads, dim_head, mlp_dim,
                    num_patches, num_classes):
    f32, bf16 = jnp.float32, jnp.bfloat16
    inner = heads * dim_head
    ks = jax.random.split(key, 8)

    def w(k, shape, scale=0.02):
        return jax.random.normal(k, shape, f32) * scale

    # Fused QKV weight, columns ordered [q(h0..h3) | k(h0..h3) | v(h0..h3)],
    # each head dh wide; attention scale dh^-0.5 folded into the q columns.
    w_qkv = w(ks[3], (depth, dim, 3 * inner))
    w_qkv = w_qkv.at[:, :, :inner].multiply(dim_head ** -0.5)

    return {
        "cls": w(ks[0], (1, dim)),
        "pos": w(ks[1], (num_patches + 1, dim)),
        "w_patch": w(ks[2], (patch_dim, dim)).astype(bf16),
        "b_patch": jnp.zeros((1, dim), f32),
        "ln1_g": jnp.ones((depth, 1, dim), f32),
        "ln1_b": jnp.zeros((depth, 1, dim), f32),
        "w_qkv": w_qkv.astype(bf16),
        "w_o": w(ks[4], (depth, inner, dim)).astype(bf16),
        "b_o": jnp.zeros((depth, 1, dim), f32),
        "ln2_g": jnp.ones((depth, 1, dim), f32),
        "ln2_b": jnp.zeros((depth, 1, dim), f32),
        "w1": w(ks[5], (depth, dim, mlp_dim)).astype(bf16),
        "b1": jnp.zeros((depth, 1, mlp_dim), f32),
        "w2": w(ks[6], (depth, mlp_dim, dim)).astype(bf16),
        "b2": jnp.zeros((depth, 1, dim), f32),
        "lnh_g": jnp.ones((1, dim), f32),
        "lnh_b": jnp.zeros((1, dim), f32),
        "w_head": w(ks[7], (dim, num_classes)).astype(bf16),
        "b_head": jnp.zeros((1, num_classes), f32),
    }


def vit_forward(img, params, *, patch_size, depth, heads, dim_head, num_classes):
    B, C, H, W = img.shape
    ph = pw = patch_size
    gh, gw = H // ph, W // pw
    num_patches = gh * gw
    patch_dim = C * ph * pw
    n_tok = num_patches + 1
    bt = B                      # all images in one grid step (weights fetched once)
    bf16 = jnp.bfloat16

    # im2col for the stride=patch Conv2d + a leading zero "cls patch" row per
    # image (so the sequence needs no in-kernel concatenate), cast to bf16.
    patches = (img.reshape(B, C, gh, ph, gw, pw)
                  .transpose(0, 2, 4, 1, 3, 5)
                  .reshape(B, num_patches, patch_dim))
    patches = jnp.concatenate(
        [jnp.zeros((B, 1, patch_dim), patches.dtype), patches], axis=1)
    patches = patches.reshape(B * n_tok, patch_dim).astype(bf16)   # (B*N, P) bf16

    # Fold conv bias, cls token and positional embedding into one add table.
    row_add = params["pos"] + params["b_patch"]                    # patch rows: pos + bias
    row_add = row_add.at[0].set(params["pos"][0] + params["cls"][0])  # cls row: pos + cls
    x_add = jnp.tile(row_add, (bt, 1))                             # (bt*N, D) f32

    # Lane-dense classifier head: pad classes to a 128-lane multiple.
    cpad = max(128, ((num_classes + 127) // 128) * 128)
    w_head = jnp.zeros((params["w_head"].shape[0], cpad), bf16
                       ).at[:, :num_classes].set(params["w_head"])
    b_head = jnp.zeros((1, cpad), jnp.float32
                       ).at[:, :num_classes].set(params["b_head"])

    weights = [x_add, params["w_patch"],
               params["ln1_g"], params["ln1_b"],
               params["w_qkv"], params["w_o"], params["b_o"],
               params["ln2_g"], params["ln2_b"],
               params["w1"], params["b1"], params["w2"], params["b2"],
               params["lnh_g"], params["lnh_b"], w_head, b_head]

    def const_spec(a):
        # Whole-array weight block, constant across the (single-step) grid.
        nd = a.ndim
        return pl.BlockSpec(a.shape, lambda s, _nd=nd: (0,) * _nd)

    kernel = functools.partial(vit_kernel, depth=depth, heads=heads,
                               dim_head=dim_head, n_tok=n_tok, imgs=bt)
    out = pl.pallas_call(
        kernel,
        out_shape=jax.ShapeDtypeStruct((B, cpad), jnp.float32),
        grid=(B // bt,),
        in_specs=[pl.BlockSpec((bt * n_tok, patch_dim), lambda s: (s, 0))]
                 + [const_spec(wt) for wt in weights],
        out_specs=pl.BlockSpec((bt, cpad), lambda s: (s, 0)),
        compiler_params=pltpu.CompilerParams(dimension_semantics=("parallel",)),
    )(patches, *weights)
    return out[:, :num_classes]


if __name__ == "__main__":
    # Small shapes consistent with the module: 32x32 RGB, 8x8 patches,
    # embed_dim=32, depth=2, heads=4, dim_head=8, mlp_dim=64, 10 classes.
    image_size, patch_size, channels = 32, 8, 3
    embed_dim, num_classes = 32, 10
    depth, heads, dim_head, mlp_dim = 2, 4, 8, 64
    B = 2
    gh = image_size // patch_size

    key = jax.random.PRNGKey(0)
    kx, kp = jax.random.split(key)
    img = jax.random.normal(kx, (B, channels, image_size, image_size), jnp.float32)
    params = init_vit_params(
        kp, patch_dim=channels * patch_size * patch_size, dim=embed_dim,
        depth=depth, heads=heads, dim_head=dim_head, mlp_dim=mlp_dim,
        num_patches=gh * gh, num_classes=num_classes)

    fwd = jax.jit(functools.partial(
        vit_forward, patch_size=patch_size, depth=depth, heads=heads,
        dim_head=dim_head, num_classes=num_classes))
    logits = fwd(img, params)
    jax.block_until_ready(logits)
    assert logits.shape == (B, num_classes)
    assert bool(jnp.all(jnp.isfinite(logits)))
    print("KERNEL_OK")
</pallas_src>

<mosaic_0001>
module attributes {stable_mosaic.version = 11 : i64} {
  func.func @vit_kernel(%arg0: i32, %arg1: memref<34x192xbf16, #tpu.memory_space<vmem>>, %arg2: memref<34x32xf32, #tpu.memory_space<vmem>>, %arg3: memref<192x32xbf16, #tpu.memory_space<vmem>>, %arg4: memref<2x1x32xf32, #tpu.memory_space<vmem>>, %arg5: memref<2x1x32xf32, #tpu.memory_space<vmem>>, %arg6: memref<2x32x96xbf16, #tpu.memory_space<vmem>>, %arg7: memref<2x32x32xbf16, #tpu.memory_space<vmem>>, %arg8: memref<2x1x32xf32, #tpu.memory_space<vmem>>, %arg9: memref<2x1x32xf32, #tpu.memory_space<vmem>>, %arg10: memref<2x1x32xf32, #tpu.memory_space<vmem>>, %arg11: memref<2x32x64xbf16, #tpu.memory_space<vmem>>, %arg12: memref<2x1x64xf32, #tpu.memory_space<vmem>>, %arg13: memref<2x64x32xbf16, #tpu.memory_space<vmem>>, %arg14: memref<2x1x32xf32, #tpu.memory_space<vmem>>, %arg15: memref<1x32xf32, #tpu.memory_space<vmem>>, %arg16: memref<1x32xf32, #tpu.memory_space<vmem>>, %arg17: memref<32x128xbf16, #tpu.memory_space<vmem>>, %arg18: memref<1x128xf32, #tpu.memory_space<vmem>>, %arg19: memref<2x128xf32, #tpu.memory_space<vmem>>) attributes {dimension_semantics = [#tpu.dimension_semantics<parallel>], iteration_bounds = array<i64: 1>, scalar_prefetch = 0 : i64, scratch_operands = 0 : i64, tpu.core_type = #tpu.core_type<tc>, window_params = [{transform_indices = @transform_0, window_bounds = array<i64: 34, 192>}, {pipeline_mode = #tpu.pipeline_mode<synchronous>, transform_indices = @transform_1, window_bounds = array<i64: 34, 32>}, {pipeline_mode = #tpu.pipeline_mode<synchronous>, transform_indices = @transform_2, window_bounds = array<i64: 192, 32>}, {pipeline_mode = #tpu.pipeline_mode<synchronous>, transform_indices = @transform_3, window_bounds = array<i64: 2, 1, 32>}, {pipeline_mode = #tpu.pipeline_mode<synchronous>, transform_indices = @transform_4, window_bounds = array<i64: 2, 1, 32>}, {pipeline_mode = #tpu.pipeline_mode<synchronous>, transform_indices = @transform_5, window_bounds = array<i64: 2, 32, 96>}, {pipeline_mode = #tpu.pipeline_mode<synchronous>, transform_indices = @transform_6, window_bounds = array<i64: 2, 32, 32>}, {pipeline_mode = #tpu.pipeline_mode<synchronous>, transform_indices = @transform_7, window_bounds = array<i64: 2, 1, 32>}, {pipeline_mode = #tpu.pipeline_mode<synchronous>, transform_indices = @transform_8, window_bounds = array<i64: 2, 1, 32>}, {pipeline_mode = #tpu.pipeline_mode<synchronous>, transform_indices = @transform_9, window_bounds = array<i64: 2, 1, 32>}, {pipeline_mode = #tpu.pipeline_mode<synchronous>, transform_indices = @transform_10, window_bounds = array<i64: 2, 32, 64>}, {pipeline_mode = #tpu.pipeline_mode<synchronous>, transform_indices = @transform_11, window_bounds = array<i64: 2, 1, 64>}, {pipeline_mode = #tpu.pipeline_mode<synchronous>, transform_indices = @transform_12, window_bounds = array<i64: 2, 64, 32>}, {pipeline_mode = #tpu.pipeline_mode<synchronous>, transform_indices = @transform_13, window_bounds = array<i64: 2, 1, 32>}, {pipeline_mode = #tpu.pipeline_mode<synchronous>, transform_indices = @transform_14, window_bounds = array<i64: 1, 32>}, {pipeline_mode = #tpu.pipeline_mode<synchronous>, transform_indices = @transform_15, window_bounds = array<i64: 1, 32>}, {pipeline_mode = #tpu.pipeline_mode<synchronous>, transform_indices = @transform_16, window_bounds = array<i64: 32, 128>}, {pipeline_mode = #tpu.pipeline_mode<synchronous>, transform_indices = @transform_17, window_bounds = array<i64: 1, 128>}, {transform_indices = @transform_18, window_bounds = array<i64: 2, 128>}]} {
    %c0 = arith.constant 0 : index
    %c0_0 = arith.constant 0 : index
    %0 = vector.load %arg1[%c0, %c0_0] : memref<34x192xbf16, #tpu.memory_space<vmem>>, vector<34x192xbf16>
    %c0_1 = arith.constant 0 : index
    %c0_2 = arith.constant 0 : index
    %1 = vector.load %arg3[%c0_1, %c0_2] : memref<192x32xbf16, #tpu.memory_space<vmem>>, vector<192x32xbf16>
    %cst = arith.constant dense<0.000000e+00> : vector<34x32xf32>
    %2 = tpu.matmul %0, %1, %cst {dimension_numbers = #tpu.dot_dimension_numbers<[1], [0], [0], [1], [0, 0, 1, 1], [], []>} : vector<34x192xbf16>, vector<192x32xbf16>, vector<34x32xf32> -> vector<34x32xf32>
    %c0_3 = arith.constant 0 : index
    %c0_4 = arith.constant 0 : index
    %3 = vector.load %arg2[%c0_3, %c0_4] : memref<34x32xf32, #tpu.memory_space<vmem>>, vector<34x32xf32>
    %4 = arith.addf %2, %3 : vector<34x32xf32>
    %c0_5 = arith.constant 0 : index
    %c0_6 = arith.constant 0 : index
    %c0_7 = arith.constant 0 : index
    %5 = vector.load %arg4[%c0_5, %c0_6, %c0_7] : memref<2x1x32xf32, #tpu.memory_space<vmem>>, vector<1x1x32xf32>
    %6 = vector.shape_cast %5 : vector<1x1x32xf32> to vector<1x32xf32>
    %c0_8 = arith.constant 0 : index
    %c0_9 = arith.constant 0 : index
    %c0_10 = arith.constant 0 : index
    %7 = vector.load %arg5[%c0_8, %c0_9, %c0_10] : memref<2x1x32xf32, #tpu.memory_space<vmem>>, vector<1x1x32xf32>
    %8 = vector.shape_cast %7 : vector<1x1x32xf32> to vector<1x32xf32>
    %cst_11 = arith.constant dense<0.000000e+00> : vector<34xf32>
    %9 = vector.multi_reduction <add>, %4, %cst_11 [1] : vector<34x32xf32> to vector<34xf32>
    %10 = vector.shape_cast %9 : vector<34xf32> to vector<34x1xf32>
    %cst_12 = arith.constant 3.200000e+01 : f32
    %11 = vector.broadcast %cst_12 : f32 to vector<34x1xf32>
    %12 = arith.divf %10, %11 : vector<34x1xf32>
    %13 = vector.broadcast %12 : vector<34x1xf32> to vector<34x32xf32>
    %14 = arith.subf %4, %13 : vector<34x32xf32>
    %15 = arith.mulf %14, %14 : vector<34x32xf32>
    %cst_13 = arith.constant dense<0.000000e+00> : vector<34xf32>
    %16 = vector.multi_reduction <add>, %15, %cst_13 [1] : vector<34x32xf32> to vector<34xf32>
    %17 = vector.shape_cast %16 : vector<34xf32> to vector<34x1xf32>
    %cst_14 = arith.constant 3.200000e+01 : f32
    %18 = vector.broadcast %cst_14 : f32 to vector<34x1xf32>
    %19 = arith.divf %17, %18 : vector<34x1xf32>
    %cst_15 = arith.constant 9.99999974E-6 : f32
    %20 = vector.broadcast %cst_15 : f32 to vector<34x1xf32>
    %21 = arith.addf %19, %20 : vector<34x1xf32>
    %22 = math.rsqrt %21 : vector<34x1xf32>
    %23 = vector.broadcast %22 : vector<34x1xf32> to vector<34x32xf32>
    %24 = arith.mulf %14, %23 : vector<34x32xf32>
    %25 = vector.broadcast %6 : vector<1x32xf32> to vector<34x32xf32>
    %26 = arith.mulf %24, %25 : vector<34x32xf32>
    %27 = vector.broadcast %8 : vector<1x32xf32> to vector<34x32xf32>
    %28 = arith.addf %26, %27 : vector<34x32xf32>
    %29 = arith.truncf %28 : vector<34x32xf32> to vector<34x32xbf16>
    %c0_16 = arith.constant 0 : index
    %c0_17 = arith.constant 0 : index
    %c0_18 = arith.constant 0 : index
    %30 = vector.load %arg6[%c0_16, %c0_17, %c0_18] : memref<2x32x96xbf16, #tpu.memory_space<vmem>>, vector<1x32x96xbf16>
    %31 = vector.shape_cast %30 : vector<1x32x96xbf16> to vector<32x96xbf16>
    %cst_19 = arith.constant dense<0.000000e+00> : vector<34x96xf32>
    %32 = tpu.matmul %29, %31, %cst_19 {dimension_numbers = #tpu.dot_dimension_numbers<[1], [0], [0], [1], [0, 0, 1, 1], [], []>} : vector<34x32xbf16>, vector<32x96xbf16>, vector<34x96xf32> -> vector<34x96xf32>
    %33 = vector.extract_strided_slice %32 {offsets = [0, 0], sizes = [17, 8], strides = [1, 1]} : vector<34x96xf32> to vector<17x8xf32>
    %34 = vector.extract_strided_slice %32 {offsets = [0, 8], sizes = [17, 8], strides = [1, 1]} : vector<34x96xf32> to vector<17x8xf32>
    %35 = vector.extract_strided_slice %32 {offsets = [0, 16], sizes = [17, 8], strides = [1, 1]} : vector<34x96xf32> to vector<17x8xf32>
    %36 = vector.extract_strided_slice %32 {offsets = [0, 24], sizes = [17, 8], strides = [1, 1]} : vector<34x96xf32> to vector<17x8xf32>
    %37 = vector.extract_strided_slice %32 {offsets = [17, 0], sizes = [17, 8], strides = [1, 1]} : vector<34x96xf32> to vector<17x8xf32>
    %38 = vector.extract_strided_slice %32 {offsets = [17, 8], sizes = [17, 8], strides = [1, 1]} : vector<34x96xf32> to vector<17x8xf32>
    %39 = vector.extract_strided_slice %32 {offsets = [17, 16], sizes = [17, 8], strides = [1, 1]} : vector<34x96xf32> to vector<17x8xf32>
    %40 = vector.extract_strided_slice %32 {offsets = [17, 24], sizes = [17, 8], strides = [1, 1]} : vector<34x96xf32> to vector<17x8xf32>
    %41 = vector.shape_cast %33 : vector<17x8xf32> to vector<1x17x8xf32>
    %42 = vector.shape_cast %34 : vector<17x8xf32> to vector<1x17x8xf32>
    %43 = vector.shape_cast %35 : vector<17x8xf32> to vector<1x17x8xf32>
    %44 = vector.shape_cast %36 : vector<17x8xf32> to vector<1x17x8xf32>
    %45 = vector.shape_cast %37 : vector<17x8xf32> to vector<1x17x8xf32>
    %46 = vector.shape_cast %38 : vector<17x8xf32> to vector<1x17x8xf32>
    %47 = vector.shape_cast %39 : vector<17x8xf32> to vector<1x17x8xf32>
    %48 = vector.shape_cast %40 : vector<17x8xf32> to vector<1x17x8xf32>
    %49 = tpu.concatenate %41, %42, %43, %44, %45, %46, %47, %48 in 0 : vector<1x17x8xf32>, vector<1x17x8xf32>, vector<1x17x8xf32>, vector<1x17x8xf32>, vector<1x17x8xf32>, vector<1x17x8xf32>, vector<1x17x8xf32>, vector<1x17x8xf32> -> vector<8x17x8xf32>
    %50 = arith.truncf %49 : vector<8x17x8xf32> to vector<8x17x8xbf16>
    %51 = vector.extract_strided_slice %32 {offsets = [0, 32], sizes = [17, 8], strides = [1, 1]} : vector<34x96xf32> to vector<17x8xf32>
    %52 = vector.extract_strided_slice %32 {offsets = [0, 40], sizes = [17, 8], strides = [1, 1]} : vector<34x96xf32> to vector<17x8xf32>
    %53 = vector.extract_strided_slice %32 {offsets = [0, 48], sizes = [17, 8], strides = [1, 1]} : vector<34x96xf32> to vector<17x8xf32>
    %54 = vector.extract_strided_slice %32 {offsets = [0, 56], sizes = [17, 8], strides = [1, 1]} : vector<34x96xf32> to vector<17x8xf32>
    %55 = vector.extract_strided_slice %32 {offsets = [17, 32], sizes = [17, 8], strides = [1, 1]} : vector<34x96xf32> to vector<17x8xf32>
    %56 = vector.extract_strided_slice %32 {offsets = [17, 40], sizes = [17, 8], strides = [1, 1]} : vector<34x96xf32> to vector<17x8xf32>
    %57 = vector.extract_strided_slice %32 {offsets = [17, 48], sizes = [17, 8], strides = [1, 1]} : vector<34x96xf32> to vector<17x8xf32>
    %58 = vector.extract_strided_slice %32 {offsets = [17, 56], sizes = [17, 8], strides = [1, 1]} : vector<34x96xf32> to vector<17x8xf32>
    %59 = vector.shape_cast %51 : vector<17x8xf32> to vector<1x17x8xf32>
    %60 = vector.shape_cast %52 : vector<17x8xf32> to vector<1x17x8xf32>
    %61 = vector.shape_cast %53 : vector<17x8xf32> to vector<1x17x8xf32>
    %62 = vector.shape_cast %54 : vector<17x8xf32> to vector<1x17x8xf32>
    %63 = vector.shape_cast %55 : vector<17x8xf32> to vector<1x17x8xf32>
    %64 = vector.shape_cast %56 : vector<17x8xf32> to vector<1x17x8xf32>
    %65 = vector.shape_cast %57 : vector<17x8xf32> to vector<1x17x8xf32>
    %66 = vector.shape_cast %58 : vector<17x8xf32> to vector<1x17x8xf32>
    %67 = tpu.concatenate %59, %60, %61, %62, %63, %64, %65, %66 in 0 : vector<1x17x8xf32>, vector<1x17x8xf32>, vector<1x17x8xf32>, vector<1x17x8xf32>, vector<1x17x8xf32>, vector<1x17x8xf32>, vector<1x17x8xf32>, vector<1x17x8xf32> -> vector<8x17x8xf32>
    %68 = arith.truncf %67 : vector<8x17x8xf32> to vector<8x17x8xbf16>
    %69 = vector.extract_strided_slice %32 {offsets = [0, 64], sizes = [17, 8], strides = [1, 1]} : vector<34x96xf32> to vector<17x8xf32>
    %70 = vector.extract_strided_slice %32 {offsets = [0, 72], sizes = [17, 8], strides = [1, 1]} : vector<34x96xf32> to vector<17x8xf32>
    %71 = vector.extract_strided_slice %32 {offsets = [0, 80], sizes = [17, 8], strides = [1, 1]} : vector<34x96xf32> to vector<17x8xf32>
    %72 = vector.extract_strided_slice %32 {offsets = [0, 88], sizes = [17, 8], strides = [1, 1]} : vector<34x96xf32> to vector<17x8xf32>
    %73 = vector.extract_strided_slice %32 {offsets = [17, 64], sizes = [17, 8], strides = [1, 1]} : vector<34x96xf32> to vector<17x8xf32>
    %74 = vector.extract_strided_slice %32 {offsets = [17, 72], sizes = [17, 8], strides = [1, 1]} : vector<34x96xf32> to vector<17x8xf32>
    %75 = vector.extract_strided_slice %32 {offsets = [17, 80], sizes = [17, 8], strides = [1, 1]} : vector<34x96xf32> to vector<17x8xf32>
    %76 = vector.extract_strided_slice %32 {offsets = [17, 88], sizes = [17, 8], strides = [1, 1]} : vector<34x96xf32> to vector<17x8xf32>
    %77 = vector.shape_cast %69 : vector<17x8xf32> to vector<1x17x8xf32>
    %78 = vector.shape_cast %70 : vector<17x8xf32> to vector<1x17x8xf32>
    %79 = vector.shape_cast %71 : vector<17x8xf32> to vector<1x17x8xf32>
    %80 = vector.shape_cast %72 : vector<17x8xf32> to vector<1x17x8xf32>
    %81 = vector.shape_cast %73 : vector<17x8xf32> to vector<1x17x8xf32>
    %82 = vector.shape_cast %74 : vector<17x8xf32> to vector<1x17x8xf32>
    %83 = vector.shape_cast %75 : vector<17x8xf32> to vector<1x17x8xf32>
    %84 = vector.shape_cast %76 : vector<17x8xf32> to vector<1x17x8xf32>
    %85 = tpu.concatenate %77, %78, %79, %80, %81, %82, %83, %84 in 0 : vector<1x17x8xf32>, vector<1x17x8xf32>, vector<1x17x8xf32>, vector<1x17x8xf32>, vector<1x17x8xf32>, vector<1x17x8xf32>, vector<1x17x8xf32>, vector<1x17x8xf32> -> vector<8x17x8xf32>
    %86 = arith.truncf %85 : vector<8x17x8xf32> to vector<8x17x8xbf16>
    "tpu.trace_start"() <{level = 10 : i32, message = "gnd,gmd->gnm"}> : () -> ()
    %cst_20 = arith.constant dense<0.000000e+00> : vector<8x17x17xf32>
    %87 = tpu.matmul %50, %68, %cst_20 {dimension_numbers = #tpu.dot_dimension_numbers<[2], [2], [1], [1], [0, 0, 0, 1, 1, 1], [0], [0]>} : vector<8x17x8xbf16>, vector<8x17x8xbf16>, vector<8x17x17xf32> -> vector<8x17x17xf32>
    "tpu.trace_stop"() : () -> ()
    %cst_21 = arith.constant dense<0xFF800000> : vector<8x17xf32>
    %88 = vector.multi_reduction <maximumf>, %87, %cst_21 [2] : vector<8x17x17xf32> to vector<8x17xf32>
    %89 = vector.shape_cast %88 : vector<8x17xf32> to vector<8x17x1xf32>
    %90 = vector.broadcast %89 : vector<8x17x1xf32> to vector<8x17x17xf32>
    %91 = arith.subf %87, %90 : vector<8x17x17xf32>
    %92 = math.exp %91 : vector<8x17x17xf32>
    %cst_22 = arith.constant dense<0.000000e+00> : vector<8x17xf32>
    %93 = vector.multi_reduction <add>, %92, %cst_22 [2] : vector<8x17x17xf32> to vector<8x17xf32>
    %94 = vector.shape_cast %93 : vector<8x17xf32> to vector<8x17x1xf32>
    %95 = tpu.reciprocal %94 {approx = true} : vector<8x17x1xf32> -> vector<8x17x1xf32>
    %96 = vector.broadcast %95 : vector<8x17x1xf32> to vector<8x17x17xf32>
    %97 = arith.mulf %92, %96 : vector<8x17x17xf32>
    %98 = arith.truncf %97 : vector<8x17x17xf32> to vector<8x17x17xbf16>
    "tpu.trace_start"() <{level = 10 : i32, message = "gnm,gmd->gnd"}> : () -> ()
    %cst_23 = arith.constant dense<0.000000e+00> : vector<8x17x8xf32>
    %99 = tpu.matmul %98, %86, %cst_23 {dimension_numbers = #tpu.dot_dimension_numbers<[2], [1], [1], [2], [0, 0, 0, 1, 1, 2], [0], [0]>} : vector<8x17x17xbf16>, vector<8x17x8xbf16>, vector<8x17x8xf32> -> vector<8x17x8xf32>
    "tpu.trace_stop"() : () -> ()
    %100 = vector.extract_strided_slice %99 {offsets = [0, 0, 0], sizes = [1, 17, 8], strides = [1, 1, 1]} : vector<8x17x8xf32> to vector<1x17x8xf32>
    %101 = vector.shape_cast %100 : vector<1x17x8xf32> to vector<17x8xf32>
    %102 = vector.extract_strided_slice %99 {offsets = [1, 0, 0], sizes = [1, 17, 8], strides = [1, 1, 1]} : vector<8x17x8xf32> to vector<1x17x8xf32>
    %103 = vector.shape_cast %102 : vector<1x17x8xf32> to vector<17x8xf32>
    %104 = vector.extract_strided_slice %99 {offsets = [2, 0, 0], sizes = [1, 17, 8], strides = [1, 1, 1]} : vector<8x17x8xf32> to vector<1x17x8xf32>
    %105 = vector.shape_cast %104 : vector<1x17x8xf32> to vector<17x8xf32>
    %106 = vector.extract_strided_slice %99 {offsets = [3, 0, 0], sizes = [1, 17, 8], strides = [1, 1, 1]} : vector<8x17x8xf32> to vector<1x17x8xf32>
    %107 = vector.shape_cast %106 : vector<1x17x8xf32> to vector<17x8xf32>
    %108 = tpu.concatenate %101, %103, %105, %107 in 1 : vector<17x8xf32>, vector<17x8xf32>, vector<17x8xf32>, vector<17x8xf32> -> vector<17x32xf32>
    %109 = vector.extract_strided_slice %99 {offsets = [4, 0, 0], sizes = [1, 17, 8], strides = [1, 1, 1]} : vector<8x17x8xf32> to vector<1x17x8xf32>
    %110 = vector.shape_cast %109 : vector<1x17x8xf32> to vector<17x8xf32>
    %111 = vector.extract_strided_slice %99 {offsets = [5, 0, 0], sizes = [1, 17, 8], strides = [1, 1, 1]} : vector<8x17x8xf32> to vector<1x17x8xf32>
    %112 = vector.shape_cast %111 : vector<1x17x8xf32> to vector<17x8xf32>
    %113 = vector.extract_strided_slice %99 {offsets = [6, 0, 0], sizes = [1, 17, 8], strides = [1, 1, 1]} : vector<8x17x8xf32> to vector<1x17x8xf32>
    %114 = vector.shape_cast %113 : vector<1x17x8xf32> to vector<17x8xf32>
    %115 = vector.extract_strided_slice %99 {offsets = [7, 0, 0], sizes = [1, 17, 8], strides = [1, 1, 1]} : vector<8x17x8xf32> to vector<1x17x8xf32>
    %116 = vector.shape_cast %115 : vector<1x17x8xf32> to vector<17x8xf32>
    %117 = tpu.concatenate %110, %112, %114, %116 in 1 : vector<17x8xf32>, vector<17x8xf32>, vector<17x8xf32>, vector<17x8xf32> -> vector<17x32xf32>
    %118 = tpu.concatenate %108, %117 in 0 : vector<17x32xf32>, vector<17x32xf32> -> vector<34x32xf32>
    %119 = arith.truncf %118 : vector<34x32xf32> to vector<34x32xbf16>
    %c0_24 = arith.constant 0 : index
    %c0_25 = arith.constant 0 : index
    %c0_26 = arith.constant 0 : index
    %120 = vector.load %arg7[%c0_24, %c0_25, %c0_26] : memref<2x32x32xbf16, #tpu.memory_space<vmem>>, vector<1x32x32xbf16>
    %121 = vector.shape_cast %120 : vector<1x32x32xbf16> to vector<32x32xbf16>
    %cst_27 = arith.constant dense<0.000000e+00> : vector<34x32xf32>
    %122 = tpu.matmul %119, %121, %cst_27 {dimension_numbers = #tpu.dot_dimension_numbers<[1], [0], [0], [1], [0, 0, 1, 1], [], []>} : vector<34x32xbf16>, vector<32x32xbf16>, vector<34x32xf32> -> vector<34x32xf32>
    %123 = arith.addf %4, %122 : vector<34x32xf32>
    %c0_28 = arith.constant 0 : index
    %c0_29 = arith.constant 0 : index
    %c0_30 = arith.constant 0 : index
    %124 = vector.load %arg8[%c0_28, %c0_29, %c0_30] : memref<2x1x32xf32, #tpu.memory_space<vmem>>, vector<1x1x32xf32>
    %125 = vector.shape_cast %124 : vector<1x1x32xf32> to vector<1x32xf32>
    %126 = vector.broadcast %125 : vector<1x32xf32> to vector<34x32xf32>
    %127 = arith.addf %123, %126 : vector<34x32xf32>
    %c0_31 = arith.constant 0 : index
    %c0_32 = arith.constant 0 : index
    %c0_33 = arith.constant 0 : index
    %128 = vector.load %arg9[%c0_31, %c0_32, %c0_33] : memref<2x1x32xf32, #tpu.memory_space<vmem>>, vector<1x1x32xf32>
    %129 = vector.shape_cast %128 : vector<1x1x32xf32> to vector<1x32xf32>
    %c0_34 = arith.constant 0 : index
    %c0_35 = arith.constant 0 : index
    %c0_36 = arith.constant 0 : index
    %130 = vector.load %arg10[%c0_34, %c0_35, %c0_36] : memref<2x1x32xf32, #tpu.memory_space<vmem>>, vector<1x1x32xf32>
    %131 = vector.shape_cast %130 : vector<1x1x32xf32> to vector<1x32xf32>
    %cst_37 = arith.constant dense<0.000000e+00> : vector<34xf32>
    %132 = vector.multi_reduction <add>, %127, %cst_37 [1] : vector<34x32xf32> to vector<34xf32>
    %133 = vector.shape_cast %132 : vector<34xf32> to vector<34x1xf32>
    %cst_38 = arith.constant 3.200000e+01 : f32
    %134 = vector.broadcast %cst_38 : f32 to vector<34x1xf32>
    %135 = arith.divf %133, %134 : vector<34x1xf32>
    %136 = vector.broadcast %135 : vector<34x1xf32> to vector<34x32xf32>
    %137 = arith.subf %127, %136 : vector<34x32xf32>
    %138 = arith.mulf %137, %137 : vector<34x32xf32>
    %cst_39 = arith.constant dense<0.000000e+00> : vector<34xf32>
    %139 = vector.multi_reduction <add>, %138, %cst_39 [1] : vector<34x32xf32> to vector<34xf32>
    %140 = vector.shape_cast %139 : vector<34xf32> to vector<34x1xf32>
    %cst_40 = arith.constant 3.200000e+01 : f32
    %141 = vector.broadcast %cst_40 : f32 to vector<34x1xf32>
    %142 = arith.divf %140, %141 : vector<34x1xf32>
    %cst_41 = arith.constant 9.99999974E-6 : f32
    %143 = vector.broadcast %cst_41 : f32 to vector<34x1xf32>
    %144 = arith.addf %142, %143 : vector<34x1xf32>
    %145 = math.rsqrt %144 : vector<34x1xf32>
    %146 = vector.broadcast %145 : vector<34x1xf32> to vector<34x32xf32>
    %147 = arith.mulf %137, %146 : vector<34x32xf32>
    %148 = vector.broadcast %129 : vector<1x32xf32> to vector<34x32xf32>
    %149 = arith.mulf %147, %148 : vector<34x32xf32>
    %150 = vector.broadcast %131 : vector<1x32xf32> to vector<34x32xf32>
    %151 = arith.addf %149, %150 : vector<34x32xf32>
    %152 = arith.truncf %151 : vector<34x32xf32> to vector<34x32xbf16>
    %c0_42 = arith.constant 0 : index
    %c0_43 = arith.constant 0 : index
    %c0_44 = arith.constant 0 : index
    %153 = vector.load %arg11[%c0_42, %c0_43, %c0_44] : memref<2x32x64xbf16, #tpu.memory_space<vmem>>, vector<1x32x64xbf16>
    %154 = vector.shape_cast %153 : vector<1x32x64xbf16> to vector<32x64xbf16>
    %cst_45 = arith.constant dense<0.000000e+00> : vector<34x64xf32>
    %155 = tpu.matmul %152, %154, %cst_45 {dimension_numbers = #tpu.dot_dimension_numbers<[1], [0], [0], [1], [0, 0, 1, 1], [], []>} : vector<34x32xbf16>, vector<32x64xbf16>, vector<34x64xf32> -> vector<34x64xf32>
    %c0_46 = arith.constant 0 : index
    %c0_47 = arith.constant 0 : index
    %c0_48 = arith.constant 0 : index
    %156 = vector.load %arg12[%c0_46, %c0_47, %c0_48] : memref<2x1x64xf32, #tpu.memory_space<vmem>>, vector<1x1x64xf32>
    %157 = vector.shape_cast %156 : vector<1x1x64xf32> to vector<1x64xf32>
    %158 = vector.broadcast %157 : vector<1x64xf32> to vector<34x64xf32>
    %159 = arith.addf %155, %158 : vector<34x64xf32>
    %cst_49 = arith.constant 5.000000e-01 : f32
    %160 = vector.broadcast %cst_49 : f32 to vector<34x64xf32>
    %161 = arith.mulf %160, %159 : vector<34x64xf32>
    %cst_50 = arith.constant 0.707106769 : f32
    %162 = vector.broadcast %cst_50 : f32 to vector<34x64xf32>
    %163 = arith.mulf %159, %162 : vector<34x64xf32>
    %164 = math.erf %163 : vector<34x64xf32>
    %cst_51 = arith.constant 1.000000e+00 : f32
    %165 = vector.broadcast %cst_51 : f32 to vector<34x64xf32>
    %166 = arith.addf %165, %164 : vector<34x64xf32>
    %167 = arith.mulf %161, %166 : vector<34x64xf32>
    %168 = arith.truncf %167 : vector<34x64xf32> to vector<34x64xbf16>
    %c0_52 = arith.constant 0 : index
    %c0_53 = arith.constant 0 : index
    %c0_54 = arith.constant 0 : index
    %169 = vector.load %arg13[%c0_52, %c0_53, %c0_54] : memref<2x64x32xbf16, #tpu.memory_space<vmem>>, vector<1x64x32xbf16>
    %170 = vector.shape_cast %169 : vector<1x64x32xbf16> to vector<64x32xbf16>
    %cst_55 = arith.constant dense<0.000000e+00> : vector<34x32xf32>
    %171 = tpu.matmul %168, %170, %cst_55 {dimension_numbers = #tpu.dot_dimension_numbers<[1], [0], [0], [1], [0, 0, 1, 1], [], []>} : vector<34x64xbf16>, vector<64x32xbf16>, vector<34x32xf32> -> vector<34x32xf32>
    %172 = arith.addf %127, %171 : vector<34x32xf32>
    %c0_56 = arith.constant 0 : index
    %c0_57 = arith.constant 0 : index
    %c0_58 = arith.constant 0 : index
    %173 = vector.load %arg14[%c0_56, %c0_57, %c0_58] : memref<2x1x32xf32, #tpu.memory_space<vmem>>, vector<1x1x32xf32>
    %174 = vector.shape_cast %173 : vector<1x1x32xf32> to vector<1x32xf32>
    %175 = vector.broadcast %174 : vector<1x32xf32> to vector<34x32xf32>
    %176 = arith.addf %172, %175 : vector<34x32xf32>
    %c1 = arith.constant 1 : index
    %c0_59 = arith.constant 0 : index
    %c0_60 = arith.constant 0 : index
    %177 = vector.load %arg4[%c1, %c0_59, %c0_60] : memref<2x1x32xf32, #tpu.memory_space<vmem>>, vector<1x1x32xf32>
    %178 = vector.shape_cast %177 : vector<1x1x32xf32> to vector<1x32xf32>
    %c1_61 = arith.constant 1 : index
    %c0_62 = arith.constant 0 : index
    %c0_63 = arith.constant 0 : index
    %179 = vector.load %arg5[%c1_61, %c0_62, %c0_63] : memref<2x1x32xf32, #tpu.memory_space<vmem>>, vector<1x1x32xf32>
    %180 = vector.shape_cast %179 : vector<1x1x32xf32> to vector<1x32xf32>
    %cst_64 = arith.constant dense<0.000000e+00> : vector<34xf32>
    %181 = vector.multi_reduction <add>, %176, %cst_64 [1] : vector<34x32xf32> to vector<34xf32>
    %182 = vector.shape_cast %181 : vector<34xf32> to vector<34x1xf32>
    %cst_65 = arith.constant 3.200000e+01 : f32
    %183 = vector.broadcast %cst_65 : f32 to vector<34x1xf32>
    %184 = arith.divf %182, %183 : vector<34x1xf32>
    %185 = vector.broadcast %184 : vector<34x1xf32> to vector<34x32xf32>
    %186 = arith.subf %176, %185 : vector<34x32xf32>
    %187 = arith.mulf %186, %186 : vector<34x32xf32>
    %cst_66 = arith.constant dense<0.000000e+00> : vector<34xf32>
    %188 = vector.multi_reduction <add>, %187, %cst_66 [1] : vector<34x32xf32> to vector<34xf32>
    %189 = vector.shape_cast %188 : vector<34xf32> to vector<34x1xf32>
    %cst_67 = arith.constant 3.200000e+01 : f32
    %190 = vector.broadcast %cst_67 : f32 to vector<34x1xf32>
    %191 = arith.divf %189, %190 : vector<34x1xf32>
    %cst_68 = arith.constant 9.99999974E-6 : f32
    %192 = vector.broadcast %cst_68 : f32 to vector<34x1xf32>
    %193 = arith.addf %191, %192 : vector<34x1xf32>
    %194 = math.rsqrt %193 : vector<34x1xf32>
    %195 = vector.broadcast %194 : vector<34x1xf32> to vector<34x32xf32>
    %196 = arith.mulf %186, %195 : vector<34x32xf32>
    %197 = vector.broadcast %178 : vector<1x32xf32> to vector<34x32xf32>
    %198 = arith.mulf %196, %197 : vector<34x32xf32>
    %199 = vector.broadcast %180 : vector<1x32xf32> to vector<34x32xf32>
    %200 = arith.addf %198, %199 : vector<34x32xf32>
    %201 = arith.truncf %200 : vector<34x32xf32> to vector<34x32xbf16>
    %c1_69 = arith.constant 1 : index
    %c0_70 = arith.constant 0 : index
    %c0_71 = arith.constant 0 : index
    %202 = vector.load %arg6[%c1_69, %c0_70, %c0_71] : memref<2x32x96xbf16, #tpu.memory_space<vmem>>, vector<1x32x96xbf16>
    %203 = vector.shape_cast %202 : vector<1x32x96xbf16> to vector<32x96xbf16>
    %cst_72 = arith.constant dense<0.000000e+00> : vector<34x96xf32>
    %204 = tpu.matmul %201, %203, %cst_72 {dimension_numbers = #tpu.dot_dimension_numbers<[1], [0], [0], [1], [0, 0, 1, 1], [], []>} : vector<34x32xbf16>, vector<32x96xbf16>, vector<34x96xf32> -> vector<34x96xf32>
    %205 = vector.extract_strided_slice %204 {offsets = [0, 0], sizes = [17, 8], strides = [1, 1]} : vector<34x96xf32> to vector<17x8xf32>
    %206 = vector.extract_strided_slice %204 {offsets = [0, 8], sizes = [17, 8], strides = [1, 1]} : vector<34x96xf32> to vector<17x8xf32>
    %207 = vector.extract_strided_slice %204 {offsets = [0, 16], sizes = [17, 8], strides = [1, 1]} : vector<34x96xf32> to vector<17x8xf32>
    %208 = vector.extract_strided_slice %204 {offsets = [0, 24], sizes = [17, 8], strides = [1, 1]} : vector<34x96xf32> to vector<17x8xf32>
    %209 = vector.extract_strided_slice %204 {offsets = [17, 0], sizes = [17, 8], strides = [1, 1]} : vector<34x96xf32> to vector<17x8xf32>
    %210 = vector.extract_strided_slice %204 {offsets = [17, 8], sizes = [17, 8], strides = [1, 1]} : vector<34x96xf32> to vector<17x8xf32>
    %211 = vector.extract_strided_slice %204 {offsets = [17, 16], sizes = [17, 8], strides = [1, 1]} : vector<34x96xf32> to vector<17x8xf32>
    %212 = vector.extract_strided_slice %204 {offsets = [17, 24], sizes = [17, 8], strides = [1, 1]} : vector<34x96xf32> to vector<17x8xf32>
    %213 = vector.shape_cast %205 : vector<17x8xf32> to vector<1x17x8xf32>
    %214 = vector.shape_cast %206 : vector<17x8xf32> to vector<1x17x8xf32>
    %215 = vector.shape_cast %207 : vector<17x8xf32> to vector<1x17x8xf32>
    %216 = vector.shape_cast %208 : vector<17x8xf32> to vector<1x17x8xf32>
    %217 = vector.shape_cast %209 : vector<17x8xf32> to vector<1x17x8xf32>
    %218 = vector.shape_cast %210 : vector<17x8xf32> to vector<1x17x8xf32>
    %219 = vector.shape_cast %211 : vector<17x8xf32> to vector<1x17x8xf32>
    %220 = vector.shape_cast %212 : vector<17x8xf32> to vector<1x17x8xf32>
    %221 = tpu.concatenate %213, %214, %215, %216, %217, %218, %219, %220 in 0 : vector<1x17x8xf32>, vector<1x17x8xf32>, vector<1x17x8xf32>, vector<1x17x8xf32>, vector<1x17x8xf32>, vector<1x17x8xf32>, vector<1x17x8xf32>, vector<1x17x8xf32> -> vector<8x17x8xf32>
    %222 = arith.truncf %221 : vector<8x17x8xf32> to vector<8x17x8xbf16>
    %223 = vector.extract_strided_slice %204 {offsets = [0, 32], sizes = [17, 8], strides = [1, 1]} : vector<34x96xf32> to vector<17x8xf32>
    %224 = vector.extract_strided_slice %204 {offsets = [0, 40], sizes = [17, 8], strides = [1, 1]} : vector<34x96xf32> to vector<17x8xf32>
    %225 = vector.extract_strided_slice %204 {offsets = [0, 48], sizes = [17, 8], strides = [1, 1]} : vector<34x96xf32> to vector<17x8xf32>
    %226 = vector.extract_strided_slice %204 {offsets = [0, 56], sizes = [17, 8], strides = [1, 1]} : vector<34x96xf32> to vector<17x8xf32>
    %227 = vector.extract_strided_slice %204 {offsets = [17, 32], sizes = [17, 8], strides = [1, 1]} : vector<34x96xf32> to vector<17x8xf32>
    %228 = vector.extract_strided_slice %204 {offsets = [17, 40], sizes = [17, 8], strides = [1, 1]} : vector<34x96xf32> to vector<17x8xf32>
    %229 = vector.extract_strided_slice %204 {offsets = [17, 48], sizes = [17, 8], strides = [1, 1]} : vector<34x96xf32> to vector<17x8xf32>
    %230 = vector.extract_strided_slice %204 {offsets = [17, 56], sizes = [17, 8], strides = [1, 1]} : vector<34x96xf32> to vector<17x8xf32>
    %231 = vector.shape_cast %223 : vector<17x8xf32> to vector<1x17x8xf32>
    %232 = vector.shape_cast %224 : vector<17x8xf32> to vector<1x17x8xf32>
    %233 = vector.shape_cast %225 : vector<17x8xf32> to vector<1x17x8xf32>
    %234 = vector.shape_cast %226 : vector<17x8xf32> to vector<1x17x8xf32>
    %235 = vector.shape_cast %227 : vector<17x8xf32> to vector<1x17x8xf32>
    %236 = vector.shape_cast %228 : vector<17x8xf32> to vector<1x17x8xf32>
    %237 = vector.shape_cast %229 : vector<17x8xf32> to vector<1x17x8xf32>
    %238 = vector.shape_cast %230 : vector<17x8xf32> to vector<1x17x8xf32>
    %239 = tpu.concatenate %231, %232, %233, %234, %235, %236, %237, %238 in 0 : vector<1x17x8xf32>, vector<1x17x8xf32>, vector<1x17x8xf32>, vector<1x17x8xf32>, vector<1x17x8xf32>, vector<1x17x8xf32>, vector<1x17x8xf32>, vector<1x17x8xf32> -> vector<8x17x8xf32>
    %240 = arith.truncf %239 : vector<8x17x8xf32> to vector<8x17x8xbf16>
    %241 = vector.extract_strided_slice %204 {offsets = [0, 64], sizes = [17, 8], strides = [1, 1]} : vector<34x96xf32> to vector<17x8xf32>
    %242 = vector.extract_strided_slice %204 {offsets = [0, 72], sizes = [17, 8], strides = [1, 1]} : vector<34x96xf32> to vector<17x8xf32>
    %243 = vector.extract_strided_slice %204 {offsets = [0, 80], sizes = [17, 8], strides = [1, 1]} : vector<34x96xf32> to vector<17x8xf32>
    %244 = vector.extract_strided_slice %204 {offsets = [0, 88], sizes = [17, 8], strides = [1, 1]} : vector<34x96xf32> to vector<17x8xf32>
    %245 = vector.extract_strided_slice %204 {offsets = [17, 64], sizes = [17, 8], strides = [1, 1]} : vector<34x96xf32> to vector<17x8xf32>
    %246 = vector.extract_strided_slice %204 {offsets = [17, 72], sizes = [17, 8], strides = [1, 1]} : vector<34x96xf32> to vector<17x8xf32>
    %247 = vector.extract_strided_slice %204 {offsets = [17, 80], sizes = [17, 8], strides = [1, 1]} : vector<34x96xf32> to vector<17x8xf32>
    %248 = vector.extract_strided_slice %204 {offsets = [17, 88], sizes = [17, 8], strides = [1, 1]} : vector<34x96xf32> to vector<17x8xf32>
    %249 = vector.shape_cast %241 : vector<17x8xf32> to vector<1x17x8xf32>
    %250 = vector.shape_cast %242 : vector<17x8xf32> to vector<1x17x8xf32>
    %251 = vector.shape_cast %243 : vector<17x8xf32> to vector<1x17x8xf32>
    %252 = vector.shape_cast %244 : vector<17x8xf32> to vector<1x17x8xf32>
    %253 = vector.shape_cast %245 : vector<17x8xf32> to vector<1x17x8xf32>
    %254 = vector.shape_cast %246 : vector<17x8xf32> to vector<1x17x8xf32>
    %255 = vector.shape_cast %247 : vector<17x8xf32> to vector<1x17x8xf32>
    %256 = vector.shape_cast %248 : vector<17x8xf32> to vector<1x17x8xf32>
    %257 = tpu.concatenate %249, %250, %251, %252, %253, %254, %255, %256 in 0 : vector<1x17x8xf32>, vector<1x17x8xf32>, vector<1x17x8xf32>, vector<1x17x8xf32>, vector<1x17x8xf32>, vector<1x17x8xf32>, vector<1x17x8xf32>, vector<1x17x8xf32> -> vector<8x17x8xf32>
    %258 = arith.truncf %257 : vector<8x17x8xf32> to vector<8x17x8xbf16>
    "tpu.trace_start"() <{level = 10 : i32, message = "gnd,gmd->gnm"}> : () -> ()
    %cst_73 = arith.constant dense<0.000000e+00> : vector<8x17x17xf32>
    %259 = tpu.matmul %222, %240, %cst_73 {dimension_numbers = #tpu.dot_dimension_numbers<[2], [2], [1], [1], [0, 0, 0, 1, 1, 1], [0], [0]>} : vector<8x17x8xbf16>, vector<8x17x8xbf16>, vector<8x17x17xf32> -> vector<8x17x17xf32>
    "tpu.trace_stop"() : () -> ()
    %cst_74 = arith.constant dense<0xFF800000> : vector<8x17xf32>
    %260 = vector.multi_reduction <maximumf>, %259, %cst_74 [2] : vector<8x17x17xf32> to vector<8x17xf32>
    %261 = vector.shape_cast %260 : vector<8x17xf32> to vector<8x17x1xf32>
    %262 = vector.broadcast %261 : vector<8x17x1xf32> to vector<8x17x17xf32>
    %263 = arith.subf %259, %262 : vector<8x17x17xf32>
    %264 = math.exp %263 : vector<8x17x17xf32>
    %cst_75 = arith.constant dense<0.000000e+00> : vector<8x17xf32>
    %265 = vector.multi_reduction <add>, %264, %cst_75 [2] : vector<8x17x17xf32> to vector<8x17xf32>
    %266 = vector.shape_cast %265 : vector<8x17xf32> to vector<8x17x1xf32>
    %267 = tpu.reciprocal %266 {approx = true} : vector<8x17x1xf32> -> vector<8x17x1xf32>
    %268 = vector.broadcast %267 : vector<8x17x1xf32> to vector<8x17x17xf32>
    %269 = arith.mulf %264, %268 : vector<8x17x17xf32>
    %270 = arith.truncf %269 : vector<8x17x17xf32> to vector<8x17x17xbf16>
    "tpu.trace_start"() <{level = 10 : i32, message = "gnm,gmd->gnd"}> : () -> ()
    %cst_76 = arith.constant dense<0.000000e+00> : vector<8x17x8xf32>
    %271 = tpu.matmul %270, %258, %cst_76 {dimension_numbers = #tpu.dot_dimension_numbers<[2], [1], [1], [2], [0, 0, 0, 1, 1, 2], [0], [0]>} : vector<8x17x17xbf16>, vector<8x17x8xbf16>, vector<8x17x8xf32> -> vector<8x17x8xf32>
    "tpu.trace_stop"() : () -> ()
    %272 = vector.extract_strided_slice %271 {offsets = [0, 0, 0], sizes = [1, 17, 8], strides = [1, 1, 1]} : vector<8x17x8xf32> to vector<1x17x8xf32>
    %273 = vector.shape_cast %272 : vector<1x17x8xf32> to vector<17x8xf32>
    %274 = vector.extract_strided_slice %271 {offsets = [1, 0, 0], sizes = [1, 17, 8], strides = [1, 1, 1]} : vector<8x17x8xf32> to vector<1x17x8xf32>
    %275 = vector.shape_cast %274 : vector<1x17x8xf32> to vector<17x8xf32>
    %276 = vector.extract_strided_slice %271 {offsets = [2, 0, 0], sizes = [1, 17, 8], strides = [1, 1, 1]} : vector<8x17x8xf32> to vector<1x17x8xf32>
    %277 = vector.shape_cast %276 : vector<1x17x8xf32> to vector<17x8xf32>
    %278 = vector.extract_strided_slice %271 {offsets = [3, 0, 0], sizes = [1, 17, 8], strides = [1, 1, 1]} : vector<8x17x8xf32> to vector<1x17x8xf32>
    %279 = vector.shape_cast %278 : vector<1x17x8xf32> to vector<17x8xf32>
    %280 = tpu.concatenate %273, %275, %277, %279 in 1 : vector<17x8xf32>, vector<17x8xf32>, vector<17x8xf32>, vector<17x8xf32> -> vector<17x32xf32>
    %281 = vector.extract_strided_slice %271 {offsets = [4, 0, 0], sizes = [1, 17, 8], strides = [1, 1, 1]} : vector<8x17x8xf32> to vector<1x17x8xf32>
    %282 = vector.shape_cast %281 : vector<1x17x8xf32> to vector<17x8xf32>
    %283 = vector.extract_strided_slice %271 {offsets = [5, 0, 0], sizes = [1, 17, 8], strides = [1, 1, 1]} : vector<8x17x8xf32> to vector<1x17x8xf32>
    %284 = vector.shape_cast %283 : vector<1x17x8xf32> to vector<17x8xf32>
    %285 = vector.extract_strided_slice %271 {offsets = [6, 0, 0], sizes = [1, 17, 8], strides = [1, 1, 1]} : vector<8x17x8xf32> to vector<1x17x8xf32>
    %286 = vector.shape_cast %285 : vector<1x17x8xf32> to vector<17x8xf32>
    %287 = vector.extract_strided_slice %271 {offsets = [7, 0, 0], sizes = [1, 17, 8], strides = [1, 1, 1]} : vector<8x17x8xf32> to vector<1x17x8xf32>
    %288 = vector.shape_cast %287 : vector<1x17x8xf32> to vector<17x8xf32>
    %289 = tpu.concatenate %282, %284, %286, %288 in 1 : vector<17x8xf32>, vector<17x8xf32>, vector<17x8xf32>, vector<17x8xf32> -> vector<17x32xf32>
    %290 = tpu.concatenate %280, %289 in 0 : vector<17x32xf32>, vector<17x32xf32> -> vector<34x32xf32>
    %291 = arith.truncf %290 : vector<34x32xf32> to vector<34x32xbf16>
    %c1_77 = arith.constant 1 : index
    %c0_78 = arith.constant 0 : index
    %c0_79 = arith.constant 0 : index
    %292 = vector.load %arg7[%c1_77, %c0_78, %c0_79] : memref<2x32x32xbf16, #tpu.memory_space<vmem>>, vector<1x32x32xbf16>
    %293 = vector.shape_cast %292 : vector<1x32x32xbf16> to vector<32x32xbf16>
    %cst_80 = arith.constant dense<0.000000e+00> : vector<34x32xf32>
    %294 = tpu.matmul %291, %293, %cst_80 {dimension_numbers = #tpu.dot_dimension_numbers<[1], [0], [0], [1], [0, 0, 1, 1], [], []>} : vector<34x32xbf16>, vector<32x32xbf16>, vector<34x32xf32> -> vector<34x32xf32>
    %295 = arith.addf %176, %294 : vector<34x32xf32>
    %c1_81 = arith.constant 1 : index
    %c0_82 = arith.constant 0 : index
    %c0_83 = arith.constant 0 : index
    %296 = vector.load %arg8[%c1_81, %c0_82, %c0_83] : memref<2x1x32xf32, #tpu.memory_space<vmem>>, vector<1x1x32xf32>
    %297 = vector.shape_cast %296 : vector<1x1x32xf32> to vector<1x32xf32>
    %298 = vector.broadcast %297 : vector<1x32xf32> to vector<34x32xf32>
    %299 = arith.addf %295, %298 : vector<34x32xf32>
    %c1_84 = arith.constant 1 : index
    %c0_85 = arith.constant 0 : index
    %c0_86 = arith.constant 0 : index
    %300 = vector.load %arg9[%c1_84, %c0_85, %c0_86] : memref<2x1x32xf32, #tpu.memory_space<vmem>>, vector<1x1x32xf32>
    %301 = vector.shape_cast %300 : vector<1x1x32xf32> to vector<1x32xf32>
    %c1_87 = arith.constant 1 : index
    %c0_88 = arith.constant 0 : index
    %c0_89 = arith.constant 0 : index
    %302 = vector.load %arg10[%c1_87, %c0_88, %c0_89] : memref<2x1x32xf32, #tpu.memory_space<vmem>>, vector<1x1x32xf32>
    %303 = vector.shape_cast %302 : vector<1x1x32xf32> to vector<1x32xf32>
    %cst_90 = arith.constant dense<0.000000e+00> : vector<34xf32>
    %304 = vector.multi_reduction <add>, %299, %cst_90 [1] : vector<34x32xf32> to vector<34xf32>
    %305 = vector.shape_cast %304 : vector<34xf32> to vector<34x1xf32>
    %cst_91 = arith.constant 3.200000e+01 : f32
    %306 = vector.broadcast %cst_91 : f32 to vector<34x1xf32>
    %307 = arith.divf %305, %306 : vector<34x1xf32>
    %308 = vector.broadcast %307 : vector<34x1xf32> to vector<34x32xf32>
    %309 = arith.subf %299, %308 : vector<34x32xf32>
    %310 = arith.mulf %309, %309 : vector<34x32xf32>
    %cst_92 = arith.constant dense<0.000000e+00> : vector<34xf32>
    %311 = vector.multi_reduction <add>, %310, %cst_92 [1] : vector<34x32xf32> to vector<34xf32>
    %312 = vector.shape_cast %311 : vector<34xf32> to vector<34x1xf32>
    %cst_93 = arith.constant 3.200000e+01 : f32
    %313 = vector.broadcast %cst_93 : f32 to vector<34x1xf32>
    %314 = arith.divf %312, %313 : vector<34x1xf32>
    %cst_94 = arith.constant 9.99999974E-6 : f32
    %315 = vector.broadcast %cst_94 : f32 to vector<34x1xf32>
    %316 = arith.addf %314, %315 : vector<34x1xf32>
    %317 = math.rsqrt %316 : vector<34x1xf32>
    %318 = vector.broadcast %317 : vector<34x1xf32> to vector<34x32xf32>
    %319 = arith.mulf %309, %318 : vector<34x32xf32>
    %320 = vector.broadcast %301 : vector<1x32xf32> to vector<34x32xf32>
    %321 = arith.mulf %319, %320 : vector<34x32xf32>
    %322 = vector.broadcast %303 : vector<1x32xf32> to vector<34x32xf32>
    %323 = arith.addf %321, %322 : vector<34x32xf32>
    %324 = arith.truncf %323 : vector<34x32xf32> to vector<34x32xbf16>
    %c1_95 = arith.constant 1 : index
    %c0_96 = arith.constant 0 : index
    %c0_97 = arith.constant 0 : index
    %325 = vector.load %arg11[%c1_95, %c0_96, %c0_97] : memref<2x32x64xbf16, #tpu.memory_space<vmem>>, vector<1x32x64xbf16>
    %326 = vector.shape_cast %325 : vector<1x32x64xbf16> to vector<32x64xbf16>
    %cst_98 = arith.constant dense<0.000000e+00> : vector<34x64xf32>
    %327 = tpu.matmul %324, %326, %cst_98 {dimension_numbers = #tpu.dot_dimension_numbers<[1], [0], [0], [1], [0, 0, 1, 1], [], []>} : vector<34x32xbf16>, vector<32x64xbf16>, vector<34x64xf32> -> vector<34x64xf32>
    %c1_99 = arith.constant 1 : index
    %c0_100 = arith.constant 0 : index
    %c0_101 = arith.constant 0 : index
    %328 = vector.load %arg12[%c1_99, %c0_100, %c0_101] : memref<2x1x64xf32, #tpu.memory_space<vmem>>, vector<1x1x64xf32>
    %329 = vector.shape_cast %328 : vector<1x1x64xf32> to vector<1x64xf32>
    %330 = vector.broadcast %329 : vector<1x64xf32> to vector<34x64xf32>
    %331 = arith.addf %327, %330 : vector<34x64xf32>
    %cst_102 = arith.constant 5.000000e-01 : f32
    %332 = vector.broadcast %cst_102 : f32 to vector<34x64xf32>
    %333 = arith.mulf %332, %331 : vector<34x64xf32>
    %cst_103 = arith.constant 0.707106769 : f32
    %334 = vector.broadcast %cst_103 : f32 to vector<34x64xf32>
    %335 = arith.mulf %331, %334 : vector<34x64xf32>
    %336 = math.erf %335 : vector<34x64xf32>
    %cst_104 = arith.constant 1.000000e+00 : f32
    %337 = vector.broadcast %cst_104 : f32 to vector<34x64xf32>
    %338 = arith.addf %337, %336 : vector<34x64xf32>
    %339 = arith.mulf %333, %338 : vector<34x64xf32>
    %340 = arith.truncf %339 : vector<34x64xf32> to vector<34x64xbf16>
    %c1_105 = arith.constant 1 : index
    %c0_106 = arith.constant 0 : index
    %c0_107 = arith.constant 0 : index
    %341 = vector.load %arg13[%c1_105, %c0_106, %c0_107] : memref<2x64x32xbf16, #tpu.memory_space<vmem>>, vector<1x64x32xbf16>
    %342 = vector.shape_cast %341 : vector<1x64x32xbf16> to vector<64x32xbf16>
    %cst_108 = arith.constant dense<0.000000e+00> : vector<34x32xf32>
    %343 = tpu.matmul %340, %342, %cst_108 {dimension_numbers = #tpu.dot_dimension_numbers<[1], [0], [0], [1], [0, 0, 1, 1], [], []>} : vector<34x64xbf16>, vector<64x32xbf16>, vector<34x32xf32> -> vector<34x32xf32>
    %344 = arith.addf %299, %343 : vector<34x32xf32>
    %c1_109 = arith.constant 1 : index
    %c0_110 = arith.constant 0 : index
    %c0_111 = arith.constant 0 : index
    %345 = vector.load %arg14[%c1_109, %c0_110, %c0_111] : memref<2x1x32xf32, #tpu.memory_space<vmem>>, vector<1x1x32xf32>
    %346 = vector.shape_cast %345 : vector<1x1x32xf32> to vector<1x32xf32>
    %347 = vector.broadcast %346 : vector<1x32xf32> to vector<34x32xf32>
    %348 = arith.addf %344, %347 : vector<34x32xf32>
    %349 = vector.extract_strided_slice %348 {offsets = [0, 0], sizes = [1, 32], strides = [1, 1]} : vector<34x32xf32> to vector<1x32xf32>
    %350 = vector.extract_strided_slice %348 {offsets = [17, 0], sizes = [1, 32], strides = [1, 1]} : vector<34x32xf32> to vector<1x32xf32>
    %351 = tpu.concatenate %349, %350 in 0 : vector<1x32xf32>, vector<1x32xf32> -> vector<2x32xf32>
    %c0_112 = arith.constant 0 : index
    %c0_113 = arith.constant 0 : index
    %352 = vector.load %arg15[%c0_112, %c0_113] : memref<1x32xf32, #tpu.memory_space<vmem>>, vector<1x32xf32>
    %c0_114 = arith.constant 0 : index
    %c0_115 = arith.constant 0 : index
    %353 = vector.load %arg16[%c0_114, %c0_115] : memref<1x32xf32, #tpu.memory_space<vmem>>, vector<1x32xf32>
    %cst_116 = arith.constant dense<0.000000e+00> : vector<2xf32>
    %354 = vector.multi_reduction <add>, %351, %cst_116 [1] : vector<2x32xf32> to vector<2xf32>
    %355 = vector.shape_cast %354 : vector<2xf32> to vector<2x1xf32>
    %cst_117 = arith.constant 3.200000e+01 : f32
    %356 = vector.broadcast %cst_117 : f32 to vector<2x1xf32>
    %357 = arith.divf %355, %356 : vector<2x1xf32>
    %358 = vector.broadcast %357 : vector<2x1xf32> to vector<2x32xf32>
    %359 = arith.subf %351, %358 : vector<2x32xf32>
    %360 = arith.mulf %359, %359 : vector<2x32xf32>
    %cst_118 = arith.constant dense<0.000000e+00> : vector<2xf32>
    %361 = vector.multi_reduction <add>, %360, %cst_118 [1] : vector<2x32xf32> to vector<2xf32>
    %362 = vector.shape_cast %361 : vector<2xf32> to vector<2x1xf32>
    %cst_119 = arith.constant 3.200000e+01 : f32
    %363 = vector.broadcast %cst_119 : f32 to vector<2x1xf32>
    %364 = arith.divf %362, %363 : vector<2x1xf32>
    %cst_120 = arith.constant 9.99999974E-6 : f32
    %365 = vector.broadcast %cst_120 : f32 to vector<2x1xf32>
    %366 = arith.addf %364, %365 : vector<2x1xf32>
    %367 = math.rsqrt %366 : vector<2x1xf32>
    %368 = vector.broadcast %367 : vector<2x1xf32> to vector<2x32xf32>
    %369 = arith.mulf %359, %368 : vector<2x32xf32>
    %370 = vector.broadcast %352 : vector<1x32xf32> to vector<2x32xf32>
    %371 = arith.mulf %369, %370 : vector<2x32xf32>
    %372 = vector.broadcast %353 : vector<1x32xf32> to vector<2x32xf32>
    %373 = arith.addf %371, %372 : vector<2x32xf32>
    %374 = arith.truncf %373 : vector<2x32xf32> to vector<2x32xbf16>
    %c0_121 = arith.constant 0 : index
    %c0_122 = arith.constant 0 : index
    %375 = vector.load %arg17[%c0_121, %c0_122] : memref<32x128xbf16, #tpu.memory_space<vmem>>, vector<32x128xbf16>
    %cst_123 = arith.constant dense<0.000000e+00> : vector<2x128xf32>
    %376 = tpu.matmul %374, %375, %cst_123 {dimension_numbers = #tpu.dot_dimension_numbers<[1], [0], [0], [1], [0, 0, 1, 1], [], []>} : vector<2x32xbf16>, vector<32x128xbf16>, vector<2x128xf32> -> vector<2x128xf32>
    %c0_124 = arith.constant 0 : index
    %c0_125 = arith.constant 0 : index
    %377 = vector.load %arg18[%c0_124, %c0_125] : memref<1x128xf32, #tpu.memory_space<vmem>>, vector<1x128xf32>
    %378 = vector.broadcast %377 : vector<1x128xf32> to vector<2x128xf32>
    %379 = arith.addf %376, %378 : vector<2x128xf32>
    %c0_126 = arith.constant 0 : index
    %c0_127 = arith.constant 0 : index
    %380 = vector.load %arg19[%c0_126, %c0_127] : memref<2x128xf32, #tpu.memory_space<vmem>>, vector<2x128xf32>
    tpu.vector_store %arg19[%c0_126, %c0_127], %379 {strides = array<i32>} : memref<2x128xf32, #tpu.memory_space<vmem>>, vector<2x128xf32>,
    return
  }
  func.func @transform_0(%arg0: i32) -> (i32, i32) {
    %c0_i32 = arith.constant 0 : i32
    %c0_i32_0 = arith.constant 0 : i32
    return %arg0, %c0_i32 : i32, i32
  }
  func.func @transform_1(%arg0: i32) -> (i32, i32) {
    %c0_i32 = arith.constant 0 : i32
    %c0_i32_0 = arith.constant 0 : i32
    %c0_i32_1 = arith.constant 0 : i32
    return %c0_i32, %c0_i32_0 : i32, i32
  }
  func.func @transform_2(%arg0: i32) -> (i32, i32) {
    %c0_i32 = arith.constant 0 : i32
    %c0_i32_0 = arith.constant 0 : i32
    %c0_i32_1 = arith.constant 0 : i32
    return %c0_i32, %c0_i32_0 : i32, i32
  }
  func.func @transform_3(%arg0: i32) -> (i32, i32, i32) {
    %c0_i32 = arith.constant 0 : i32
    %c0_i32_0 = arith.constant 0 : i32
    %c0_i32_1 = arith.constant 0 : i32
    %c0_i32_2 = arith.constant 0 : i32
    return %c0_i32, %c0_i32_0, %c0_i32_1 : i32, i32, i32
  }
  func.func @transform_4(%arg0: i32) -> (i32, i32, i32) {
    %c0_i32 = arith.constant 0 : i32
    %c0_i32_0 = arith.constant 0 : i32
    %c0_i32_1 = arith.constant 0 : i32
    %c0_i32_2 = arith.constant 0 : i32
    return %c0_i32, %c0_i32_0, %c0_i32_1 : i32, i32, i32
  }
  func.func @transform_5(%arg0: i32) -> (i32, i32, i32) {
    %c0_i32 = arith.constant 0 : i32
    %c0_i32_0 = arith.constant 0 : i32
    %c0_i32_1 = arith.constant 0 : i32
    %c0_i32_2 = arith.constant 0 : i32
    return %c0_i32, %c0_i32_0, %c0_i32_1 : i32, i32, i32
  }
  func.func @transform_6(%arg0: i32) -> (i32, i32, i32) {
    %c0_i32 = arith.constant 0 : i32
    %c0_i32_0 = arith.constant 0 : i32
    %c0_i32_1 = arith.constant 0 : i32
    %c0_i32_2 = arith.constant 0 : i32
    return %c0_i32, %c0_i32_0, %c0_i32_1 : i32, i32, i32
  }
  func.func @transform_7(%arg0: i32) -> (i32, i32, i32) {
    %c0_i32 = arith.constant 0 : i32
    %c0_i32_0 = arith.constant 0 : i32
    %c0_i32_1 = arith.constant 0 : i32
    %c0_i32_2 = arith.constant 0 : i32
    return %c0_i32, %c0_i32_0, %c0_i32_1 : i32, i32, i32
  }
  func.func @transform_8(%arg0: i32) -> (i32, i32, i32) {
    %c0_i32 = arith.constant 0 : i32
    %c0_i32_0 = arith.constant 0 : i32
    %c0_i32_1 = arith.constant 0 : i32
    %c0_i32_2 = arith.constant 0 : i32
    return %c0_i32, %c0_i32_0, %c0_i32_1 : i32, i32, i32
  }
  func.func @transform_9(%arg0: i32) -> (i32, i32, i32) {
    %c0_i32 = arith.constant 0 : i32
    %c0_i32_0 = arith.constant 0 : i32
    %c0_i32_1 = arith.constant 0 : i32
    %c0_i32_2 = arith.constant 0 : i32
    return %c0_i32, %c0_i32_0, %c0_i32_1 : i32, i32, i32
  }
  func.func @transform_10(%arg0: i32) -> (i32, i32, i32) {
    %c0_i32 = arith.constant 0 : i32
    %c0_i32_0 = arith.constant 0 : i32
    %c0_i32_1 = arith.constant 0 : i32
    %c0_i32_2 = arith.constant 0 : i32
    return %c0_i32, %c0_i32_0, %c0_i32_1 : i32, i32, i32
  }
  func.func @transform_11(%arg0: i32) -> (i32, i32, i32) {
    %c0_i32 = arith.constant 0 : i32
    %c0_i32_0 = arith.constant 0 : i32
    %c0_i32_1 = arith.constant 0 : i32
    %c0_i32_2 = arith.constant 0 : i32
    return %c0_i32, %c0_i32_0, %c0_i32_1 : i32, i32, i32
  }
  func.func @transform_12(%arg0: i32) -> (i32, i32, i32) {
    %c0_i32 = arith.constant 0 : i32
    %c0_i32_0 = arith.constant 0 : i32
    %c0_i32_1 = arith.constant 0 : i32
    %c0_i32_2 = arith.constant 0 : i32
    return %c0_i32, %c0_i32_0, %c0_i32_1 : i32, i32, i32
  }
  func.func @transform_13(%arg0: i32) -> (i32, i32, i32) {
    %c0_i32 = arith.constant 0 : i32
    %c0_i32_0 = arith.constant 0 : i32
    %c0_i32_1 = arith.constant 0 : i32
    %c0_i32_2 = arith.constant 0 : i32
    return %c0_i32, %c0_i32_0, %c0_i32_1 : i32, i32, i32
  }
  func.func @transform_14(%arg0: i32) -> (i32, i32) {
    %c0_i32 = arith.constant 0 : i32
    %c0_i32_0 = arith.constant 0 : i32
    %c0_i32_1 = arith.constant 0 : i32
    return %c0_i32, %c0_i32_0 : i32, i32
  }
  func.func @transform_15(%arg0: i32) -> (i32, i32) {
    %c0_i32 = arith.constant 0 : i32
    %c0_i32_0 = arith.constant 0 : i32
    %c0_i32_1 = arith.constant 0 : i32
    return %c0_i32, %c0_i32_0 : i32, i32
  }
  func.func @transform_16(%arg0: i32) -> (i32, i32) {
    %c0_i32 = arith.constant 0 : i32
    %c0_i32_0 = arith.constant 0 : i32
    %c0_i32_1 = arith.constant 0 : i32
    return %c0_i32, %c0_i32_0 : i32, i32
  }
  func.func @transform_17(%arg0: i32) -> (i32, i32) {
    %c0_i32 = arith.constant 0 : i32
    %c0_i32_0 = arith.constant 0 : i32
    %c0_i32_1 = arith.constant 0 : i32
    return %c0_i32, %c0_i32_0 : i32, i32
  }
  func.func @transform_18(%arg0: i32) -> (i32, i32) {
    %c0_i32 = arith.constant 0 : i32
    %c0_i32_0 = arith.constant 0 : i32
    return %arg0, %c0_i32 : i32, i32
  }
}

</mosaic_0001>

<bundles_post_ra>
// kernel: tile.9
= control target key start
LH: loop header
LB: loop body
LE: loop exit
PB: predicated region body
PF: predicated region fallthrough
CT: control target
= control target key end

     0   :  { %vm3_vm0 = vcmask 261120   ;;  %s11_s6 = smov 3  ;;  %s74_s0 = inlined_call_operand.vmem [shape: f32[2,17,32], index: 0, kind: input, shape index: {}]   ;;  %s75_s1 = inlined_call_operand.vmem [shape: f32[34,32], index: 1, kind: output, shape index: {}]  }
   0x1   :  { %v2_v0 = vld [vmem:[%s74_s0] sm:$0xff]   ;;  %v26_v1 = vld [vmem:[%s74_s0 + $0x8] sm:$0xff]  }
   0x2   :  { %v28_v2 = vld [vmem:[%s74_s0 + $0x10] ss:$8 sm:%s11_s6]   ;;  %4 = vst.msk [vmem:[%s75_s1] sm:$0xff] %vm3_vm0, %v2_v0   ;;  %27 = vst.msk [vmem:[%s75_s1 + $0x8] sm:$0xff] %vm3_vm0, %v26_v1  }
   0x3   :  { %29 = vst.msk [vmem:[%s75_s1 + $0x10] sm:$0x3] %vm3_vm0, %v28_v2   ;;  %v30_v3 = vld [vmem:[%s74_s0 + $0x19] sm:$0xff]   ;;  %v32_v4 = vld [vmem:[%s74_s0 + $0x21] sm:$0xff]  }
   0x4   :  { %31 = vst.msk [vmem:[%s75_s1 + $0x12] sm:$0xff] %vm3_vm0, %v30_v3   ;;  %33 = vst.msk [vmem:[%s75_s1 + $0x1a] sm:$0xff] %vm3_vm0, %v32_v4  }

// kernel: vit_forward.1
= control target key start
LH: loop header
LB: loop body
LE: loop exit
PB: predicated region body
PF: predicated region fallthrough
CT: control target
= control target key end

     0   :  { %s7347_s0 = inlined_call_operand.vmem [shape: bf16[34,192], index: 0, kind: input, shape index: {}]   ;;  %s7348_s1 = inlined_call_operand.vmem [shape: f32[34,32], index: 1, kind: input, shape index: {}]   ;;  %s7349_s2 = inlined_call_operand.vmem [shape: bf16[192,32], index: 2, kind: input, shape index: {}]   ;;  %s7350_s3 = inlined_call_operand.vmem [shape: f32[2,1,32], index: 3, kind: input, shape index: {}]   ;;  %s7351_s4 = inlined_call_operand.vmem [shape: f32[2,1,32], index: 4, kind: input, shape index: {}]   ;;  %s7352_s5 = inlined_call_operand.vmem [shape: bf16[2,32,96], index: 5, kind: input, shape index: {}]   ;;  %s7353_s6 = inlined_call_operand.vmem [shape: bf16[2,32,32], index: 6, kind: input, shape index: {}]   ;;  %s7354_s7 = inlined_call_operand.vmem [shape: f32[2,1,32], index: 7, kind: input, shape index: {}]   ;;  %s7355_s8 = inlined_call_operand.vmem [shape: f32[2,1,32], index: 8, kind: input, shape index: {}]   ;;  %s7356_s9 = inlined_call_operand.vmem [shape: f32[2,1,32], index: 9, kind: input, shape index: {}]   ;;  %s7357_s10 = inlined_call_operand.vmem [shape: bf16[2,32,64], index: 10, kind: input, shape index: {}]   ;;  %s7358_s11 = inlined_call_operand.vmem [shape: f32[2,1,64], index: 11, kind: input, shape index: {}]   ;;  %s7359_s12 = inlined_call_operand.vmem [shape: bf16[2,64,32], index: 12, kind: input, shape index: {}]   ;;  %s7360_s13 = inlined_call_operand.vmem [shape: f32[2,1,32], index: 13, kind: input, shape index: {}]   ;;  %s7361_s14 = inlined_call_operand.vmem [shape: f32[1,32], index: 14, kind: input, shape index: {}]   ;;  %s7362_s15 = inlined_call_operand.vmem [shape: f32[1,32], index: 15, kind: input, shape index: {}]   ;;  %s7363_s16 = inlined_call_operand.vmem [shape: bf16[32,128], index: 16, kind: input, shape index: {}]   ;;  %s7364_s17 = inlined_call_operand.vmem [shape: f32[1,128], index: 17, kind: input, shape index: {}]   ;;  %s7365_s18 = inlined_call_operand.hbm [shape: f32[2,128], index: 18, kind: output, shape index: {}]  }
   0x1   :  { %7371 = sst [smem:[#allocation5_spill]] %s7347_s0 }
   0x2   :  { %7372 = sst [smem:[#allocation6_spill]] %s7348_s1 }
   0x3   :  { %7373 = sst [smem:[#allocation7_spill]] %s7349_s2 }
   0x4   :  { %s7374_s29 = sld [smem:[#allocation7_spill]]  ;;  %v5788_v1 = vmov 0   ;;  %vm191_vm0 = vcmask 523264   ;;  %s7375_s23 = sld [smem:[#allocation5_spill]] }
   0x5   :  { %201 = vmatprep.subr.bf16.mxu0 %v5788_v1 }
   0xa   :  { %v5468_v0 = vld [vmem:[%s7374_s29] sm:$0xff]   ;;  %v5469_v2 = vld [vmem:[%s7374_s29 + $0x8] sm:$0xff]   ;;  %v5470_v3 = vld [vmem:[%s7374_s29 + $0x10] sm:$0xff]  }
   0xb   :  { %202 = vmatpush1.bf16.msra.mxu0 %v5468_v0  ;;  %v5471_v4 = vld [vmem:[%s7374_s29 + $0x18] sm:$0xff]   ;;  %v5482_v5 = vld [vmem:[%s7375_s23 + $0x4] ss:$8 sps:$4 sm:$0xff]   ;;  %v5474_v8 = vld [vmem:[%s7374_s29 + $0x30] sm:$0xff]  }
   0xc   :  { %203 = vmatprep.subr.bf16.mxu0 %v5788_v1  ;;  %v5472_v6 = vld [vmem:[%s7374_s29 + $0x20] sm:$0xff]   ;;  %4571 = vmatprep.mubr.msk.bf16.mxu0 %vm191_vm0, %v5482_v5  ;;  %v5473_v7 = vld [vmem:[%s7374_s29 + $0x28] sm:$0xff]   ;;  %v5475_v9 = vld [vmem:[%s7374_s29 + $0x38] sm:$0xff]  }
   0xd   :  { %v5476_v10 = vld [vmem:[%s7374_s29 + $0x40] sm:$0xff]  }
   0xf   :  { %204 = vmatpush1.bf16.msra.mxu0 %v5469_v2 }
  0x10   :  { %205 = vmatprep.subr.bf16.mxu0 %v5788_v1 }
  0x13   :  { %206 = vmatpush1.bf16.msra.mxu0 %v5470_v3 }
  0x14   :  { %207 = vmatprep.subr.bf16.mxu0 %v5788_v1 }
  0x17   :  { %208 = vmatpush1.bf16.msra.mxu0 %v5471_v4 }
  0x18   :  { %209 = vmatprep.subr.bf16.mxu0 %v5788_v1 }
  0x1b   :  { %210 = vmatpush1.bf16.msra.mxu0 %v5472_v6 }
  0x1c   :  { %211 = vmatprep.subr.bf16.mxu0 %v5788_v1 }
  0x1f   :  { %212 = vmatpush1.bf16.msra.mxu0 %v5473_v7 }
  0x20   :  { %213 = vmatprep.subr.bf16.mxu0 %v5788_v1 }
  0x23   :  { %214 = vmatpush1.bf16.msra.mxu0 %v5474_v8 }
  0x24   :  { %215 = vmatprep.subr.bf16.mxu0 %v5788_v1 }
  0x27   :  { %216 = vmatpush1.bf16.msra.mxu0 %v5475_v9 }
  0x28   :  { %23 = vsyncpa [#allocation3], 0  ;;  %217 = vmatprep.subr.bf16.mxu0 %v5788_v1  ;;  %v5477_v11 = vld [vmem:[%s7374_s29 + $0x48] sm:$0xff]   ;;  %v5478_v12 = vld [vmem:[%s7374_s29 + $0x50] sm:$0xff]   ;;  %s7376_s2 = sld [smem:[#allocation6_spill]]  ;;  %vm259_vm1 = vcmask 261120  }
  0x29   :  { %v5479_v13 = vld [vmem:[%s7374_s29 + $0x58] sm:$0xff]   ;;  %v5480_v14 = vld [vmem:[%s7375_s23] ss:$8 sps:$4 sm:$0xff]   ;;  %vm272_vm2 = vcmask 254976   ;;  %vm5790_vm3 = vmmov 0   ;;  %vm523_vm4 = vcmask 64512  }
  0x2a   :  { %v5483_v15 = vld [vmem:[%s7375_s23 + $0x14] ss:$8 sps:$4 sm:$0xff]   ;;  %v65_v16 = vld [vmem:[%s7375_s23 + $0x20] sm:$0x11]  ;;  %v5485_v17 = vld [vmem:[%s7375_s23 + $0x10] ss:$8 sps:$4 sm:$0xff]  }
  0x2b   :  { %218 = vmatpush1.bf16.msra.mxu0 %v5476_v10  ;;  %v4558_v18 = vcombine.high %v65_v16, %v65_v16  ;;  %v4557_v19 = vcombine.low %v65_v16, %v65_v16  ;;  %v5488_v9 = vld [vmem:[%s7352_s5] sm:$0xff]   ;;  %v5789_v10 = vmov 0.0   ;;  %s5791_s25 = smov 120   ;;  %s5792_s23 = smov 112   ;;  %vm465_vm5 = vcmask 1046528  }
  0x2c   :  { %219 = vmatprep.subr.bf16.mxu0 %v5788_v1  ;;  %4904 = vmatprep.subr.bf16.mxu1 %v5789_v10  ;;  %s5793_s26 = smov 104   ;;  %s5794_s27 = smov 96   ;;  %vm1053_vm6 = vcmask 131072   ;;  %vm1046_vm7 = vcmask 138240   ;;  %vm1339_vm8 = vcmask 1040384   ;;  %vm1866_vm9 = vcmask 130048  }
  0x2d   :  { %4905 = vmatpush3.bf16.msra.mxu1 %v5488_v9  ;;  %4908 = vmatprep.mubr.msk.bf16.mxu1 %vm5790_vm3, %v5789_v10  ;;  %s5795_s28 = smov 64   ;;  %s5796_s30 = smov 8   ;;  %vm1870_vm10 = vcmask 195584  }
  0x2e   :  { %v90_v20 = vld [vmem:[%s7376_s2] sm:$0xff]  ;;  %v91_v22 = vld [vmem:[%s7376_s2 + $0x8] sm:$0xff]  ;;  %v92_v29 = vld [vmem:[%s7376_s2 + $0x10] sm:$0xff]  ;;  %4906 = vmatprep.subr.bf16.mxu1 %v5789_v10  ;;  %s7369_s29 = smov 24   ;;  %s5798_s21 = smov 16  }
  0x2f   :  { %220 = vmatpush1.bf16.msra.mxu0 %v5477_v11  ;;  %v93_v32 = vld [vmem:[%s7376_s2 + $0x18] sm:$0xff]  ;;  %v94_v39 = vld [vmem:[%s7376_s2 + $0x20] sm:$0x3]  ;;  %v5489_v11 = vld [vmem:[%s7352_s5 + $0x8] sm:$0xff]   ;;  %s5799_s20 = smov [#allocation2]  }
  0x30   :  { %221 = vmatprep.subr.bf16.mxu0 %v5788_v1 }
  0x31   :  { %4907 = vmatpush3.bf16.msra.mxu1 %v5489_v11 }
  0x33   :  { %222 = vmatpush1.bf16.msra.mxu0 %v5478_v12 }
  0x34   :  { %223 = vmatprep.subr.bf16.mxu0 %v5788_v1 }
  0x37   :  { %224 = vmatpush1.bf16.msra.mxu0 %v5479_v13 }
  0x3a   :  { %234 = vmatmul.mubr.bf16.vlgmr.msra.gmra.mrb[0].mxu0 %v5480_v14 }
  0x3b   :  { %4572 = vmatprep.mubr.msk.bf16.mxu0 %vm191_vm0, %v5483_v15 }
  0x42   :  { %242 = vmatmul.mubr.bf16.gmra.mrb[4].mxu0 %v5485_v17 }
  0x43   :  { %4573 = vmatprep.mubr.msk.bf16.mxu0 %vm191_vm0, %v4558_v18 }
  0x4a   :  { %250 = vmatmul.mubr.bf16.gmra.mrb[8].mxu0 %v4557_v19 }
 0x10d   :  { %v235_v21 = vpop.f32.mrb[0].mxu0 }
 0x10e   :  { %v5967_v23 = vadd.f32 %v235_v21, %v90_v20  ;;  %v237_v24 = vpop.f32.mrb[1].mxu0 }
 0x10f   :  { %v238_v25 = vpop.f32.mrb[2].mxu0 }
 0x110   :  { %v5969_v26 = vadd.f32 %v238_v25, %v91_v22  ;;  %v240_v27 = vpop.f32.mrb[3].mxu0  ;;  %v260_v28 = vsel %vm259_vm1, %v5967_v23, 0.0 }
 0x111   :  { %261 = vadd.xlane.f32.xlu0 %v260_v28 }
 0x112   :  { %v263_v30 = vsel %vm259_vm1, %v5969_v26, 0.0 }
 0x115   :  { %v243_v31 = vpop.f32.mrb[4].mxu0  ;;  %264 = vadd.xlane.f32.xlu0 %v263_v30  ;;  %v4574_v30 = vld [vmem:[%s7350_s3] ss:$0 sm:$0xff] }
 0x116   :  { %v5981_v33 = vadd.f32 %v243_v31, %v92_v29  ;;  %v245_v34 = vpop.f32.mrb[5].mxu0 }
 0x117   :  { %v246_v35 = vpop.f32.mrb[6].mxu0 }
 0x118   :  { %v5983_v36 = vadd.f32 %v246_v35, %v93_v32  ;;  %v248_v37 = vpop.f32.mrb[7].mxu0  ;;  %v266_v38 = vsel %vm259_vm1, %v5981_v33, 0.0 }
 0x119   :  { %267 = vadd.xlane.f32.xlu1 %v266_v38  ;;  %v4575_v37 = vld [vmem:[%s7351_s4] ss:$0 sm:$0xff] }
 0x11a   :  { %v269_v40 = vsel %vm259_vm1, %v5983_v36, 0.0 }
 0x11d   :  { %v251_v41 = vpop.f32.mrb[8].mxu0  ;;  %270 = vadd.xlane.f32.xlu1 %v269_v40 }
 0x11e   :  { %v5992_v42 = vadd.f32 %v251_v41, %v94_v39  ;;  %v253_v43 = vpop.f32.mrb[9].mxu0 }
 0x11f   :  { %v254_v44 = vpop.f32.mrb[10].mxu0 }
 0x120   :  { %v255_v45 = vpop.f32.mrb[11].mxu0  ;;  %v273_v46 = vsel %vm272_vm2, %v5992_v42, 0.0 }
 0x121   :  { %274 = vadd.xlane.f32.xlu0 %v273_v46 }
 0x19e   :  { %v262_v47 = vpop.xlane.xlu0 %261 }
 0x19f   :  { %v277_v48 = vmul.f32 0.03125, %v262_v47 }
 0x1a1   :  { %v282_v49 = vsub.f32 %v5967_v23, %v277_v48 }
 0x1a2   :  { %v265_v50 = vpop.xlane.xlu0 %264 }
 0x1a3   :  { %v278_v51 = vmul.f32 0.03125, %v265_v50  ;;  %v287_v52 = vmul.f32 %v282_v49, %v282_v49 }
 0x1a5   :  { %v283_v53 = vsub.f32 %v5969_v26, %v278_v51  ;;  %v292_v54 = vsel %vm259_vm1, %v287_v52, 0.0 }
 0x1a6   :  { %v268_v55 = vpop.xlane.xlu1 %267  ;;  %293 = vadd.xlane.f32.xlu1 %v292_v54 }
 0x1a7   :  { %v279_v56 = vmul.f32 0.03125, %v268_v55  ;;  %v288_v57 = vmul.f32 %v283_v53, %v283_v53 }
 0x1a9   :  { %v284_v58 = vsub.f32 %v5981_v33, %v279_v56  ;;  %v295_v59 = vsel %vm259_vm1, %v288_v57, 0.0 }
 0x1aa   :  { %v271_v60 = vpop.xlane.xlu1 %270  ;;  %296 = vadd.xlane.f32.xlu0 %v295_v59 }
 0x1ab   :  { %v280_v61 = vmul.f32 0.03125, %v271_v60  ;;  %v289_v62 = vmul.f32 %v284_v58, %v284_v58 }
 0x1ad   :  { %v285_v63 = vsub.f32 %v5983_v36, %v280_v61  ;;  %v298_v0 = vsel %vm259_vm1, %v289_v62, 0.0 }
 0x1ae   :  { %299 = vadd.xlane.f32.xlu1 %v298_v0  ;;  %v275_v2 = vpop.xlane.xlu0 %274 }
 0x1af   :  { %v281_v3 = vmul.f32 0.03125, %v275_v2  ;;  %v290_v4 = vmul.f32 %v285_v63, %v285_v63 }
 0x1b1   :  { %v286_v5 = vsub.f32 %v5992_v42, %v281_v3  ;;  %v301_v6 = vsel %vm259_vm1, %v290_v4, 0.0 }
 0x1b2   :  { %302 = vadd.xlane.f32.xlu0 %v301_v6 }
 0x1b3   :  { %v291_v7 = vmul.f32 %v286_v5, %v286_v5 }
 0x1b5   :  { %v304_v8 = vsel %vm272_vm2, %v291_v7, 0.0 }
 0x1b6   :  { %305 = vadd.xlane.f32.xlu1 %v304_v8 }
 0x233   :  { %v294_v12 = vpop.xlane.xlu1 %293 }
 0x234   :  { %v307_v13 = vmul.f32 0.03125, %v294_v12 }
 0x236   :  { %v312_v14 = vadd.f32 1e-05, %v307_v13 }
 0x237   :  { %v297_v15 = vpop.xlane.xlu0 %296 }
 0x238   :  { %5510 = vrsqrt.f32 %v312_v14  ;;  %v308_v16 = vmul.f32 0.03125, %v297_v15 }
 0x23a   :  { %v313_v17 = vadd.f32 1e-05, %v308_v16 }
 0x23b   :  { %v300_v18 = vpop.xlane.xlu1 %299 }
 0x23c   :  { %5512 = vrsqrt.f32 %v313_v17  ;;  %v309_v19 = vmul.f32 0.03125, %v300_v18 }
 0x23e   :  { %v314_v20 = vadd.f32 1e-05, %v309_v19 }
 0x23f   :  { %v303_v21 = vpop.xlane.xlu0 %302 }
 0x240   :  { %5514 = vrsqrt.f32 %v314_v20  ;;  %v310_v22 = vmul.f32 0.03125, %v303_v21 }
 0x242   :  { %v5511_v24 = vpop.eup %5510  ;;  %v315_v25 = vadd.f32 1e-05, %v310_v22 }
 0x243   :  { %v306_v27 = vpop.xlane.xlu1 %305  ;;  %v322_v28 = vmul.f32 %v5511_v24, %v282_v49 }
 0x244   :  { %5516 = vrsqrt.f32 %v315_v25  ;;  %v311_v29 = vmul.f32 0.03125, %v306_v27 }
 0x245   :  { %v333_v35 = vmul.f32 %v4574_v30, %v322_v28 }
 0x246   :  { %v5513_v31 = vpop.eup %5512  ;;  %v316_v32 = vadd.f32 1e-05, %v311_v29 }
 0x247   :  { %v323_v34 = vmul.f32 %v5513_v31, %v283_v53  ;;  %v344_v40 = vadd.f32 %v4575_v37, %v333_v35 }
 0x248   :  { %5518 = vrsqrt.f32 %v316_v32 }
 0x249   :  { %v334_v38 = vmul.f32 %v4574_v30, %v323_v34 }
 0x24a   :  { %v5515_v39 = vpop.eup %5514 }
 0x24b   :  { %v345_v41 = vadd.f32 %v4575_v37, %v334_v38  ;;  %v324_v43 = vmul.f32 %v5515_v39, %v284_v58 }
 0x24d   :  { %v349_v44 = vpack.c.bf16 %v345_v41, %v344_v40  ;;  %v335_v47 = vmul.f32 %v4574_v30, %v324_v43 }
 0x24e   :  { %v5517_v45 = vpop.eup %5516 }
 0x24f   :  { %4909 = vmatmul.mubr.msk.bf16.vlgmr.msra.gmra.mrb[0].mxu1 %vm259_vm1, %v349_v44  ;;  %v325_v46 = vmul.f32 %v5517_v45, %v285_v63  ;;  %v346_v50 = vadd.f32 %v4575_v37, %v335_v47 }
 0x250   :  { %4912 = vmatprep.mubr.msk.bf16.mxu1 %vm5790_vm3, %v5789_v10 }
 0x251   :  { %v336_v48 = vmul.f32 %v4574_v30, %v325_v46 }
 0x252   :  { %v5519_v49 = vpop.eup %5518 }
 0x253   :  { %v347_v51 = vadd.f32 %v4575_v37, %v336_v48  ;;  %v326_v52 = vmul.f32 %v5519_v49, %v286_v5 }
 0x255   :  { %v350_v53 = vpack.c.bf16 %v347_v51, %v346_v50  ;;  %v337_v54 = vmul.f32 %v4574_v30, %v326_v52 }
 0x257   :  { %4913 = vmatmul.mubr.msk.bf16.gmra.mrb[4].mxu1 %vm259_vm1, %v350_v53  ;;  %v348_v55 = vadd.f32 %v4575_v37, %v337_v54 }
 0x258   :  { %4916 = vmatprep.mubr.msk.bf16.mxu1 %vm5790_vm3, %v5789_v10 }
 0x259   :  { %v351_v56 = vpack.c.bf16 %v348_v55, %v348_v55 }
 0x25f   :  { %4917 = vmatmul.mubr.msk.bf16.gmra.mrb[8].mxu1 %vm259_vm1, %v351_v56 }
 0x322   :  { %v411_v57 = vpop.f32.mrb[0].mxu1 }
 0x323   :  { %v4910_v58 = vpop.f32.mrb[1].mxu1 }
 0x324   :  { %v414_v59 = vpop.f32.mrb[2].mxu1 }
 0x325   :  { %v6029_v60 = vpack.c.bf16 %v414_v59, %v411_v57  ;;  %v4911_v61 = vpop.f32.mrb[3].mxu1  ;;  %v5348_v62 = vpack.i.bf16 %v414_v59, %v411_v57 }
 0x327   :  { %5349 = vrot.lane.b32.xlu0 %v5348_v62, %s5791_s25  ;;  %4924 = vmatprep.mubr.msk.bf16.mxu1 %vm523_vm4, %v6029_v60 }
 0x32a   :  { %v419_v63 = vpop.f32.mrb[4].mxu1 }
 0x32b   :  { %449 = vrot.lane.b32.xlu0 %v419_v63, %s5792_s23  ;;  %440 = vrot.lane.b32.xlu1 %v419_v63, %s5791_s25  ;;  %v4914_v0 = vpop.f32.mrb[5].mxu1  ;;  %v466_v3 = vrot.slane %v419_v63, 1  ;;  %v6049_v16 = vpack.c.bf16 %v419_v63, %v419_v63 }
 0x32c   :  { %v422_v2 = vpop.f32.mrb[6].mxu1 }
 0x32d   :  { %v467_v4 = vrot.slane %v422_v2, 1  ;;  %v4915_v5 = vpop.f32.mrb[7].mxu1 }
 0x32f   :  { %v468_v6 = vsel %vm465_vm5, %v466_v3, %v467_v4  ;;  %5354 = vrot.lane.b32.xlu1 %v5348_v62, %s5792_s23 }
 0x332   :  { %v427_v7 = vpop.f32.mrb[8].mxu1 }
 0x333   :  { %v469_v8 = vrot.slane %v427_v7, 1  ;;  %5359 = vrot.lane.b32.xlu1 %v5348_v62, %s5793_s26  ;;  %v4918_v9 = vpop.f32.mrb[9].mxu1 }
 0x334   :  { %v430_v11 = vpop.f32.mrb[10].mxu1 }
 0x335   :  { %v4919_v12 = vpop.f32.mrb[11].mxu1  ;;  %v470_v13 = vsel %vm465_vm5, %v467_v4, %v469_v8  ;;  %v6084_v48 = vpack.c.bf16 %v469_v8, %v469_v8 }
 0x336   :  { %v5363_v14 = vpack.i.bf16 %v470_v13, %v468_v6  ;;  %v6040_v15 = vpack.c.bf16 %v470_v13, %v468_v6 }
 0x337   :  { %458 = vrot.lane.b32.xlu1 %v419_v63, %s5793_s26 }
 0x338   :  { %5364 = vrot.lane.b32.xlu0 %v5363_v14, %s5791_s25 }
 0x33b   :  { %478 = vrot.lane.b32.xlu1 %v469_v8, %s5791_s25 }
 0x33c   :  { %519 = vrot.lane.b32.xlu0 %v6029_v60, %s5794_s27 }
 0x33f   :  { %5369 = vrot.lane.b32.xlu1 %v5363_v14, %s5792_s23 }
 0x340   :  { %5374 = vrot.lane.b32.xlu0 %v5363_v14, %s5793_s26 }
 0x343   :  { %521 = vrot.lane.b32.xlu1 %v6049_v16, %s5794_s27 }
 0x344   :  { %487 = vrot.lane.b32.xlu0 %v469_v8, %s5792_s23 }
 0x347   :  { %496 = vrot.lane.b32.xlu1 %v469_v8, %s5793_s26 }
 0x399   :  { %v5350_v17 = vpop.permute.xlu0 %5349 }
 0x39a   :  { %v5352_v18 = vunpack.i.h.bf16 %v5350_v17  ;;  %v5351_v19 = vunpack.i.l.bf16 %v5350_v17 }
 0x39c   :  { %v503_v20 = vpack.c.bf16 %v5352_v18, %v5351_v19 }
 0x39d   :  { %v441_v21 = vpop.permute.xlu1 %440  ;;  %v450_v30 = vpop.permute.xlu0 %449 }
 0x39e   :  { %v6055_v22 = vpack.c.bf16 %v441_v21, %v441_v21  ;;  %586 = vrot.lane.b32.xlu0 %v503_v20, %s5794_s27  ;;  %v6066_v35 = vpack.c.bf16 %v450_v30, %v450_v30 }
 0x3a0   :  { %588 = vrot.lane.b32.xlu1 %v6055_v22, %s5794_s27 }
 0x3a1   :  { %v5355_v24 = vpop.permute.xlu1 %5354 }
 0x3a2   :  { %v5357_v25 = vunpack.i.h.bf16 %v5355_v24  ;;  %v5356_v27 = vunpack.i.l.bf16 %v5355_v24 }
 0x3a4   :  { %v6060_v28 = vpack.c.bf16 %v5357_v25, %v5356_v27 }
 0x3a5   :  { %v5360_v29 = vpop.permute.xlu1 %5359 }
 0x3a6   :  { %v5362_v31 = vunpack.i.h.bf16 %v5360_v29  ;;  %v5361_v32 = vunpack.i.l.bf16 %v5360_v29  ;;  %652 = vrot.lane.b32.xlu0 %v6060_v28, %s5794_s27 }
 0x3a8   :  { %v6064_v34 = vpack.c.bf16 %v5362_v31, %v5361_v32 }
 0x3a9   :  { %v459_v37 = vpop.permute.xlu1 %458 }
 0x3aa   :  { %4948 = vmatprep.mubr.msk.bf16.mxu0 %vm523_vm4, %v6064_v34  ;;  %718 = vrot.lane.b32.xlu1 %v6064_v34, %s5794_s27  ;;  %v5365_v38 = vpop.permute.xlu0 %5364  ;;  %v6074_v39 = vpack.c.bf16 %v459_v37, %v459_v37 }
 0x3ab   :  { %654 = vrot.lane.b32.xlu0 %v6066_v35, %s5794_s27  ;;  %v5367_v40 = vunpack.i.h.bf16 %v5365_v38  ;;  %v5366_v41 = vunpack.i.l.bf16 %v5365_v38 }
 0x3ad   :  { %v479_v43 = vpop.permute.xlu1 %478  ;;  %v6082_v46 = vpack.c.bf16 %v5367_v40, %v5366_v41 }
 0x3ae   :  { %720 = vrot.lane.b32.xlu1 %v6074_v39, %s5794_s27  ;;  %v520_v44 = vpop.permute.xlu0 %519  ;;  %v6090_v52 = vpack.c.bf16 %v479_v43, %v479_v43 }
 0x3af   :  { %784 = vrot.lane.b32.xlu0 %v6040_v15, %s5794_s27  ;;  %5304 = vmatprep.subr.msk.bf16.mxu1 %vm523_vm4, %v520_v44  ;;  %v531_v45 = vsel %vm523_vm4, %v520_v44, 0 }
 0x3b0   :  { %4921 = vmatpush3.bf16.xpose.msra.mxu1 %v531_v45 }
 0x3b1   :  { %v5370_v47 = vpop.permute.xlu1 %5369 }
 0x3b2   :  { %v5372_v49 = vunpack.i.h.bf16 %v5370_v47  ;;  %v5371_v50 = vunpack.i.l.bf16 %v5370_v47  ;;  %v5375_v51 = vpop.permute.xlu0 %5374  ;;  %850 = vrot.lane.b32.xlu1 %v6082_v46, %s5794_s27 }
 0x3b3   :  { %786 = vrot.lane.b32.xlu0 %v6084_v48, %s5794_s27  ;;  %v5377_v53 = vunpack.i.h.bf16 %v5375_v51  ;;  %v5376_v54 = vunpack.i.l.bf16 %v5375_v51 }
 0x3b4   :  { %v6092_v55 = vpack.c.bf16 %v5372_v49, %v5371_v50 }
 0x3b5   :  { %v522_v56 = vpop.permute.xlu1 %521  ;;  %v6102_v61 = vpack.c.bf16 %v5377_v53, %v5376_v54 }
 0x3b6   :  { %5305 = vmatprep.subr.msk.bf16.mxu1 %vm523_vm4, %v522_v56  ;;  %v488_v57 = vpop.permute.xlu0 %487  ;;  %852 = vrot.lane.b32.xlu1 %v6090_v52, %s5794_s27  ;;  %v534_v58 = vsel %vm523_vm4, %v522_v56, 0 }
 0x3b7   :  { %v6098_v59 = vpack.c.bf16 %v488_v57, %v488_v57  ;;  %916 = vrot.lane.b32.xlu0 %v6092_v55, %s5794_s27 }
 0x3b8   :  { %4923 = vmatpush3.bf16.xpose.msra.mxu1 %v534_v58 }
 0x3b9   :  { %v497_v62 = vpop.permute.xlu1 %496 }
 0x3ba   :  { %982 = vrot.lane.b32.xlu1 %v6102_v61, %s5794_s27  ;;  %v6108_v63 = vpack.c.bf16 %v497_v62, %v497_v62 }
 0x3bb   :  { %918 = vrot.lane.b32.xlu0 %v6098_v59, %s5794_s27 }
 0x3be   :  { %984 = vrot.lane.b32.xlu1 %v6108_v63, %s5794_s27 }
 0x3bf   :  { %1328 = vrot.lane.b32.xlu0 %v6029_v60, %s5795_s28  ;;  %4925 = vmatmul.mubr.msk.bf16.vlgmr.msra.gmra.mrb[12].mxu1 %vm523_vm4, %v6049_v16 }
 0x3c0   :  { %4932 = vmatprep.mubr.msk.bf16.mxu1 %vm523_vm4, %v503_v20 }
 0x3c2   :  { %1393 = vrot.lane.b32.xlu1 %v503_v20, %s5795_s28 }
 0x410   :  { %v587_v0 = vpop.permute.xlu0 %586 }
 0x411   :  { %5306 = vmatprep.subr.msk.bf16.mxu1 %vm523_vm4, %v587_v0  ;;  %v597_v2 = vsel %vm523_vm4, %v587_v0, 0 }
 0x412   :  { %v589_v3 = vpop.permute.xlu1 %588  ;;  %4929 = vmatpush3.bf16.xpose.msra.mxu1 %v597_v2 }
 0x413   :  { %5307 = vmatprep.subr.msk.bf16.mxu1 %vm523_vm4, %v589_v3  ;;  %v600_v4 = vsel %vm523_vm4, %v589_v3, 0 }
 0x418   :  { %v653_v5 = vpop.permute.xlu0 %652 }
 0x419   :  { %v663_v8 = vsel %vm523_vm4, %v653_v5, 0 }
 0x41a   :  { %4931 = vmatpush3.bf16.xpose.msra.mxu1 %v600_v4 }
 0x41b   :  { %5308 = vmatprep.subr.msk.bf16.mxu1 %vm523_vm4, %v653_v5 }
 0x41c   :  { %v719_v60 = vpop.permute.xlu1 %718 }
 0x41d   :  { %5310 = vmatprep.subr.msk.bf16.mxu0 %vm523_vm4, %v719_v60  ;;  %v729_v6 = vsel %vm523_vm4, %v719_v60, 0  ;;  %v655_v9 = vpop.permute.xlu0 %654 }
 0x41e   :  { %4945 = vmatpush3.bf16.xpose.msra.mxu0 %v729_v6  ;;  %v666_v13 = vsel %vm523_vm4, %v655_v9, 0 }
 0x420   :  { %v721_v7 = vpop.permute.xlu1 %720 }
 0x421   :  { %4933 = vmatmul.mubr.msk.bf16.vlgmr.msra.gmra.mrb[16].mxu1 %vm523_vm4, %v6055_v22  ;;  %5311 = vmatprep.subr.msk.bf16.mxu0 %vm523_vm4, %v721_v7  ;;  %v732_v11 = vsel %vm523_vm4, %v721_v7, 0  ;;  %v785_v14 = vpop.permute.xlu0 %784 }
 0x422   :  { %4937 = vmatpush3.bf16.xpose.msra.mxu1 %v663_v8  ;;  %4940 = vmatprep.mubr.msk.bf16.mxu1 %vm523_vm4, %v6060_v28  ;;  %v795_v19 = vsel %vm523_vm4, %v785_v14, 0 }
 0x423   :  { %5309 = vmatprep.subr.msk.bf16.mxu1 %vm523_vm4, %v655_v9 }
 0x424   :  { %v851_v12 = vpop.permute.xlu1 %850 }
 0x425   :  { %v861_v17 = vsel %vm523_vm4, %v851_v12, 0  ;;  %v787_v20 = vpop.permute.xlu0 %786 }
 0x426   :  { %4947 = vmatpush3.bf16.xpose.msra.mxu0 %v732_v11  ;;  %v798_v25 = vsel %vm523_vm4, %v787_v20, 0 }
 0x427   :  { %5314 = vmatprep.subr.msk.bf16.mxu0 %vm523_vm4, %v851_v12 }
 0x428   :  { %v853_v18 = vpop.permute.xlu1 %852 }
 0x429   :  { %v864_v21 = vsel %vm523_vm4, %v853_v18, 0  ;;  %v917_v27 = vpop.permute.xlu0 %916 }
 0x42a   :  { %4939 = vmatpush3.bf16.xpose.msra.mxu1 %v666_v13  ;;  %v927_v31 = vsel %vm523_vm4, %v917_v27, 0 }
 0x42b   :  { %5312 = vmatprep.subr.msk.bf16.mxu1 %vm523_vm4, %v785_v14 }
 0x42c   :  { %v983_v24 = vpop.permute.xlu1 %982 }
 0x42d   :  { %4949 = vmatmul.mubr.msk.bf16.vlgmr.msra.gmra.mrb[12].mxu0 %vm523_vm4, %v6074_v39  ;;  %v993_v29 = vsel %vm523_vm4, %v983_v24, 0  ;;  %v919_v32 = vpop.permute.xlu0 %918 }
 0x42e   :  { %4961 = vmatpush3.bf16.xpose.msra.mxu0 %v861_v17  ;;  %4964 = vmatprep.mubr.msk.bf16.mxu0 %vm523_vm4, %v6082_v46  ;;  %v930_v40 = vsel %vm523_vm4, %v919_v32, 0 }
 0x42f   :  { %5315 = vmatprep.subr.msk.bf16.mxu0 %vm523_vm4, %v853_v18 }
 0x430   :  { %v985_v30 = vpop.permute.xlu1 %984 }
 0x431   :  { %4941 = vmatmul.mubr.msk.bf16.vlgmr.msra.gmra.mrb[20].mxu1 %vm523_vm4, %v6066_v35  ;;  %v996_v37 = vsel %vm523_vm4, %v985_v30, 0  ;;  %v1329_v41 = vpop.permute.xlu0 %1328 }
 0x432   :  { %4953 = vmatpush3.bf16.xpose.msra.mxu1 %v795_v19  ;;  %4956 = vmatprep.mubr.msk.bf16.mxu1 %vm523_vm4, %v6040_v15 }
 0x433   :  { %5313 = vmatprep.subr.msk.bf16.mxu1 %vm523_vm4, %v787_v20 }
 0x434   :  { %v1394_v38 = vpop.permute.xlu1 %1393 }
 0x436   :  { %4963 = vmatpush3.bf16.xpose.msra.mxu0 %v864_v21 }
 0x437   :  { %5318 = vmatprep.subr.msk.bf16.mxu0 %vm523_vm4, %v983_v24 }
 0x43a   :  { %4955 = vmatpush3.bf16.xpose.msra.mxu1 %v798_v25 }
 0x43b   :  { %5316 = vmatprep.subr.msk.bf16.mxu1 %vm523_vm4, %v917_v27 }
 0x43d   :  { %4965 = vmatmul.mubr.msk.bf16.vlgmr.msra.gmra.mrb[16].mxu0 %vm523_vm4, %v6090_v52 }
 0x43e   :  { %4977 = vmatpush3.bf16.xpose.msra.mxu0 %v993_v29  ;;  %4980 = vmatprep.mubr.msk.bf16.mxu0 %vm523_vm4, %v6102_v61 }
 0x43f   :  { %5319 = vmatprep.subr.msk.bf16.mxu0 %vm523_vm4, %v985_v30 }
 0x441   :  { %4957 = vmatmul.mubr.msk.bf16.vlgmr.msra.gmra.mrb[24].mxu1 %vm523_vm4, %v6084_v48 }
 0x442   :  { %4969 = vmatpush3.bf16.xpose.msra.mxu1 %v927_v31  ;;  %4972 = vmatprep.mubr.msk.bf16.mxu1 %vm523_vm4, %v6092_v55 }
 0x443   :  { %5317 = vmatprep.subr.msk.bf16.mxu1 %vm523_vm4, %v919_v32 }
 0x446   :  { %4979 = vmatpush3.bf16.xpose.msra.mxu0 %v996_v37 }
 0x447   :  { %4992 = vmatprep.subr.bf16.mxu0 %v1394_v38 }
 0x44a   :  { %4971 = vmatpush3.bf16.xpose.msra.mxu1 %v930_v40 }
 0x44b   :  { %4984 = vmatprep.subr.bf16.mxu1 %v1329_v41 }
 0x44d   :  { %4981 = vmatmul.mubr.msk.bf16.vlgmr.msra.gmra.mrb[20].mxu0 %vm523_vm4, %v6108_v63 }
 0x44e   :  { %4993 = vmatpush3.bf16.msra.mxu0 %v1394_v38 }
 0x451   :  { %4973 = vmatmul.mubr.msk.bf16.vlgmr.msra.gmra.mrb[28].mxu1 %vm523_vm4, %v6098_v59 }
 0x452   :  { %4985 = vmatpush3.bf16.msra.mxu1 %v1329_v41 }
 0x492   :  { %v6170_v43 = vpop.f32.mrb[12].mxu1 }
 0x493   :  { %v6172_v44 = vpop.f32.mrb[13].mxu1  ;;  %v1054_v45 = vsel %vm1053_vm6, %v6170_v43, -inf }
 0x494   :  { %v4927_v47 = vpop.f32.mrb[14].mxu1  ;;  %1055 = vmax.xlane.f32.xlu0 %v1054_v45  ;;  %v1047_v51 = vsel %vm1046_vm7, %v6172_v44, -inf }
 0x495   :  { %v6176_v49 = vpop.f32.mrb[15].mxu1 }
 0x496   :  { %v1050_v50 = vsel %vm1046_vm7, %v6176_v49, -inf }
 0x497   :  { %1051 = vmax.xlane.f32.xlu1 %v1050_v50 }
 0x498   :  { %1048 = vmax.xlane.f32.xlu0 %v1047_v51 }
 0x4f4   :  { %v6182_v53 = vpop.f32.mrb[16].mxu1 }
 0x4f5   :  { %v6184_v54 = vpop.f32.mrb[17].mxu1  ;;  %v1063_v56 = vsel %vm1053_vm6, %v6182_v53, -inf }
 0x4f6   :  { %1064 = vmax.xlane.f32.xlu1 %v1063_v56  ;;  %v4935_v57 = vpop.f32.mrb[18].mxu1  ;;  %v1057_v58 = vsel %vm1046_vm7, %v6184_v54, -inf }
 0x4f7   :  { %1058 = vmax.xlane.f32.xlu0 %v1057_v58  ;;  %v6190_v62 = vpop.f32.mrb[19].mxu1 }
 0x4f8   :  { %v1060_v0 = vsel %vm1046_vm7, %v6190_v62, -inf }
 0x4fb   :  { %1061 = vmax.xlane.f32.xlu0 %v1060_v0 }
 0x500   :  { %v6194_v2 = vpop.f32.mrb[12].mxu0 }
 0x501   :  { %v6196_v3 = vpop.f32.mrb[13].mxu0  ;;  %v1081_v4 = vsel %vm1053_vm6, %v6194_v2, -inf }
 0x502   :  { %v4951_v5 = vpop.f32.mrb[14].mxu0  ;;  %1082 = vmax.xlane.f32.xlu1 %v1081_v4  ;;  %v1075_v9 = vsel %vm1046_vm7, %v6196_v3, -inf }
 0x503   :  { %v6200_v60 = vpop.f32.mrb[15].mxu0 }
 0x504   :  { %v6202_v6 = vpop.f32.mrb[20].mxu1  ;;  %v1078_v7 = vsel %vm1046_vm7, %v6200_v60, -inf }
 0x505   :  { %1079 = vmax.xlane.f32.xlu0 %v1078_v7  ;;  %v6206_v8 = vpop.f32.mrb[21].mxu1  ;;  %v1072_v13 = vsel %vm1053_vm6, %v6202_v6, -inf }
 0x506   :  { %1076 = vmax.xlane.f32.xlu1 %v1075_v9  ;;  %v4943_v11 = vpop.f32.mrb[22].mxu1  ;;  %v1066_v14 = vsel %vm1046_vm7, %v6206_v8, -inf }
 0x507   :  { %v6210_v12 = vpop.f32.mrb[23].mxu1 }
 0x508   :  { %v1069_v37 = vsel %vm1046_vm7, %v6210_v12, -inf }
 0x509   :  { %1073 = vmax.xlane.f32.xlu0 %v1072_v13 }
 0x50d   :  { %1067 = vmax.xlane.f32.xlu0 %v1066_v14 }
 0x510   :  { %v6216_v17 = vpop.f32.mrb[16].mxu0 }
 0x511   :  { %v6218_v18 = vpop.f32.mrb[17].mxu0  ;;  %v1099_v19 = vsel %vm1053_vm6, %v6216_v17, -inf }
 0x512   :  { %v4967_v20 = vpop.f32.mrb[18].mxu0  ;;  %1100 = vmax.xlane.f32.xlu1 %v1099_v19  ;;  %v1093_v29 = vsel %vm1046_vm7, %v6218_v18, -inf }
 0x513   :  { %v6222_v21 = vpop.f32.mrb[19].mxu0 }
 0x514   :  { %v6224_v24 = vpop.f32.mrb[24].mxu1  ;;  %v1096_v25 = vsel %vm1046_vm7, %v6222_v21, -inf }
 0x515   :  { %1097 = vmax.xlane.f32.xlu0 %v1096_v25  ;;  %v6228_v27 = vpop.f32.mrb[25].mxu1  ;;  %v1090_v32 = vsel %vm1053_vm6, %v6224_v24, -inf }
 0x516   :  { %1094 = vmax.xlane.f32.xlu1 %v1093_v29  ;;  %v4959_v30 = vpop.f32.mrb[26].mxu1  ;;  %v1084_v38 = vsel %vm1046_vm7, %v6228_v27, -inf }
 0x517   :  { %v6232_v31 = vpop.f32.mrb[27].mxu1 }
 0x519   :  { %1091 = vmax.xlane.f32.xlu0 %v1090_v32 }
 0x51a   :  { %1070 = vmax.xlane.f32.xlu1 %v1069_v37 }
 0x51d   :  { %1085 = vmax.xlane.f32.xlu0 %v1084_v38 }
 0x520   :  { %v6240_v40 = vpop.f32.mrb[20].mxu0 }
 0x521   :  { %v6242_v41 = vpop.f32.mrb[21].mxu0  ;;  %v1056_v45 = vpop.xlane.xlu0 %1055  ;;  %v1117_v47 = vsel %vm1053_vm6, %v6240_v40, -inf }
 0x522   :  { %v1122_v50 = vsub.f32 %v6170_v43, %v1056_v45  ;;  %v4983_v51 = vpop.f32.mrb[22].mxu0  ;;  %1118 = vmax.xlane.f32.xlu1 %v1117_v47  ;;  %v1111_v43 = vsel %vm1046_vm7, %v6242_v41, -inf }
 0x523   :  { %v6247_v56 = vpop.f32.mrb[23].mxu0 }
 0x524   :  { %v1148_v57 = vmul.f32 1.442695, %v1122_v50  ;;  %v1052_v58 = vpop.xlane.xlu1 %1051  ;;  %v6249_v0 = vpop.f32.mrb[28].mxu1  ;;  %v1114_v4 = vsel %vm1046_vm7, %v6247_v56, -inf }
 0x525   :  { %v1121_v5 = vsub.f32 %v6176_v49, %v1052_v58  ;;  %v1049_v7 = vpop.xlane.xlu0 %1048  ;;  %1115 = vmax.xlane.f32.xlu0 %v1114_v4  ;;  %v6254_v9 = vpop.f32.mrb[29].mxu1  ;;  %v1087_v49 = vsel %vm1046_vm7, %v6232_v31, -inf  ;;  %v1108_v38 = vsel %vm1053_vm6, %v6249_v0, -inf }
 0x526   :  { %5520 = vpow2.f32 %v1148_v57  ;;  %v1120_v11 = vsub.f32 %v6172_v44, %v1049_v7  ;;  %1112 = vmax.xlane.f32.xlu1 %v1111_v43  ;;  %v4975_v13 = vpop.f32.mrb[30].mxu1  ;;  %v1102_v45 = vsel %vm1046_vm7, %v6254_v9, -inf }
 0x527   :  { %v1146_v14 = vmul.f32 1.442695, %v1121_v5  ;;  %v6259_v19 = vpop.f32.mrb[31].mxu1 }
 0x528   :  { %v1144_v20 = vmul.f32 1.442695, %v1120_v11 }
 0x529   :  { %5522 = vpow2.f32 %v1146_v14 }
 0x52a   :  { %5524 = vpow2.f32 %v1144_v20  ;;  %1088 = vmax.xlane.f32.xlu1 %v1087_v49 }
 0x530   :  { %v6263_v25 = vpop.eup %5520 }
 0x531   :  { %v1198_v29 = vsel %vm1053_vm6, %v6263_v25, 0.0 }
 0x532   :  { %1199 = vadd.xlane.f32.xlu0 %v1198_v29 }
 0x533   :  { %v6267_v30 = vpop.eup %5522 }
 0x534   :  { %v6269_v44 = vpop.eup %5524  ;;  %v1195_v32 = vsel %vm1046_vm7, %v6267_v30, 0.0 }
 0x535   :  { %1196 = vadd.xlane.f32.xlu1 %v1195_v32  ;;  %v1192_v37 = vsel %vm1046_vm7, %v6269_v44, 0.0 }
 0x536   :  { %1193 = vadd.xlane.f32.xlu0 %v1192_v37 }
 0x53a   :  { %1109 = vmax.xlane.f32.xlu0 %v1108_v38 }
 0x53e   :  { %1103 = vmax.xlane.f32.xlu0 %v1102_v45 }
 0x546   :  { %1395 = vrot.lane.b32.xlu1 %v6055_v22, %s5795_s28  ;;  %v1105_v22 = vsel %vm1046_vm7, %v6259_v19, -inf }
 0x54a   :  { %1455 = vrot.lane.b32.xlu1 %v6060_v28, %s5795_s28 }
 0x54e   :  { %1517 = vrot.lane.b32.xlu1 %v6064_v34, %s5795_s28 }
 0x552   :  { %1457 = vrot.lane.b32.xlu1 %v6066_v35, %s5795_s28 }
 0x554   :  { %1330 = vrot.lane.b32.xlu0 %v6049_v16, %s5795_s28 }
 0x556   :  { %1519 = vrot.lane.b32.xlu1 %v6074_v39, %s5795_s28 }
 0x55a   :  { %1579 = vrot.lane.b32.xlu1 %v6040_v15, %s5795_s28 }
 0x57e   :  { %1106 = vmax.xlane.f32.xlu1 %v1105_v22 }
 0x583   :  { %v1065_v16 = vpop.xlane.xlu1 %1064 }
 0x584   :  { %v1059_v28 = vpop.xlane.xlu0 %1058 }
 0x588   :  { %v1062_v47 = vpop.xlane.xlu0 %1061 }
 0x589   :  { %v1124_v34 = vsub.f32 %v6190_v62, %v1062_v47 }
 0x58b   :  { %v1152_v50 = vmul.f32 1.442695, %v1124_v34 }
 0x58d   :  { %5526 = vpow2.f32 %v1152_v50 }
 0x58f   :  { %1641 = vrot.lane.b32.xlu1 %v6082_v46, %s5795_s28  ;;  %v1083_v51 = vpop.xlane.xlu1 %1082 }
 0x592   :  { %v1080_v35 = vpop.xlane.xlu0 %1079 }
 0x593   :  { %v1130_v39 = vsub.f32 %v6200_v60, %v1080_v35  ;;  %v1077_v43 = vpop.xlane.xlu1 %1076  ;;  %v1125_v60 = vsub.f32 %v6182_v53, %v1065_v16  ;;  %v1123_v53 = vsub.f32 %v6184_v54, %v1059_v28 }
 0x594   :  { %v1129_v50 = vsub.f32 %v6196_v3, %v1077_v43 }
 0x595   :  { %v1164_v57 = vmul.f32 1.442695, %v1130_v39  ;;  %v1154_v20 = vmul.f32 1.442695, %v1125_v60 }
 0x596   :  { %v1074_v15 = vpop.xlane.xlu0 %1073 }
 0x597   :  { %v6299_v58 = vpop.eup %5526  ;;  %5528 = vpow2.f32 %v1164_v57  ;;  %v1128_v4 = vsub.f32 %v6202_v6, %v1074_v15  ;;  %v1131_v6 = vsub.f32 %v6194_v2, %v1083_v51  ;;  %v1162_v51 = vmul.f32 1.442695, %v1129_v50 }
 0x598   :  { %v1204_v62 = vsel %vm1046_vm7, %v6299_v58, 0.0 }
 0x599   :  { %v1160_v5 = vmul.f32 1.442695, %v1128_v4  ;;  %1205 = vadd.xlane.f32.xlu0 %v1204_v62 }
 0x59a   :  { %v1068_v7 = vpop.xlane.xlu0 %1067 }
 0x59b   :  { %5530 = vpow2.f32 %v1160_v5  ;;  %v1126_v46 = vsub.f32 %v6206_v8, %v1068_v7  ;;  %v1166_v8 = vmul.f32 1.442695, %v1131_v6 }
 0x59d   :  { %v1156_v11 = vmul.f32 1.442695, %v1126_v46 }
 0x59f   :  { %5532 = vpow2.f32 %v1156_v11  ;;  %v1101_v13 = vpop.xlane.xlu1 %1100 }
 0x5a0   :  { %5534 = vpow2.f32 %v1154_v20 }
 0x5a1   :  { %v6306_v14 = vpop.eup %5528 }
 0x5a2   :  { %v1098_v49 = vpop.xlane.xlu0 %1097  ;;  %v1222_v29 = vsel %vm1046_vm7, %v6306_v14, 0.0 }
 0x5a3   :  { %v1136_v32 = vsub.f32 %v6222_v21, %v1098_v49  ;;  %1223 = vadd.xlane.f32.xlu0 %v1222_v29  ;;  %v1095_v45 = vpop.xlane.xlu1 %1094  ;;  %v1150_v21 = vmul.f32 1.442695, %v1123_v53 }
 0x5a4   :  { %v1135_v7 = vsub.f32 %v6218_v18, %v1095_v45 }
 0x5a5   :  { %v6312_v37 = vpop.eup %5530  ;;  %v1176_v38 = vmul.f32 1.442695, %v1136_v32 }
 0x5a6   :  { %v1092_v22 = vpop.xlane.xlu0 %1091  ;;  %v1216_v47 = vsel %vm1053_vm6, %v6312_v37, 0.0 }
 0x5a7   :  { %5536 = vpow2.f32 %v1176_v38  ;;  %v1134_v2 = vsub.f32 %v6224_v24, %v1092_v22  ;;  %1217 = vadd.xlane.f32.xlu0 %v1216_v47  ;;  %v1071_v28 = vpop.xlane.xlu1 %1070  ;;  %v1137_v24 = vsub.f32 %v6216_v17, %v1101_v13 }
 0x5a8   :  { %5538 = vpow2.f32 %v1166_v8  ;;  %v1127_v11 = vsub.f32 %v6210_v12, %v1071_v28 }
 0x5a9   :  { %v6318_v34 = vpop.eup %5532  ;;  %v1172_v16 = vmul.f32 1.442695, %v1134_v2  ;;  %v1178_v5 = vmul.f32 1.442695, %v1137_v24  ;;  %v6371_v24 = vsel %vm1339_vm8, 65535, %v5788_v1 }
 0x5aa   :  { %v1086_v35 = vpop.xlane.xlu0 %1085  ;;  %v1210_v54 = vsel %vm1046_vm7, %v6318_v34, 0.0  ;;  %v6325_v15 = vpop.eup %5534  ;;  %v1158_v29 = vmul.f32 1.442695, %v1127_v11 }
 0x5ab   :  { %5540 = vpow2.f32 %v1172_v16  ;;  %v1132_v39 = vsub.f32 %v6228_v27, %v1086_v35  ;;  %1211 = vadd.xlane.f32.xlu0 %v1210_v54  ;;  %v1207_v17 = vsel %vm1053_vm6, %v6325_v15, 0.0 }
 0x5ac   :  { %5542 = vpow2.f32 %v1150_v21 }
 0x5ad   :  { %v1168_v57 = vmul.f32 1.442695, %v1132_v39 }
 0x5af   :  { %5544 = vpow2.f32 %v1168_v57  ;;  %v1119_v4 = vpop.xlane.xlu1 %1118 }
 0x5b0   :  { %v1143_v3 = vsub.f32 %v6240_v40, %v1119_v4  ;;  %5546 = vpow2.f32 %v1162_v51  ;;  %v1174_v40 = vmul.f32 1.442695, %v1135_v7 }
 0x5b1   :  { %v6328_v62 = vpop.eup %5536 }
 0x5b2   :  { %v1190_v43 = vmul.f32 1.442695, %v1143_v3  ;;  %v1240_v27 = vsel %vm1046_vm7, %v6328_v62, 0.0  ;;  %v6335_v46 = vpop.eup %5538  ;;  %v1116_v38 = vpop.xlane.xlu0 %1115 }
 0x5b3   :  { %1241 = vadd.xlane.f32.xlu0 %v1240_v27  ;;  %1208 = vadd.xlane.f32.xlu1 %v1207_v17  ;;  %v1113_v13 = vpop.xlane.xlu1 %1112  ;;  %v1225_v20 = vsel %vm1053_vm6, %v6335_v46, 0.0  ;;  %v1142_v35 = vsub.f32 %v6247_v56, %v1116_v38 }
 0x5b4   :  { %5548 = vpow2.f32 %v1190_v43  ;;  %v1141_v32 = vsub.f32 %v6242_v41, %v1113_v13 }
 0x5b5   :  { %v6337_v60 = vpop.eup %5540  ;;  %5550 = vpow2.f32 %v1178_v5  ;;  %v1188_v57 = vmul.f32 1.442695, %v1142_v35 }
 0x5b6   :  { %v1234_v18 = vsel %vm1053_vm6, %v6337_v60, 0.0  ;;  %v6344_v6 = vpop.eup %5542  ;;  %5552 = vpow2.f32 %v1174_v40  ;;  %v1186_v22 = vmul.f32 1.442695, %v1141_v32 }
 0x5b7   :  { %1235 = vadd.xlane.f32.xlu0 %v1234_v18  ;;  %1226 = vadd.xlane.f32.xlu1 %v1225_v20  ;;  %v1201_v53 = vsel %vm1046_vm7, %v6344_v6, 0.0  ;;  %v1089_v45 = vpop.xlane.xlu1 %1088  ;;  %5554 = vpow2.f32 %v1158_v29 }
 0x5b8   :  { %v1133_v2 = vsub.f32 %v6232_v31, %v1089_v45  ;;  %5556 = vpow2.f32 %v1186_v22 }
 0x5b9   :  { %v6346_v49 = vpop.eup %5544 }
 0x5ba   :  { %v1228_v12 = vsel %vm1046_vm7, %v6346_v49, 0.0  ;;  %v6353_v8 = vpop.eup %5546  ;;  %v1170_v54 = vmul.f32 1.442695, %v1133_v2 }
 0x5bb   :  { %1229 = vadd.xlane.f32.xlu0 %v1228_v12  ;;  %1202 = vadd.xlane.f32.xlu1 %v1201_v53  ;;  %v1219_v41 = vsel %vm1046_vm7, %v6353_v8, 0.0 }
 0x5be   :  { %v6355_v47 = vpop.eup %5548 }
 0x5bf   :  { %v6360_v21 = vpop.eup %5550  ;;  %v1200_v50 = vpop.xlane.xlu0 %1199  ;;  %1220 = vadd.xlane.f32.xlu1 %v1219_v41  ;;  %v1261_v16 = vsel %vm1053_vm6, %v6355_v47, 0.0 }
 0x5c0   :  { %1262 = vadd.xlane.f32.xlu0 %v1261_v16  ;;  %5558 = vrcp.f32 %v1200_v50  ;;  %v1243_v31 = vsel %vm1053_vm6, %v6360_v21, 0.0  ;;  %v6367_v39 = vpop.eup %5552 }
 0x5c1   :  { %v1237_v56 = vsel %vm1046_vm7, %v6367_v39, 0.0  ;;  %v6375_v3 = vpop.eup %5554 }
 0x5c2   :  { %v1197_v28 = vpop.xlane.xlu1 %1196  ;;  %v1213_v17 = vsel %vm1046_vm7, %v6375_v3, 0.0  ;;  %v6381_v40 = vpop.eup %5556 }
 0x5c3   :  { %5560 = vrcp.f32 %v1197_v28  ;;  %v1194_v51 = vpop.xlane.xlu0 %1193  ;;  %1244 = vadd.xlane.f32.xlu1 %v1243_v31  ;;  %v1255_v12 = vsel %vm1046_vm7, %v6381_v40, 0.0 }
 0x5c4   :  { %5562 = vrcp.f32 %v1194_v51 }
 0x5c5   :  { %5564 = vpow2.f32 %v1170_v54 }
 0x5c6   :  { %v1396_v4 = vpop.permute.xlu1 %1395  ;;  %5566 = vpow2.f32 %v1188_v57 }
 0x5c7   :  { %v1405_v5 = vand.u32 %v1396_v4, %v6371_v24  ;;  %v1110_v7 = vpop.xlane.xlu0 %1109  ;;  %1238 = vadd.xlane.f32.xlu1 %v1237_v56 }
 0x5c8   :  { %v1140_v43 = vsub.f32 %v6249_v0, %v1110_v7 }
 0x5c9   :  { %4994 = vmatprep.subr.bf16.mxu0 %v1405_v5 }
 0x5ca   :  { %v1184_v27 = vmul.f32 1.442695, %v1140_v43  ;;  %4995 = vmatpush3.bf16.msra.mxu0 %v1405_v5  ;;  %v1456_v1 = vpop.permute.xlu1 %1455  ;;  %v5559_v13 = vpop.eup %5558 }
 0x5cb   :  { %v1104_v11 = vpop.xlane.xlu0 %1103  ;;  %1214 = vadd.xlane.f32.xlu1 %v1213_v17  ;;  %v1290_v2 = vmul.f32 %v5559_v13, %v6263_v25 }
 0x5cc   :  { %v1138_v18 = vsub.f32 %v6254_v9, %v1104_v11  ;;  %5568 = vpow2.f32 %v1184_v27 }
 0x5cd   :  { %v5561_v20 = vpop.eup %5560 }
 0x5ce   :  { %v5563_v29 = vpop.eup %5562  ;;  %v1180_v32 = vmul.f32 1.442695, %v1138_v18  ;;  %v6384_v0 = vpop.permute.xlu1 %1517  ;;  %v1289_v53 = vmul.f32 %v5561_v20, %v6267_v30 }
 0x5cf   :  { %5008 = vmatprep.subr.bf16.mxu0 %v6384_v0  ;;  %v1331_v38 = vpop.permute.xlu0 %1330  ;;  %1256 = vadd.xlane.f32.xlu1 %v1255_v12  ;;  %v1288_v45 = vmul.f32 %v5563_v29, %v6269_v44  ;;  %v6391_v22 = vpop.eup %5564  ;;  %v1313_v44 = vpack.c.bf16 %v1290_v2, %v1290_v2 }
 0x5d0   :  { %v1343_v9 = vand.u32 %v6371_v24, %v1331_v38  ;;  %5570 = vpow2.f32 %v1180_v32  ;;  %v1231_v30 = vsel %vm1046_vm7, %v6391_v22, 0.0  ;;  %v6398_v16 = vpop.eup %5566 }
 0x5d1   :  { %v1312_v41 = vpack.c.bf16 %v1289_v53, %v1288_v45  ;;  %v1258_v25 = vsel %vm1046_vm7, %v6398_v16, 0.0 }
 0x5d2   :  { %v1458_v50 = vpop.permute.xlu1 %1457  ;;  %4986 = vmatprep.subr.bf16.mxu1 %v1343_v9 }
 0x5d3   :  { %4987 = vmatpush3.bf16.msra.mxu1 %v1343_v9  ;;  %4988 = vmatprep.mubr.msk.bf16.mxu1 %vm1046_vm7, %v1312_v41  ;;  %v1467_v35 = vand.u32 %v1458_v50, %v6371_v24 }
 0x5d4   :  { %1232 = vadd.xlane.f32.xlu1 %v1231_v30  ;;  %5000 = vmatprep.subr.bf16.mxu1 %v1456_v1 }
 0x5d6   :  { %v6401_v54 = vpop.permute.xlu1 %1519  ;;  %4989 = vmatmul.mubr.msk.bf16.vlgmr.msra.gmra.mrb[32].mxu1 %vm1046_vm7, %v1313_v44  ;;  %v6406_v28 = vpop.eup %5568 }
 0x5d7   :  { %5001 = vmatpush3.bf16.msra.mxu1 %v1456_v1  ;;  %v1252_v51 = vsel %vm1053_vm6, %v6406_v28, 0.0 }
 0x5d8   :  { %1259 = vadd.xlane.f32.xlu1 %v1258_v25  ;;  %5002 = vmatprep.subr.bf16.mxu1 %v1467_v35 }
 0x5da   :  { %v6408_v31 = vpop.permute.xlu1 %1579  ;;  %v6412_v57 = vpop.eup %5570 }
 0x5db   :  { %5003 = vmatpush3.bf16.msra.mxu1 %v1467_v35  ;;  %v1246_v4 = vsel %vm1046_vm7, %v6412_v57, 0.0 }
 0x5dc   :  { %1253 = vadd.xlane.f32.xlu1 %v1252_v51  ;;  %5016 = vmatprep.subr.bf16.mxu1 %v6408_v31 }
 0x5e0   :  { %1247 = vadd.xlane.f32.xlu1 %v1246_v4 }
 0x5f1   :  { %1643 = vrot.lane.b32.xlu1 %v6090_v52, %s5795_s28 }
 0x5f5   :  { %1703 = vrot.lane.b32.xlu1 %v6092_v55, %s5795_s28 }
 0x5f9   :  { %1765 = vrot.lane.b32.xlu1 %v6102_v61, %s5795_s28 }
 0x5fd   :  { %1705 = vrot.lane.b32.xlu1 %v6098_v59, %s5795_s28 }
 0x601   :  { %1767 = vrot.lane.b32.xlu1 %v6108_v63, %s5795_s28 }
 0x60b   :  { %v1107_v56 = vpop.xlane.xlu1 %1106 }
 0x60c   :  { %v1139_v5 = vsub.f32 %v6259_v19, %v1107_v56 }
 0x60e   :  { %v1182_v7 = vmul.f32 1.442695, %v1139_v5 }
 0x60f   :  { %v1642_v55 = vpop.permute.xlu1 %1641 }
 0x610   :  { %5572 = vpow2.f32 %v1182_v7 }
 0x61a   :  { %v6428_v43 = vpop.eup %5572 }
 0x61b   :  { %v1249_v52 = vsel %vm1046_vm7, %v6428_v43, 0.0 }
 0x61c   :  { %1250 = vadd.xlane.f32.xlu0 %v1249_v52 }
 0x626   :  { %v1206_v61 = vpop.xlane.xlu0 %1205 }
 0x630   :  { %v1224_v59 = vpop.xlane.xlu0 %1223 }
 0x632   :  { %1581 = vrot.lane.b32.xlu0 %v6084_v48, %s5795_s28 }
 0x634   :  { %v1218_v63 = vpop.xlane.xlu0 %1217 }
 0x638   :  { %v1212_v17 = vpop.xlane.xlu0 %1211 }
 0x640   :  { %v1209_v27 = vpop.xlane.xlu1 %1208  ;;  %v1242_v13 = vpop.xlane.xlu0 %1241 }
 0x641   :  { %5574 = vrcp.f32 %v1209_v27 }
 0x642   :  { %5576 = vrcp.f32 %v1206_v61 }
 0x644   :  { %v1227_v1 = vpop.xlane.xlu1 %1226  ;;  %v6437_v2 = vpop.xlane.xlu0 %1235 }
 0x648   :  { %v1203_v19 = vpop.xlane.xlu1 %1202 }
 0x649   :  { %5578 = vrcp.f32 %v1203_v19 }
 0x64a   :  { %5580 = vrcp.f32 %v1224_v59 }
 0x64b   :  { %v5575_v20 = vpop.eup %5574 }
 0x64c   :  { %v1221_v11 = vpop.xlane.xlu1 %1220  ;;  %v5577_v29 = vpop.eup %5576  ;;  %v1293_v12 = vmul.f32 %v5575_v20, %v6325_v15  ;;  %v1529_v15 = vand.u32 %v6401_v54, %v6371_v24 }
 0x64d   :  { %5582 = vrcp.f32 %v1221_v11  ;;  %v1292_v45 = vmul.f32 %v5577_v29, %v6299_v58 }
 0x64e   :  { %5584 = vrcp.f32 %v1227_v1  ;;  %v1315_v30 = vpack.c.bf16 %v1293_v12, %v1293_v12 }
 0x64f   :  { %5586 = vrcp.f32 %v1242_v13 }
 0x650   :  { %v1245_v18 = vpop.xlane.xlu1 %1244 }
 0x653   :  { %v5579_v48 = vpop.eup %5578 }
 0x654   :  { %v1239_v32 = vpop.xlane.xlu1 %1238  ;;  %v5581_v53 = vpop.eup %5580  ;;  %v1291_v38 = vmul.f32 %v5579_v48, %v6344_v6 }
 0x655   :  { %5588 = vrcp.f32 %v1239_v32  ;;  %v1298_v35 = vmul.f32 %v5581_v53, %v6306_v14  ;;  %v1230_v14 = vpop.xlane.xlu0 %1229 }
 0x656   :  { %5590 = vrcp.f32 %v1218_v63  ;;  %v1314_v41 = vpack.c.bf16 %v1292_v45, %v1291_v38 }
 0x657   :  { %v5583_v9 = vpop.eup %5582  ;;  %5592 = vrcp.f32 %v1212_v17 }
 0x658   :  { %v1215_v50 = vpop.xlane.xlu1 %1214  ;;  %v1297_v44 = vmul.f32 %v5583_v9, %v6353_v8  ;;  %v5585_v25 = vpop.eup %5584  ;;  %4996 = vmatprep.mubr.msk.bf16.mxu0 %vm1046_vm7, %v1314_v41 }
 0x659   :  { %5594 = vrcp.f32 %v1215_v50  ;;  %4997 = vmatmul.mubr.msk.bf16.vlgmr.msra.gmra.mrb[24].mxu0 %vm1046_vm7, %v1315_v30  ;;  %v1299_v8 = vmul.f32 %v5585_v25, %v6335_v46  ;;  %v5587_v51 = vpop.eup %5586  ;;  %v1263_v48 = vpop.xlane.xlu0 %1262 }
 0x65a   :  { %v1318_v58 = vpack.c.bf16 %v1298_v35, %v1297_v44  ;;  %5009 = vmatpush3.bf16.msra.mxu0 %v6384_v0  ;;  %5596 = vrcp.f32 %v1230_v14  ;;  %v1304_v7 = vmul.f32 %v5587_v51, %v6328_v62 }
 0x65b   :  { %5010 = vmatprep.subr.bf16.mxu0 %v1529_v15  ;;  %v1319_v5 = vpack.c.bf16 %v1299_v8, %v1299_v8 }
 0x65c   :  { %5012 = vmatprep.mubr.msk.bf16.mxu0 %vm1046_vm7, %v1318_v58  ;;  %v1257_v6 = vpop.xlane.xlu1 %1256 }
 0x65e   :  { %5011 = vmatpush3.bf16.msra.mxu0 %v1529_v15 }
 0x65f   :  { %v5589_v4 = vpop.eup %5588  ;;  %5024 = vmatprep.subr.bf16.mxu0 %v1642_v55 }
 0x660   :  { %v5591_v56 = vpop.eup %5590  ;;  %v1303_v54 = vmul.f32 %v5589_v4, %v6367_v39 }
 0x661   :  { %v5593_v52 = vpop.eup %5592  ;;  %v1233_v0 = vpop.xlane.xlu1 %1232  ;;  %5013 = vmatmul.mubr.msk.bf16.vlgmr.msra.gmra.mrb[28].mxu0 %vm1046_vm7, %v1319_v5  ;;  %v1296_v46 = vmul.f32 %v5591_v56, %v6312_v37 }
 0x662   :  { %5598 = vrcp.f32 %v1233_v0  ;;  %v1322_v61 = vpack.c.bf16 %v1304_v7, %v1303_v54  ;;  %5025 = vmatpush3.bf16.msra.mxu0 %v1642_v55  ;;  %v1294_v27 = vmul.f32 %v5593_v52, %v6318_v34 }
 0x663   :  { %v5595_v59 = vpop.eup %5594  ;;  %5600 = vrcp.f32 %v1245_v18  ;;  %v1317_v63 = vpack.c.bf16 %v1296_v46, %v1296_v46 }
 0x664   :  { %5028 = vmatprep.mubr.msk.bf16.mxu0 %vm1046_vm7, %v1322_v61  ;;  %v1295_v1 = vmul.f32 %v5595_v59, %v6375_v3  ;;  %v5597_v55 = vpop.eup %5596 }
 0x665   :  { %v1260_v39 = vpop.xlane.xlu1 %1259  ;;  %v1300_v34 = vmul.f32 %v5597_v55, %v6346_v49 }
 0x666   :  { %5602 = vrcp.f32 %v1260_v39  ;;  %v1316_v62 = vpack.c.bf16 %v1295_v1, %v1294_v27 }
 0x667   :  { %5604 = vrcp.f32 %v1257_v6 }
 0x668   :  { %5004 = vmatprep.mubr.msk.bf16.mxu1 %vm1046_vm7, %v1316_v62  ;;  %5606 = vrcp.f32 %v1263_v48  ;;  %v5491_v62 = vld [vmem:[%s7353_s6 + $0x8] sm:$0xff]  }
 0x669   :  { %v1254_v19 = vpop.xlane.xlu1 %1253  ;;  %5005 = vmatmul.mubr.msk.bf16.vlgmr.msra.gmra.mrb[36].mxu1 %vm1046_vm7, %v1317_v63  ;;  %5608 = vrcp.f32 %v6437_v2 }
 0x66a   :  { %5017 = vmatpush3.bf16.msra.mxu1 %v6408_v31 }
 0x66c   :  { %v5599_v37 = vpop.eup %5598 }
 0x66d   :  { %v1248_v17 = vpop.xlane.xlu1 %1247  ;;  %v1301_v3 = vmul.f32 %v5599_v37, %v6391_v22  ;;  %v5601_v11 = vpop.eup %5600 }
 0x66e   :  { %v1305_v12 = vmul.f32 %v5601_v11, %v6360_v21  ;;  %5610 = vrcp.f32 %v1248_v17 }
 0x66f   :  { %v1320_v13 = vpack.c.bf16 %v1301_v3, %v1300_v34  ;;  %5612 = vrcp.f32 %v1254_v19 }
 0x670   :  { %v5603_v18 = vpop.eup %5602  ;;  %v1323_v53 = vpack.c.bf16 %v1305_v12, %v1305_v12 }
 0x671   :  { %5020 = vmatprep.mubr.msk.bf16.mxu1 %vm1046_vm7, %v1320_v13  ;;  %v1644_v20 = vpop.permute.xlu1 %1643  ;;  %v5605_v29 = vpop.eup %5604  ;;  %v1310_v31 = vmul.f32 %v5603_v18, %v6398_v16 }
 0x672   :  { %v1653_v32 = vand.u32 %v1644_v20, %v6371_v24  ;;  %v1309_v22 = vmul.f32 %v5605_v29, %v6381_v40  ;;  %v5607_v41 = vpop.eup %5606 }
 0x673   :  { %v1311_v50 = vmul.f32 %v5607_v41, %v6355_v47  ;;  %v5609_v47 = vpop.eup %5608 }
 0x674   :  { %5026 = vmatprep.subr.bf16.mxu0 %v1653_v32  ;;  %v1326_v38 = vpack.c.bf16 %v1310_v31, %v1309_v22  ;;  %v1302_v8 = vmul.f32 %v5609_v47, %v6337_v60 }
 0x675   :  { %5027 = vmatpush3.bf16.msra.mxu0 %v1653_v32  ;;  %v1704_v49 = vpop.permute.xlu1 %1703  ;;  %v1327_v30 = vpack.c.bf16 %v1311_v50, %v1311_v50 }
 0x676   :  { %v1321_v51 = vpack.c.bf16 %v1302_v8, %v1302_v8 }
 0x678   :  { %5029 = vmatmul.mubr.msk.bf16.vlgmr.msra.gmra.mrb[32].mxu0 %vm1046_vm7, %v1323_v53  ;;  %v5611_v2 = vpop.eup %5610 }
 0x679   :  { %5044 = vmatprep.mubr.msk.bf16.mxu0 %vm1046_vm7, %v1326_v38  ;;  %v1766_v45 = vpop.permute.xlu1 %1765  ;;  %v5613_v14 = vpop.eup %5612  ;;  %v1306_v5 = vmul.f32 %v5611_v2, %v6412_v57 }
 0x67a   :  { %5040 = vmatprep.subr.bf16.mxu0 %v1766_v45  ;;  %v1308_v7 = vmul.f32 %v5613_v14, %v6406_v28  ;;  %v5490_v28 = vld [vmem:[%s7353_s6] sm:$0xff]  }
 0x67b   :  { %5041 = vmatpush3.bf16.msra.mxu0 %v1766_v45 }
 0x67c   :  { %v1325_v52 = vpack.c.bf16 %v1308_v7, %v1308_v7 }
 0x67d   :  { %v1706_v9 = vpop.permute.xlu1 %1705 }
 0x67e   :  { %v1715_v56 = vand.u32 %v1706_v9, %v6371_v24 }
 0x681   :  { %v1768_v21 = vpop.permute.xlu1 %1767 }
 0x682   :  { %v1777_v16 = vand.u32 %v1768_v21, %v6371_v24 }
 0x684   :  { %5042 = vmatprep.subr.bf16.mxu0 %v1777_v16 }
 0x685   :  { %5043 = vmatpush3.bf16.msra.mxu0 %v1777_v16 }
 0x686   :  { %5064 = vmatprep.subr.bf16.mxu0 %v5789_v10 }
 0x688   :  { %5045 = vmatmul.mubr.msk.bf16.vlgmr.msra.gmra.mrb[36].mxu0 %vm1046_vm7, %v1327_v30 }
 0x689   :  { %5068 = vmatprep.mubr.msk.bf16.mxu0 %vm5790_vm3, %v5789_v10 }
 0x6a9   :  { %v6474_v40 = vpop.f32.mrb[32].mxu1  ;;  %v1251_v44 = vpop.xlane.xlu0 %1250 }
 0x6aa   :  { %5614 = vrcp.f32 %v1251_v44  ;;  %v6476_v35 = vpop.f32.mrb[33].mxu1 }
 0x6ab   :  { %v4991_v25 = vpop.f32.mrb[34].mxu1 }
 0x6ac   :  { %v6478_v15 = vpop.f32.mrb[35].mxu1 }
 0x6ad   :  { %v1582_v58 = vpop.permute.xlu0 %1581 }
 0x6ae   :  { %v1591_v6 = vand.u32 %v1582_v58, %v6371_v24 }
 0x6b0   :  { %5018 = vmatprep.subr.bf16.mxu1 %v1591_v6 }
 0x6b1   :  { %5019 = vmatpush3.bf16.msra.mxu1 %v1591_v6 }
 0x6b2   :  { %5032 = vmatprep.subr.bf16.mxu1 %v1704_v49 }
 0x6b4   :  { %v5615_v4 = vpop.eup %5614  ;;  %5021 = vmatmul.mubr.msk.bf16.vlgmr.msra.gmra.mrb[40].mxu1 %vm1046_vm7, %v1321_v51 }
 0x6b5   :  { %5033 = vmatpush3.bf16.msra.mxu1 %v1704_v49  ;;  %v1307_v54 = vmul.f32 %v5615_v4, %v6428_v43 }
 0x6b6   :  { %5034 = vmatprep.subr.bf16.mxu1 %v1715_v56 }
 0x6b7   :  { %v1324_v60 = vpack.c.bf16 %v1307_v54, %v1306_v5 }
 0x6b9   :  { %5035 = vmatpush3.bf16.msra.mxu1 %v1715_v56  ;;  %5036 = vmatprep.mubr.msk.bf16.mxu1 %vm1046_vm7, %v1324_v60 }
 0x6ba   :  { %5048 = vmatprep.subr.bf16.mxu1 %v5789_v10 }
 0x6bc   :  { %5037 = vmatmul.mubr.msk.bf16.vlgmr.msra.gmra.mrb[44].mxu1 %vm1046_vm7, %v1325_v52 }
 0x6bd   :  { %5052 = vmatprep.mubr.msk.bf16.mxu1 %vm5790_vm3, %v5789_v10  ;;  %5049 = vmatpush3.bf16.msra.mxu1 %v5490_v28 }
 0x6be   :  { %5050 = vmatprep.subr.bf16.mxu1 %v5789_v10 }
 0x6c1   :  { %5051 = vmatpush3.bf16.msra.mxu1 %v5491_v62 }
 0x6c2   :  { %5080 = vmatprep.subr.bf16.mxu1 %v5789_v10 }
 0x72c   :  { %v4998_v0 = vpop.f32.mrb[24].mxu0 }
 0x72d   :  { %v1441_v61 = vpop.f32.mrb[25].mxu0 }
 0x72e   :  { %v4999_v57 = vpop.f32.mrb[26].mxu0 }
 0x72f   :  { %v1444_v59 = vpop.f32.mrb[27].mxu0 }
 0x730   :  { %v5378_v43 = vpack.i.bf16 %v1444_v59, %v1441_v61 }
 0x732   :  { %5379 = vrot.lane.b32.xlu1 %v5378_v43, %s5796_s30 }
 0x734   :  { %v5014_v46 = vpop.f32.mrb[28].mxu0 }
 0x735   :  { %v1565_v27 = vpop.f32.mrb[29].mxu0 }
 0x736   :  { %v5015_v1 = vpop.f32.mrb[30].mxu0 }
 0x737   :  { %v1568_v39 = vpop.f32.mrb[31].mxu0 }
 0x738   :  { %v5383_v63 = vpack.i.bf16 %v1568_v39, %v1565_v27 }
 0x73a   :  { %5384 = vrot.lane.b32.xlu1 %v5383_v63, %s7369_s29 }
 0x73c   :  { %v5006_v19 = vpop.f32.mrb[36].mxu1 }
 0x73d   :  { %v1503_v55 = vpop.f32.mrb[37].mxu1 }
 0x73e   :  { %v5007_v37 = vpop.f32.mrb[38].mxu1 }
 0x73f   :  { %v1506_v17 = vpop.f32.mrb[39].mxu1 }
 0x740   :  { %v5388_v34 = vpack.i.bf16 %v1506_v17, %v1503_v55 }
 0x742   :  { %5389 = vrot.lane.b32.xlu0 %v5388_v34, %s5798_s21 }
 0x746   :  { %1834 = vrot.lane.b32.xlu0 %v4998_v0, %s5796_s30 }
 0x74b   :  { %v5030_v3 = vpop.f32.mrb[32].mxu0 }
 0x74c   :  { %v1689_v11 = vpop.f32.mrb[33].mxu0 }
 0x74d   :  { %v5031_v13 = vpop.f32.mrb[34].mxu0 }
 0x74e   :  { %v1692_v18 = vpop.f32.mrb[35].mxu0 }
 0x74f   :  { %v5393_v20 = vpack.i.bf16 %v1692_v18, %v1689_v11 }
 0x751   :  { %5394 = vrot.lane.b32.xlu0 %v5393_v20, %s5796_s30 }
 0x755   :  { %1846 = vrot.lane.b32.xlu0 %v5006_v19, %s5798_s21 }
 0x759   :  { %1881 = vrot.lane.b32.xlu0 %v5030_v3, %s5796_s30 }
 0x75b   :  { %v5046_v29 = vpop.f32.mrb[36].mxu0 }
 0x75c   :  { %v1813_v48 = vpop.f32.mrb[37].mxu0 }
 0x75d   :  { %1905 = vrot.lane.b32.xlu0 %v5046_v29, %s7369_s29  ;;  %v5047_v32 = vpop.f32.mrb[38].mxu0 }
 0x75e   :  { %v1816_v12 = vpop.f32.mrb[39].mxu0 }
 0x75f   :  { %v5398_v31 = vpack.i.bf16 %v1816_v12, %v1813_v48 }
 0x761   :  { %5399 = vrot.lane.b32.xlu1 %v5398_v31, %s7369_s29 }
 0x787   :  { %v5022_v49 = vpop.f32.mrb[40].mxu1 }
 0x788   :  { %v1627_v22 = vpop.f32.mrb[41].mxu1 }
 0x789   :  { %v5023_v53 = vpop.f32.mrb[42].mxu1 }
 0x78a   :  { %v1630_v38 = vpop.f32.mrb[43].mxu1 }
 0x78f   :  { %v5038_v45 = vpop.f32.mrb[44].mxu1 }
 0x790   :  { %v1751_v9 = vpop.f32.mrb[45].mxu1 }
 0x791   :  { %v5039_v41 = vpop.f32.mrb[46].mxu1 }
 0x792   :  { %v1754_v21 = vpop.f32.mrb[47].mxu1 }
 0x793   :  { %v5403_v16 = vpack.i.bf16 %v1754_v21, %v1751_v9 }
 0x795   :  { %5404 = vrot.lane.b32.xlu1 %v5403_v16, %s5798_s21 }
 0x799   :  { %1858 = vrot.lane.b32.xlu1 %v5014_v46, %s7369_s29 }
 0x79d   :  { %1893 = vrot.lane.b32.xlu1 %v5038_v45, %s5798_s21  ;;  %v4618_v45 = vld [vmem:[%s7354_s7] ss:$0 sm:$0xff] }
 0x7a4   :  { %v5380_v50 = vpop.permute.xlu1 %5379 }
 0x7a5   :  { %v5382_v30 = vunpack.i.h.bf16 %v5380_v50  ;;  %v5381_v44 = vunpack.i.l.bf16 %v5380_v50 }
 0x7a7   :  { %v1864_v8 = vsel %vm523_vm4, %v6478_v15, %v5382_v30  ;;  %v1863_v2 = vsel %vm523_vm4, %v6476_v35, %v5381_v44 }
 0x7ac   :  { %v5385_v47 = vpop.permute.xlu1 %5384 }
 0x7ad   :  { %v5387_v51 = vunpack.i.h.bf16 %v5385_v47  ;;  %v5386_v14 = vunpack.i.l.bf16 %v5385_v47 }
 0x7b4   :  { %v5390_v25 = vpop.permute.xlu0 %5389 }
 0x7b5   :  { %v5392_v58 = vunpack.i.h.bf16 %v5390_v25  ;;  %v5391_v6 = vunpack.i.l.bf16 %v5390_v25 }
 0x7b7   :  { %v1867_v4 = vsel %vm1866_vm9, %v1863_v2, %v5391_v6  ;;  %v1868_v56 = vsel %vm1866_vm9, %v1864_v8, %v5392_v58 }
 0x7b8   :  { %v1871_v5 = vsel %vm1870_vm10, %v1867_v4, %v5386_v14  ;;  %v1872_v54 = vsel %vm1870_vm10, %v1868_v56, %v5387_v51  ;;  %v1835_v15 = vpop.permute.xlu0 %1834 }
 0x7b9   :  { %v1931_v7 = vpack.c.bf16 %v1872_v54, %v1871_v5  ;;  %v1865_v39 = vsel %vm523_vm4, %v6474_v40, %v1835_v15 }
 0x7bb   :  { %5053 = vmatmul.mubr.msk.bf16.vlgmr.msra.gmra.mrb[48].mxu1 %vm259_vm1, %v1931_v7 }
 0x7bc   :  { %5056 = vmatprep.mubr.msk.bf16.mxu1 %vm5790_vm3, %v5789_v10 }
 0x7c3   :  { %v5395_v60 = vpop.permute.xlu0 %5394 }
 0x7c4   :  { %v5397_v0 = vunpack.i.h.bf16 %v5395_v60  ;;  %v5396_v61 = vunpack.i.l.bf16 %v5395_v60 }
 0x7c6   :  { %v1911_v28 = vsel %vm523_vm4, %v1630_v38, %v5397_v0  ;;  %v1910_v46 = vsel %vm523_vm4, %v1627_v22, %v5396_v61 }
 0x7c7   :  { %v1847_v35 = vpop.permute.xlu0 %1846 }
 0x7c8   :  { %v1869_v55 = vsel %vm1866_vm9, %v1865_v39, %v1847_v35 }
 0x7cb   :  { %v1882_v62 = vpop.permute.xlu0 %1881 }
 0x7cc   :  { %v1912_v20 = vsel %vm523_vm4, %v5022_v49, %v1882_v62 }
 0x7cf   :  { %v1906_v32 = vpop.permute.xlu0 %1905 }
 0x7d3   :  { %v5400_v52 = vpop.permute.xlu1 %5399 }
 0x7d4   :  { %v5402_v27 = vunpack.i.h.bf16 %v5400_v52  ;;  %v5401_v1 = vunpack.i.l.bf16 %v5400_v52 }
 0x807   :  { %v5405_v57 = vpop.permute.xlu1 %5404 }
 0x808   :  { %v5407_v59 = vunpack.i.h.bf16 %v5405_v57  ;;  %v5406_v43 = vunpack.i.l.bf16 %v5405_v57 }
 0x80a   :  { %v1914_v63 = vsel %vm1866_vm9, %v1911_v28, %v5407_v59  ;;  %v1913_v19 = vsel %vm1866_vm9, %v1910_v46, %v5406_v43 }
 0x80b   :  { %v1917_v37 = vsel %vm1870_vm10, %v1914_v63, %v5402_v27  ;;  %v1859_v17 = vpop.permute.xlu1 %1858  ;;  %v1916_v34 = vsel %vm1870_vm10, %v1913_v19, %v5401_v1  ;;  %v5492_v27 = vld [vmem:[%s7357_s10] sm:$0xff]   ;;  %v5493_v1 = vld [vmem:[%s7357_s10 + $0x8] sm:$0xff]  }
 0x80c   :  { %v1873_v3 = vsel %vm1870_vm10, %v1869_v55, %v1859_v17  ;;  %v1922_v11 = vrot.slane %v1916_v34, 7  ;;  %v1923_v13 = vrot.slane %v1917_v37, 7  ;;  %5065 = vmatpush3.bf16.msra.mxu0 %v5492_v27  ;;  %v5494_v27 = vld [vmem:[%s7359_s12] sm:$0xff]  }
 0x80d   :  { %5066 = vmatprep.subr.bf16.mxu0 %v5789_v10  ;;  %5081 = vmatpush3.bf16.msra.mxu1 %v5494_v27 }
 0x80e   :  { %v1924_v18 = vsel %vm1339_vm8, %v1922_v11, %v1923_v13  ;;  %v1930_v40 = vsel %vm1339_vm8, %v1873_v3, %v1922_v11  ;;  %5082 = vmatprep.subr.bf16.mxu1 %v5789_v10 }
 0x80f   :  { %v1932_v29 = vpack.c.bf16 %v1924_v18, %v1930_v40  ;;  %v1894_v48 = vpop.permute.xlu1 %1893 }
 0x810   :  { %v1915_v12 = vsel %vm1866_vm9, %v1912_v20, %v1894_v48  ;;  %5067 = vmatpush3.bf16.msra.mxu0 %v5493_v1  ;;  %v5495_v1 = vld [vmem:[%s7359_s12 + $0x8] sm:$0xff]  }
 0x811   :  { %v1918_v31 = vsel %vm1870_vm10, %v1915_v12, %v1906_v32  ;;  %5057 = vmatmul.mubr.msk.bf16.gmra.mrb[52].mxu1 %vm259_vm1, %v1932_v29  ;;  %5100 = vmatprep.subr.bf16.mxu0 %v5789_v10 }
 0x812   :  { %v1925_v22 = vrot.slane %v1918_v31, 7  ;;  %5060 = vmatprep.mubr.msk.bf16.mxu1 %vm5790_vm3, %v5789_v10  ;;  %5083 = vmatpush3.bf16.msra.mxu1 %v5495_v1 }
 0x813   :  { %5084 = vmatprep.subr.bf16.mxu1 %v5789_v10 }
 0x814   :  { %v1926_v53 = vsel %vm1339_vm8, %v1923_v13, %v1925_v22 }
 0x815   :  { %v1933_v38 = vpack.c.bf16 %v1926_v53, %v1926_v53 }
 0x819   :  { %5061 = vmatmul.mubr.msk.bf16.gmra.mrb[56].mxu1 %vm259_vm1, %v1933_v38 }
 0x81a   :  { %5088 = vmatprep.mubr.msk.bf16.mxu1 %vm5790_vm3, %v5789_v10 }
 0x88e   :  { %v1993_v49 = vpop.f32.mrb[48].mxu1 }
 0x88f   :  { %v2015_v9 = vadd.f32 %v1993_v49, %v5967_v23  ;;  %v5054_v41 = vpop.f32.mrb[49].mxu1  ;;  %v4619_v49 = vld [vmem:[%s7355_s8] ss:$0 sm:$0xff] }
 0x890   :  { %v1996_v21 = vpop.f32.mrb[50].mxu1 }
 0x891   :  { %v6549_v16 = vadd.f32 %v4618_v45, %v2015_v9  ;;  %v2016_v50 = vadd.f32 %v1996_v21, %v5969_v26  ;;  %v5055_v30 = vpop.f32.mrb[51].mxu1 }
 0x893   :  { %v6552_v44 = vadd.f32 %v4618_v45, %v2016_v50  ;;  %v2034_v47 = vsel %vm259_vm1, %v6549_v16, 0.0  ;;  %v4620_v50 = vld [vmem:[%s7356_s9] ss:$0 sm:$0xff] }
 0x894   :  { %2035 = vadd.xlane.f32.xlu1 %v2034_v47 }
 0x895   :  { %v2037_v25 = vsel %vm259_vm1, %v6552_v44, 0.0 }
 0x896   :  { %2038 = vadd.xlane.f32.xlu0 %v2037_v25 }
 0x8e4   :  { %v2001_v58 = vpop.f32.mrb[52].mxu1 }
 0x8e5   :  { %v2017_v23 = vadd.f32 %v2001_v58, %v5981_v33  ;;  %v5058_v6 = vpop.f32.mrb[53].mxu1 }
 0x8e6   :  { %v2004_v8 = vpop.f32.mrb[54].mxu1 }
 0x8e7   :  { %v6559_v2 = vadd.f32 %v4618_v45, %v2017_v23  ;;  %v2018_v26 = vadd.f32 %v2004_v8, %v5983_v36  ;;  %v5059_v51 = vpop.f32.mrb[55].mxu1 }
 0x8e9   :  { %v6562_v14 = vadd.f32 %v4618_v45, %v2018_v26  ;;  %v2040_v4 = vsel %vm259_vm1, %v6559_v2, 0.0 }
 0x8ea   :  { %2041 = vadd.xlane.f32.xlu0 %v2040_v4 }
 0x8eb   :  { %v2043_v56 = vsel %vm259_vm1, %v6562_v14, 0.0 }
 0x8ec   :  { %2044 = vadd.xlane.f32.xlu1 %v2043_v56  ;;  %v2009_v5 = vpop.f32.mrb[56].mxu1 }
 0x8ed   :  { %v2019_v33 = vadd.f32 %v2009_v5, %v5992_v42  ;;  %v5062_v54 = vpop.f32.mrb[57].mxu1 }
 0x8ee   :  { %v2012_v7 = vpop.f32.mrb[58].mxu1 }
 0x8ef   :  { %v6569_v15 = vadd.f32 %v4618_v45, %v2019_v33  ;;  %v5063_v60 = vpop.f32.mrb[59].mxu1 }
 0x8f1   :  { %v2046_v36 = vsel %vm272_vm2, %v6569_v15, 0.0 }
 0x8f2   :  { %2047 = vadd.xlane.f32.xlu0 %v2046_v36 }
 0x921   :  { %v2036_v52 = vpop.xlane.xlu1 %2035 }
 0x922   :  { %v2049_v35 = vmul.f32 0.03125, %v2036_v52 }
 0x923   :  { %v2039_v0 = vpop.xlane.xlu0 %2038 }
 0x924   :  { %v2054_v61 = vsub.f32 %v6549_v16, %v2049_v35  ;;  %v2050_v57 = vmul.f32 0.03125, %v2039_v0 }
 0x926   :  { %v2055_v59 = vsub.f32 %v6552_v44, %v2050_v57  ;;  %v2059_v43 = vmul.f32 %v2054_v61, %v2054_v61 }
 0x928   :  { %v2064_v42 = vsel %vm259_vm1, %v2059_v43, 0.0  ;;  %v2060_v28 = vmul.f32 %v2055_v59, %v2055_v59 }
 0x929   :  { %2065 = vadd.xlane.f32.xlu1 %v2064_v42 }
 0x92a   :  { %v2067_v46 = vsel %vm259_vm1, %v2060_v28, 0.0 }
 0x92b   :  { %2068 = vadd.xlane.f32.xlu0 %v2067_v46 }
 0x977   :  { %v2042_v39 = vpop.xlane.xlu0 %2041 }
 0x978   :  { %v2051_v62 = vmul.f32 0.03125, %v2042_v39  ;;  %v5496_v39 = vld [vmem:[%s7359_s12 + $0x10] sm:$0xff]  }
 0x979   :  { %v2045_v63 = vpop.xlane.xlu1 %2044  ;;  %5085 = vmatpush3.bf16.msra.mxu1 %v5496_v39 }
 0x97a   :  { %v2056_v19 = vsub.f32 %v6559_v2, %v2051_v62  ;;  %v2052_v55 = vmul.f32 0.03125, %v2045_v63  ;;  %5086 = vmatprep.subr.bf16.mxu1 %v5789_v10  ;;  %v5497_v62 = vld [vmem:[%s7359_s12 + $0x18] sm:$0xff]   ;;  %v4621_v63 = vld [vmem:[%s7358_s11] ss:$0 sm:$0xff] }
 0x97c   :  { %v2057_v37 = vsub.f32 %v6562_v14, %v2052_v55  ;;  %v2061_v17 = vmul.f32 %v2056_v19, %v2056_v19 }
 0x97d   :  { %5087 = vmatpush3.bf16.msra.mxu1 %v5497_v62 }
 0x97e   :  { %v2070_v34 = vsel %vm259_vm1, %v2061_v17, 0.0  ;;  %v2062_v3 = vmul.f32 %v2057_v37, %v2057_v37 }
 0x97f   :  { %2071 = vadd.xlane.f32.xlu1 %v2070_v34  ;;  %v2048_v11 = vpop.xlane.xlu0 %2047 }
 0x980   :  { %v2053_v13 = vmul.f32 0.03125, %v2048_v11  ;;  %v2073_v18 = vsel %vm259_vm1, %v2062_v3, 0.0 }
 0x981   :  { %2074 = vadd.xlane.f32.xlu0 %v2073_v18 }
 0x982   :  { %v2058_v40 = vsub.f32 %v6569_v15, %v2053_v13 }
 0x984   :  { %v2063_v20 = vmul.f32 %v2058_v40, %v2058_v40 }
 0x986   :  { %v2076_v29 = vsel %vm272_vm2, %v2063_v20, 0.0 }
 0x987   :  { %2077 = vadd.xlane.f32.xlu1 %v2076_v29 }
 0x9b6   :  { %v2066_v48 = vpop.xlane.xlu1 %2065 }
 0x9b7   :  { %v2079_v32 = vmul.f32 0.03125, %v2066_v48 }
 0x9b8   :  { %v2069_v12 = vpop.xlane.xlu0 %2068 }
 0x9b9   :  { %v2084_v31 = vadd.f32 1e-05, %v2079_v32  ;;  %v2080_v22 = vmul.f32 0.03125, %v2069_v12 }
 0x9bb   :  { %5616 = vrsqrt.f32 %v2084_v31  ;;  %v2085_v53 = vadd.f32 1e-05, %v2080_v22 }
 0x9bd   :  { %5618 = vrsqrt.f32 %v2085_v53 }
 0x9c5   :  { %v5617_v38 = vpop.eup %5616 }
 0x9c6   :  { %v2094_v45 = vmul.f32 %v5617_v38, %v2054_v61 }
 0x9c7   :  { %v5619_v9 = vpop.eup %5618 }
 0x9c8   :  { %v2105_v41 = vmul.f32 %v4619_v49, %v2094_v45  ;;  %v2095_v21 = vmul.f32 %v5619_v9, %v2055_v59 }
 0x9ca   :  { %v2106_v30 = vmul.f32 %v4619_v49, %v2095_v21  ;;  %v2116_v47 = vadd.f32 %v4620_v50, %v2105_v41 }
 0x9cc   :  { %v2117_v25 = vadd.f32 %v4620_v50, %v2106_v30 }
 0x9ce   :  { %v2121_v58 = vpack.c.bf16 %v2117_v25, %v2116_v47 }
 0x9d0   :  { %5069 = vmatmul.mubr.msk.bf16.vlgmr.msra.gmra.mrb[40].mxu0 %vm259_vm1, %v2121_v58 }
 0x9d1   :  { %5072 = vmatprep.mubr.msk.bf16.mxu0 %vm5790_vm3, %v5789_v10 }
 0xa0c   :  { %v2072_v23 = vpop.xlane.xlu1 %2071 }
 0xa0d   :  { %v2081_v6 = vmul.f32 0.03125, %v2072_v23 }
 0xa0e   :  { %v2075_v8 = vpop.xlane.xlu0 %2074 }
 0xa0f   :  { %v2086_v26 = vadd.f32 1e-05, %v2081_v6  ;;  %v2082_v51 = vmul.f32 0.03125, %v2075_v8 }
 0xa11   :  { %5620 = vrsqrt.f32 %v2086_v26  ;;  %v2087_v4 = vadd.f32 1e-05, %v2082_v51 }
 0xa13   :  { %5622 = vrsqrt.f32 %v2087_v4 }
 0xa14   :  { %v2078_v56 = vpop.xlane.xlu1 %2077 }
 0xa15   :  { %v2083_v5 = vmul.f32 0.03125, %v2078_v56 }
 0xa17   :  { %v2088_v33 = vadd.f32 1e-05, %v2083_v5 }
 0xa19   :  { %5624 = vrsqrt.f32 %v2088_v33 }
 0xa1b   :  { %v5621_v54 = vpop.eup %5620 }
 0xa1c   :  { %v2096_v7 = vmul.f32 %v5621_v54, %v2056_v19 }
 0xa1d   :  { %v5623_v60 = vpop.eup %5622 }
 0xa1e   :  { %v2097_v36 = vmul.f32 %v5623_v60, %v2057_v37  ;;  %v2107_v52 = vmul.f32 %v4619_v49, %v2096_v7 }
 0xa20   :  { %v2108_v35 = vmul.f32 %v4619_v49, %v2097_v36  ;;  %v2118_v0 = vadd.f32 %v4620_v50, %v2107_v52 }
 0xa22   :  { %v2119_v61 = vadd.f32 %v4620_v50, %v2108_v35 }
 0xa23   :  { %v5625_v57 = vpop.eup %5624 }
 0xa24   :  { %v2122_v59 = vpack.c.bf16 %v2119_v61, %v2118_v0  ;;  %v2098_v43 = vmul.f32 %v5625_v57, %v2058_v40  ;;  %v4634_v57 = vld [vmem:[%s7360_s13] ss:$0 sm:$0xff] }
 0xa26   :  { %5073 = vmatmul.mubr.msk.bf16.gmra.mrb[44].mxu0 %vm259_vm1, %v2122_v59  ;;  %v2109_v42 = vmul.f32 %v4619_v49, %v2098_v43 }
 0xa27   :  { %5076 = vmatprep.mubr.msk.bf16.mxu0 %vm5790_vm3, %v5789_v10 }
 0xa28   :  { %v2120_v28 = vadd.f32 %v4620_v50, %v2109_v42 }
 0xa2a   :  { %v2123_v46 = vpack.c.bf16 %v2120_v28, %v2120_v28 }
 0xa2e   :  { %5077 = vmatmul.mubr.msk.bf16.gmra.mrb[48].mxu0 %vm259_vm1, %v2123_v46 }
 0xa2f   :  { %5104 = vmatprep.mubr.msk.bf16.mxu0 %vm5790_vm3, %v5789_v10 }
 0xaa3   :  { %v2190_v19 = vpop.f32.mrb[40].mxu0 }
 0xaa4   :  { %v2191_v55 = vadd.f32 %v4621_v63, %v2190_v19  ;;  %v5070_v37 = vpop.f32.mrb[41].mxu0 }
 0xaa5   :  { %v2193_v17 = vpop.f32.mrb[42].mxu0 }
 0xaa6   :  { %v2217_v34 = vmul.f32 0.70710677, %v2191_v55  ;;  %v2194_v3 = vadd.f32 %v4621_v63, %v2193_v17  ;;  %v5071_v11 = vpop.f32.mrb[43].mxu0  ;;  %v2212_v29 = vmul.f32 0.5, %v2191_v55 }
 0xaa8   :  { %5626 = verf.f32 %v2217_v34  ;;  %v2218_v13 = vmul.f32 0.70710677, %v2194_v3  ;;  %v2213_v48 = vmul.f32 0.5, %v2194_v3 }
 0xaaa   :  { %5628 = verf.f32 %v2218_v13 }
 0xab2   :  { %v5627_v18 = vpop.eup %5626 }
 0xab3   :  { %v2227_v40 = vadd.f32 1.0, %v5627_v18 }
 0xab4   :  { %v5629_v20 = vpop.eup %5628 }
 0xab5   :  { %v2228_v32 = vadd.f32 1.0, %v5629_v20  ;;  %v2232_v12 = vmul.f32 %v2227_v40, %v2212_v29 }
 0xab7   :  { %v2233_v31 = vmul.f32 %v2228_v32, %v2213_v48 }
 0xab9   :  { %v2237_v22 = vpack.c.bf16 %v2233_v31, %v2232_v12 }
 0xabb   :  { %5089 = vmatmul.mubr.msk.bf16.vlgmr.msra.gmra.mrb[60].mxu1 %vm191_vm0, %v2237_v22 }
 0xabc   :  { %5092 = vmatprep.mubr.msk.bf16.mxu1 %vm5790_vm3, %v5789_v10 }
 0xaf9   :  { %v2198_v53 = vpop.f32.mrb[44].mxu0 }
 0xafa   :  { %v2199_v38 = vadd.f32 %v4621_v63, %v2198_v53  ;;  %v5074_v49 = vpop.f32.mrb[45].mxu0 }
 0xafb   :  { %v2201_v45 = vpop.f32.mrb[46].mxu0 }
 0xafc   :  { %v2219_v9 = vmul.f32 0.70710677, %v2199_v38  ;;  %v2202_v41 = vadd.f32 %v4621_v63, %v2201_v45  ;;  %v5075_v21 = vpop.f32.mrb[47].mxu0  ;;  %v2214_v4 = vmul.f32 0.5, %v2199_v38 }
 0xafe   :  { %5630 = verf.f32 %v2219_v9  ;;  %v2220_v50 = vmul.f32 0.70710677, %v2202_v41  ;;  %v2215_v56 = vmul.f32 0.5, %v2202_v41  ;;  %v5498_v9 = vld [vmem:[%s7352_s5 + $0x10] sm:$0xff]   ;;  %v5499_v41 = vld [vmem:[%s7352_s5 + $0x18] sm:$0xff]  }
 0xaff   :  { %5101 = vmatpush3.bf16.msra.mxu0 %v5498_v9 }
 0xb00   :  { %5632 = verf.f32 %v2220_v50  ;;  %5102 = vmatprep.subr.bf16.mxu0 %v5789_v10 }
 0xb01   :  { %v2206_v30 = vpop.f32.mrb[48].mxu0 }
 0xb02   :  { %v2207_v47 = vadd.f32 %v4621_v63, %v2206_v30  ;;  %v5078_v25 = vpop.f32.mrb[49].mxu0 }
 0xb03   :  { %v2209_v58 = vpop.f32.mrb[50].mxu0  ;;  %5103 = vmatpush3.bf16.msra.mxu0 %v5499_v41 }
 0xb04   :  { %v2221_v23 = vmul.f32 0.70710677, %v2207_v47  ;;  %v5079_v6 = vpop.f32.mrb[51].mxu0  ;;  %v2216_v36 = vmul.f32 0.5, %v2207_v47 }
 0xb06   :  { %5634 = verf.f32 %v2221_v23 }
 0xb08   :  { %v5631_v8 = vpop.eup %5630 }
 0xb09   :  { %v2229_v26 = vadd.f32 1.0, %v5631_v8 }
 0xb0a   :  { %v5633_v51 = vpop.eup %5632 }
 0xb0b   :  { %v2230_v5 = vadd.f32 1.0, %v5633_v51  ;;  %v2234_v33 = vmul.f32 %v2229_v26, %v2214_v4 }
 0xb0d   :  { %v2235_v54 = vmul.f32 %v2230_v5, %v2215_v56 }
 0xb0f   :  { %v2238_v7 = vpack.c.bf16 %v2235_v54, %v2234_v33 }
 0xb10   :  { %v5635_v60 = vpop.eup %5634 }
 0xb11   :  { %v2231_v52 = vadd.f32 1.0, %v5635_v60  ;;  %5093 = vmatmul.mubr.msk.bf16.gmra.mrb[64].mxu1 %vm191_vm0, %v2238_v7 }
 0xb12   :  { %5096 = vmatprep.mubr.msk.bf16.mxu1 %vm5790_vm3, %v5789_v10 }
 0xb13   :  { %v2236_v35 = vmul.f32 %v2231_v52, %v2216_v36 }
 0xb15   :  { %v2239_v0 = vpack.c.bf16 %v2236_v35, %v2236_v35 }
 0xb19   :  { %5097 = vmatmul.mubr.msk.bf16.gmra.mrb[68].mxu1 %vm191_vm0, %v2239_v0 }
 0xb8e   :  { %v2315_v61 = vpop.f32.mrb[60].mxu1 }
 0xb8f   :  { %v2337_v59 = vadd.f32 %v2315_v61, %v6549_v16  ;;  %v5090_v43 = vpop.f32.mrb[61].mxu1  ;;  %v4637_v61 = vld [vmem:[%s7350_s3 + $0x1] ss:$0 sm:$0xff] }
 0xb90   :  { %v2318_v42 = vpop.f32.mrb[62].mxu1 }
 0xb91   :  { %v6635_v28 = vadd.f32 %v4634_v57, %v2337_v59  ;;  %v2338_v46 = vadd.f32 %v2318_v42, %v6552_v44  ;;  %v5091_v27 = vpop.f32.mrb[63].mxu1 }
 0xb93   :  { %v6638_v1 = vadd.f32 %v4634_v57, %v2338_v46  ;;  %v2358_v39 = vsel %vm259_vm1, %v6635_v28, 0.0  ;;  %v4638_v46 = vld [vmem:[%s7351_s4 + $0x1] ss:$0 sm:$0xff] }
 0xb94   :  { %2359 = vadd.xlane.f32.xlu0 %v2358_v39 }
 0xb95   :  { %v2361_v62 = vsel %vm259_vm1, %v6638_v1, 0.0 }
 0xb96   :  { %2362 = vadd.xlane.f32.xlu1 %v2361_v62 }
 0xbe4   :  { %v2323_v63 = vpop.f32.mrb[64].mxu1 }
 0xbe5   :  { %v2339_v16 = vadd.f32 %v2323_v63, %v6559_v2  ;;  %v5094_v19 = vpop.f32.mrb[65].mxu1 }
 0xbe6   :  { %v2326_v55 = vpop.f32.mrb[66].mxu1 }
 0xbe7   :  { %v6645_v37 = vadd.f32 %v4634_v57, %v2339_v16  ;;  %v2340_v44 = vadd.f32 %v2326_v55, %v6562_v14  ;;  %v5095_v17 = vpop.f32.mrb[67].mxu1 }
 0xbe9   :  { %v6648_v34 = vadd.f32 %v4634_v57, %v2340_v44  ;;  %v2364_v3 = vsel %vm259_vm1, %v6645_v37, 0.0 }
 0xbea   :  { %2365 = vadd.xlane.f32.xlu0 %v2364_v3 }
 0xbeb   :  { %v2367_v11 = vsel %vm259_vm1, %v6648_v34, 0.0 }
 0xbec   :  { %2368 = vadd.xlane.f32.xlu1 %v2367_v11  ;;  %v2331_v13 = vpop.f32.mrb[68].mxu1 }
 0xbed   :  { %v2341_v2 = vadd.f32 %v2331_v13, %v6569_v15  ;;  %v5098_v18 = vpop.f32.mrb[69].mxu1 }
 0xbee   :  { %v2334_v40 = vpop.f32.mrb[70].mxu1 }
 0xbef   :  { %v6655_v20 = vadd.f32 %v4634_v57, %v2341_v2  ;;  %v5099_v29 = vpop.f32.mrb[71].mxu1 }
 0xbf1   :  { %v2370_v14 = vsel %vm272_vm2, %v6655_v20, 0.0 }
 0xbf2   :  { %2371 = vadd.xlane.f32.xlu0 %v2370_v14 }
 0xc21   :  { %v2360_v48 = vpop.xlane.xlu0 %2359 }
 0xc22   :  { %v2373_v32 = vmul.f32 0.03125, %v2360_v48 }
 0xc23   :  { %v2363_v12 = vpop.xlane.xlu1 %2362 }
 0xc24   :  { %v2378_v31 = vsub.f32 %v6635_v28, %v2373_v32  ;;  %v2374_v22 = vmul.f32 0.03125, %v2363_v12 }
 0xc26   :  { %v2379_v53 = vsub.f32 %v6638_v1, %v2374_v22  ;;  %v2383_v38 = vmul.f32 %v2378_v31, %v2378_v31 }
 0xc28   :  { %v2388_v15 = vsel %vm259_vm1, %v2383_v38, 0.0  ;;  %v2384_v49 = vmul.f32 %v2379_v53, %v2379_v53 }
 0xc29   :  { %2389 = vadd.xlane.f32.xlu1 %v2388_v15 }
 0xc2a   :  { %v2391_v45 = vsel %vm259_vm1, %v2384_v49, 0.0 }
 0xc2b   :  { %2392 = vadd.xlane.f32.xlu0 %v2391_v45 }
 0xc77   :  { %v2366_v21 = vpop.xlane.xlu0 %2365 }
 0xc78   :  { %v2375_v50 = vmul.f32 0.03125, %v2366_v21 }
 0xc79   :  { %v2369_v30 = vpop.xlane.xlu1 %2368 }
 0xc7a   :  { %v2380_v47 = vsub.f32 %v6645_v37, %v2375_v50  ;;  %v2376_v25 = vmul.f32 0.03125, %v2369_v30 }
 0xc7c   :  { %v2381_v58 = vsub.f32 %v6648_v34, %v2376_v25  ;;  %v2385_v23 = vmul.f32 %v2380_v47, %v2380_v47 }
 0xc7e   :  { %v2394_v6 = vsel %vm259_vm1, %v2385_v23, 0.0  ;;  %v2386_v8 = vmul.f32 %v2381_v58, %v2381_v58 }
 0xc7f   :  { %2395 = vadd.xlane.f32.xlu1 %v2394_v6  ;;  %v2372_v26 = vpop.xlane.xlu0 %2371 }
 0xc80   :  { %v2377_v51 = vmul.f32 0.03125, %v2372_v26  ;;  %v2397_v4 = vsel %vm259_vm1, %v2386_v8, 0.0 }
 0xc81   :  { %2398 = vadd.xlane.f32.xlu0 %v2397_v4 }
 0xc82   :  { %v2382_v56 = vsub.f32 %v6655_v20, %v2377_v51 }
 0xc84   :  { %v2387_v5 = vmul.f32 %v2382_v56, %v2382_v56 }
 0xc86   :  { %v2400_v33 = vsel %vm272_vm2, %v2387_v5, 0.0 }
 0xc87   :  { %2401 = vadd.xlane.f32.xlu1 %v2400_v33 }
 0xcb6   :  { %v2390_v54 = vpop.xlane.xlu1 %2389 }
 0xcb7   :  { %v2403_v7 = vmul.f32 0.03125, %v2390_v54 }
 0xcb8   :  { %v2393_v60 = vpop.xlane.xlu0 %2392 }
 0xcb9   :  { %v2408_v36 = vadd.f32 1e-05, %v2403_v7  ;;  %v2404_v52 = vmul.f32 0.03125, %v2393_v60 }
 0xcbb   :  { %5636 = vrsqrt.f32 %v2408_v36  ;;  %v2409_v35 = vadd.f32 1e-05, %v2404_v52 }
 0xcbd   :  { %5638 = vrsqrt.f32 %v2409_v35 }
 0xcc5   :  { %v5637_v0 = vpop.eup %5636 }
 0xcc6   :  { %v2418_v57 = vmul.f32 %v5637_v0, %v2378_v31 }
 0xcc7   :  { %v5639_v59 = vpop.eup %5638 }
 0xcc8   :  { %v2429_v43 = vmul.f32 %v4637_v61, %v2418_v57  ;;  %v2419_v42 = vmul.f32 %v5639_v59, %v2379_v53 }
 0xcca   :  { %v2430_v27 = vmul.f32 %v4637_v61, %v2419_v42  ;;  %v2440_v39 = vadd.f32 %v4638_v46, %v2429_v43 }
 0xccc   :  { %v2441_v62 = vadd.f32 %v4638_v46, %v2430_v27 }
 0xcce   :  { %v2445_v63 = vpack.c.bf16 %v2441_v62, %v2440_v39 }
 0xcd0   :  { %5105 = vmatmul.mubr.msk.bf16.vlgmr.msra.gmra.mrb[52].mxu0 %vm259_vm1, %v2445_v63 }
 0xcd1   :  { %5108 = vmatprep.mubr.msk.bf16.mxu0 %vm5790_vm3, %v5789_v10 }
 0xd0c   :  { %v2396_v16 = vpop.xlane.xlu1 %2395 }
 0xd0d   :  { %v2405_v19 = vmul.f32 0.03125, %v2396_v16 }
 0xd0e   :  { %v2399_v55 = vpop.xlane.xlu0 %2398 }
 0xd0f   :  { %v2410_v44 = vadd.f32 1e-05, %v2405_v19  ;;  %v2406_v17 = vmul.f32 0.03125, %v2399_v55 }
 0xd11   :  { %5640 = vrsqrt.f32 %v2410_v44  ;;  %v2411_v3 = vadd.f32 1e-05, %v2406_v17 }
 0xd13   :  { %5642 = vrsqrt.f32 %v2411_v3 }
 0xd14   :  { %v2402_v11 = vpop.xlane.xlu1 %2401 }
 0xd15   :  { %v2407_v13 = vmul.f32 0.03125, %v2402_v11 }
 0xd17   :  { %v2412_v2 = vadd.f32 1e-05, %v2407_v13 }
 0xd19   :  { %5644 = vrsqrt.f32 %v2412_v2 }
 0xd1b   :  { %v5641_v18 = vpop.eup %5640 }
 0xd1c   :  { %v2420_v40 = vmul.f32 %v5641_v18, %v2380_v47 }
 0xd1d   :  { %v5643_v29 = vpop.eup %5642 }
 0xd1e   :  { %v2421_v14 = vmul.f32 %v5643_v29, %v2381_v58  ;;  %v2431_v48 = vmul.f32 %v4637_v61, %v2420_v40 }
 0xd20   :  { %v2432_v32 = vmul.f32 %v4637_v61, %v2421_v14  ;;  %v2442_v12 = vadd.f32 %v4638_v46, %v2431_v48 }
 0xd22   :  { %v2443_v31 = vadd.f32 %v4638_v46, %v2432_v32 }
 0xd23   :  { %v5645_v22 = vpop.eup %5644 }
 0xd24   :  { %v2446_v53 = vpack.c.bf16 %v2443_v31, %v2442_v12  ;;  %v2422_v38 = vmul.f32 %v5645_v22, %v2382_v56 }
 0xd26   :  { %5109 = vmatmul.mubr.msk.bf16.gmra.mrb[56].mxu0 %vm259_vm1, %v2446_v53  ;;  %v2433_v15 = vmul.f32 %v4637_v61, %v2422_v38 }
 0xd27   :  { %5112 = vmatprep.mubr.msk.bf16.mxu0 %vm5790_vm3, %v5789_v10 }
 0xd28   :  { %v2444_v49 = vadd.f32 %v4638_v46, %v2433_v15 }
 0xd2a   :  { %v2447_v45 = vpack.c.bf16 %v2444_v49, %v2444_v49 }
 0xd2e   :  { %5113 = vmatmul.mubr.msk.bf16.gmra.mrb[60].mxu0 %vm259_vm1, %v2447_v45 }
 0xda3   :  { %v2508_v9 = vpop.f32.mrb[52].mxu0 }
 0xda4   :  { %v5106_v41 = vpop.f32.mrb[53].mxu0 }
 0xda5   :  { %v2511_v21 = vpop.f32.mrb[54].mxu0 }
 0xda6   :  { %v5418_v50 = vpack.i.bf16 %v2511_v21, %v2508_v9  ;;  %v6689_v30 = vpack.c.bf16 %v2511_v21, %v2508_v9  ;;  %v5107_v47 = vpop.f32.mrb[55].mxu0 }
 0xda8   :  { %5409 = vrot.lane.b32.xlu0 %v5418_v50, %s5791_s25  ;;  %5120 = vmatprep.mubr.msk.bf16.mxu1 %vm523_vm4, %v6689_v30 }
 0xdac   :  { %5419 = vrot.lane.b32.xlu0 %v5418_v50, %s5793_s26 }
 0xdf9   :  { %v2516_v25 = vpop.f32.mrb[56].mxu0 }
 0xdfa   :  { %2555 = vrot.lane.b32.xlu0 %v2516_v25, %s5793_s26  ;;  %2537 = vrot.lane.b32.xlu1 %v2516_v25, %s5791_s25  ;;  %v5110_v58 = vpop.f32.mrb[57].mxu0  ;;  %v2562_v6 = vrot.slane %v2516_v25, 1  ;;  %v6711_v52 = vpack.c.bf16 %v2516_v25, %v2516_v25 }
 0xdfb   :  { %v2519_v23 = vpop.f32.mrb[58].mxu0 }
 0xdfc   :  { %v2563_v8 = vrot.slane %v2519_v23, 1  ;;  %v5111_v26 = vpop.f32.mrb[59].mxu0 }
 0xdfe   :  { %v2564_v51 = vsel %vm465_vm5, %v2562_v6, %v2563_v8  ;;  %5414 = vrot.lane.b32.xlu1 %v5418_v50, %s5792_s23 }
 0xe01   :  { %v2524_v4 = vpop.f32.mrb[60].mxu0 }
 0xe02   :  { %v2565_v56 = vrot.slane %v2524_v4, 1  ;;  %2546 = vrot.lane.b32.xlu1 %v2516_v25, %s5792_s23  ;;  %v5114_v5 = vpop.f32.mrb[61].mxu0 }
 0xe03   :  { %v2527_v33 = vpop.f32.mrb[62].mxu0 }
 0xe04   :  { %2574 = vrot.lane.b32.xlu0 %v2565_v56, %s5791_s25  ;;  %v5115_v54 = vpop.f32.mrb[63].mxu0  ;;  %v2566_v7 = vsel %vm465_vm5, %v2563_v8, %v2565_v56  ;;  %v6743_v12 = vpack.c.bf16 %v2565_v56, %v2565_v56 }
 0xe05   :  { %v5423_v60 = vpack.i.bf16 %v2566_v7, %v2564_v51  ;;  %v6702_v36 = vpack.c.bf16 %v2566_v7, %v2564_v51 }
 0xe07   :  { %5424 = vrot.lane.b32.xlu1 %v5423_v60, %s5791_s25 }
 0xe08   :  { %5434 = vrot.lane.b32.xlu0 %v5423_v60, %s5793_s26 }
 0xe0b   :  { %5429 = vrot.lane.b32.xlu1 %v5423_v60, %s5792_s23 }
 0xe0c   :  { %2592 = vrot.lane.b32.xlu0 %v2565_v56, %s5793_s26  ;;  %s7377_s26 = smov 24  }
 0xe0f   :  { %2583 = vrot.lane.b32.xlu1 %v2565_v56, %s5792_s23 }
 0xe13   :  { %2615 = vrot.lane.b32.xlu1 %v6689_v30, %s5794_s27 }
 0xe17   :  { %2617 = vrot.lane.b32.xlu1 %v6711_v52, %s5794_s27 }
 0xe1a   :  { %v5410_v35 = vpop.permute.xlu0 %5409 }
 0xe1b   :  { %v5412_v0 = vunpack.i.h.bf16 %v5410_v35  ;;  %v5411_v61 = vunpack.i.l.bf16 %v5410_v35 }
 0xe1d   :  { %v2599_v57 = vpack.c.bf16 %v5412_v0, %v5411_v61 }
 0xe1e   :  { %v5420_v59 = vpop.permute.xlu0 %5419 }
 0xe1f   :  { %2681 = vrot.lane.b32.xlu0 %v2599_v57, %s5794_s27  ;;  %5128 = vmatprep.mubr.msk.bf16.mxu0 %vm523_vm4, %v2599_v57  ;;  %v5422_v42 = vunpack.i.h.bf16 %v5420_v59  ;;  %v5421_v46 = vunpack.i.l.bf16 %v5420_v59 }
 0xe21   :  { %v6721_v62 = vpack.c.bf16 %v5422_v42, %v5421_v46 }
 0xe6c   :  { %v2538_v43 = vpop.permute.xlu1 %2537  ;;  %v2556_v19 = vpop.permute.xlu0 %2555 }
 0xe6d   :  { %v6717_v27 = vpack.c.bf16 %v2538_v43, %v2538_v43  ;;  %v6727_v17 = vpack.c.bf16 %v2556_v19, %v2556_v19 }
 0xe6f   :  { %2683 = vrot.lane.b32.xlu0 %v6717_v27, %s5794_s27 }
 0xe70   :  { %v5415_v39 = vpop.permute.xlu1 %5414 }
 0xe71   :  { %v5417_v63 = vunpack.i.h.bf16 %v5415_v39  ;;  %v5416_v16 = vunpack.i.l.bf16 %v5415_v39 }
 0xe73   :  { %v6723_v55 = vpack.c.bf16 %v5417_v63, %v5416_v16  ;;  %2813 = vrot.lane.b32.xlu0 %v6721_v62, %s5794_s27 }
 0xe74   :  { %v2547_v44 = vpop.permute.xlu1 %2546 }
 0xe75   :  { %2747 = vrot.lane.b32.xlu1 %v6723_v55, %s5794_s27  ;;  %v6731_v3 = vpack.c.bf16 %v2547_v44, %v2547_v44 }
 0xe76   :  { %v2575_v11 = vpop.permute.xlu0 %2574 }
 0xe77   :  { %2815 = vrot.lane.b32.xlu0 %v6727_v17, %s5794_s27  ;;  %v6745_v31 = vpack.c.bf16 %v2575_v11, %v2575_v11 }
 0xe79   :  { %2749 = vrot.lane.b32.xlu1 %v6731_v3, %s5794_s27  ;;  %v5425_v13 = vpop.permute.xlu1 %5424 }
 0xe7a   :  { %v5427_v2 = vunpack.i.h.bf16 %v5425_v13  ;;  %v5426_v18 = vunpack.i.l.bf16 %v5425_v13  ;;  %v5435_v29 = vpop.permute.xlu0 %5434 }
 0xe7b   :  { %v5437_v22 = vunpack.i.h.bf16 %v5435_v29  ;;  %v5436_v53 = vunpack.i.l.bf16 %v5435_v29 }
 0xe7c   :  { %v6737_v40 = vpack.c.bf16 %v5427_v2, %v5426_v18 }
 0xe7d   :  { %v5430_v14 = vpop.permute.xlu1 %5429  ;;  %2879 = vrot.lane.b32.xlu1 %v6702_v36, %s5794_s27  ;;  %v6753_v49 = vpack.c.bf16 %v5437_v22, %v5436_v53 }
 0xe7e   :  { %2945 = vrot.lane.b32.xlu0 %v6737_v40, %s5794_s27  ;;  %v5432_v48 = vunpack.i.h.bf16 %v5430_v14  ;;  %v5431_v32 = vunpack.i.l.bf16 %v5430_v14  ;;  %v2593_v45 = vpop.permute.xlu0 %2592 }
 0xe7f   :  { %v6763_v50 = vpack.c.bf16 %v2593_v45, %v2593_v45 }
 0xe80   :  { %v6751_v15 = vpack.c.bf16 %v5432_v48, %v5431_v32 }
 0xe81   :  { %v2584_v38 = vpop.permute.xlu1 %2583  ;;  %2881 = vrot.lane.b32.xlu1 %v6743_v12, %s5794_s27 }
 0xe82   :  { %2947 = vrot.lane.b32.xlu0 %v6745_v31, %s5794_s27  ;;  %v6761_v21 = vpack.c.bf16 %v2584_v38, %v2584_v38 }
 0xe85   :  { %v2616_v9 = vpop.permute.xlu1 %2615  ;;  %3011 = vrot.lane.b32.xlu1 %v6751_v15, %s5794_s27 }
 0xe86   :  { %5320 = vmatprep.subr.msk.bf16.mxu1 %vm523_vm4, %v2616_v9  ;;  %3077 = vrot.lane.b32.xlu0 %v6753_v49, %s5794_s27  ;;  %v2626_v41 = vsel %vm523_vm4, %v2616_v9, 0 }
 0xe87   :  { %5117 = vmatpush3.bf16.xpose.msra.mxu1 %v2626_v41 }
 0xe89   :  { %v2618_v47 = vpop.permute.xlu1 %2617  ;;  %3013 = vrot.lane.b32.xlu1 %v6761_v21, %s5794_s27 }
 0xe8a   :  { %5321 = vmatprep.subr.msk.bf16.mxu1 %vm523_vm4, %v2618_v47  ;;  %3079 = vrot.lane.b32.xlu0 %v6763_v50, %s5794_s27  ;;  %v2629_v25 = vsel %vm523_vm4, %v2618_v47, 0 }
 0xe8d   :  { %3483 = vrot.lane.b32.xlu1 %v2599_v57, %s5795_s28 }
 0xe8e   :  { %3421 = vrot.lane.b32.xlu0 %v6689_v30, %s5795_s28 }
 0xe8f   :  { %5119 = vmatpush3.bf16.xpose.msra.mxu1 %v2629_v25 }
 0xe91   :  { %v2682_v58 = vpop.permute.xlu0 %2681 }
 0xe92   :  { %v2692_v23 = vsel %vm523_vm4, %v2682_v58, 0  ;;  %5322 = vmatprep.subr.msk.bf16.mxu0 %vm523_vm4, %v2682_v58 }
 0xe93   :  { %5125 = vmatpush3.bf16.xpose.msra.mxu0 %v2692_v23 }
 0xe96   :  { %5121 = vmatmul.mubr.msk.bf16.vlgmr.msra.gmra.mrb[72].mxu1 %vm523_vm4, %v6711_v52 }
 0xe97   :  { %5136 = vmatprep.mubr.msk.bf16.mxu1 %vm523_vm4, %v6723_v55 }
 0xee1   :  { %v2684_v6 = vpop.permute.xlu0 %2683 }
 0xee2   :  { %v2695_v8 = vsel %vm523_vm4, %v2684_v6, 0  ;;  %5323 = vmatprep.subr.msk.bf16.mxu0 %vm523_vm4, %v2684_v6 }
 0xee3   :  { %5127 = vmatpush3.bf16.xpose.msra.mxu0 %v2695_v8 }
 0xee5   :  { %v2814_v30 = vpop.permute.xlu0 %2813 }
 0xee6   :  { %5326 = vmatprep.subr.msk.bf16.mxu0 %vm523_vm4, %v2814_v30  ;;  %v2824_v4 = vsel %vm523_vm4, %v2814_v30, 0 }
 0xee7   :  { %v2748_v26 = vpop.permute.xlu1 %2747 }
 0xee8   :  { %5324 = vmatprep.subr.msk.bf16.mxu1 %vm523_vm4, %v2748_v26  ;;  %v2758_v51 = vsel %vm523_vm4, %v2748_v26, 0 }
 0xee9   :  { %5133 = vmatpush3.bf16.xpose.msra.mxu1 %v2758_v51  ;;  %v2816_v56 = vpop.permute.xlu0 %2815 }
 0xeea   :  { %5129 = vmatmul.mubr.msk.bf16.vlgmr.msra.gmra.mrb[64].mxu0 %vm523_vm4, %v6717_v27  ;;  %v2827_v7 = vsel %vm523_vm4, %v2816_v56, 0 }
 0xeeb   :  { %v2750_v5 = vpop.permute.xlu1 %2749  ;;  %5141 = vmatpush3.bf16.xpose.msra.mxu0 %v2824_v4  ;;  %5144 = vmatprep.mubr.msk.bf16.mxu0 %vm523_vm4, %v6721_v62 }
 0xeec   :  { %5325 = vmatprep.subr.msk.bf16.mxu1 %vm523_vm4, %v2750_v5  ;;  %5327 = vmatprep.subr.msk.bf16.mxu0 %vm523_vm4, %v2816_v56  ;;  %v2761_v33 = vsel %vm523_vm4, %v2750_v5, 0 }
 0xeef   :  { %v2880_v54 = vpop.permute.xlu1 %2879 }
 0xef0   :  { %v2946_v60 = vpop.permute.xlu0 %2945  ;;  %v2890_v35 = vsel %vm523_vm4, %v2880_v54, 0 }
 0xef1   :  { %5135 = vmatpush3.bf16.xpose.msra.mxu1 %v2761_v33  ;;  %v2956_v61 = vsel %vm523_vm4, %v2946_v60, 0 }
 0xef2   :  { %5328 = vmatprep.subr.msk.bf16.mxu1 %vm523_vm4, %v2880_v54 }
 0xef3   :  { %5143 = vmatpush3.bf16.xpose.msra.mxu0 %v2827_v7  ;;  %v2882_v0 = vpop.permute.xlu1 %2881 }
 0xef4   :  { %5330 = vmatprep.subr.msk.bf16.mxu0 %vm523_vm4, %v2946_v60  ;;  %v2948_v57 = vpop.permute.xlu0 %2947  ;;  %v2893_v59 = vsel %vm523_vm4, %v2882_v0, 0 }
 0xef5   :  { %v2959_v42 = vsel %vm523_vm4, %v2948_v57, 0 }
 0xef7   :  { %v3012_v43 = vpop.permute.xlu1 %3011 }
 0xef8   :  { %5137 = vmatmul.mubr.msk.bf16.vlgmr.msra.gmra.mrb[76].mxu1 %vm523_vm4, %v6731_v3  ;;  %v3078_v46 = vpop.permute.xlu0 %3077  ;;  %v3022_v39 = vsel %vm523_vm4, %v3012_v43, 0 }
 0xef9   :  { %5149 = vmatpush3.bf16.xpose.msra.mxu1 %v2890_v35  ;;  %5152 = vmatprep.mubr.msk.bf16.mxu1 %vm523_vm4, %v6702_v36  ;;  %v3088_v16 = vsel %vm523_vm4, %v3078_v46, 0 }
 0xefa   :  { %5145 = vmatmul.mubr.msk.bf16.vlgmr.msra.gmra.mrb[68].mxu0 %vm523_vm4, %v6727_v17  ;;  %5329 = vmatprep.subr.msk.bf16.mxu1 %vm523_vm4, %v2882_v0 }
 0xefb   :  { %5157 = vmatpush3.bf16.xpose.msra.mxu0 %v2956_v61  ;;  %5160 = vmatprep.mubr.msk.bf16.mxu0 %vm523_vm4, %v6737_v40  ;;  %v3014_v63 = vpop.permute.xlu1 %3013 }
 0xefc   :  { %5331 = vmatprep.subr.msk.bf16.mxu0 %vm523_vm4, %v2948_v57  ;;  %v3080_v19 = vpop.permute.xlu0 %3079  ;;  %v3025_v44 = vsel %vm523_vm4, %v3014_v63, 0 }
 0xefd   :  { %v3091_v13 = vsel %vm523_vm4, %v3080_v19, 0 }
 0xeff   :  { %v3484_v2 = vpop.permute.xlu1 %3483 }
 0xf00   :  { %v3422_v11 = vpop.permute.xlu0 %3421 }
 0xf01   :  { %5151 = vmatpush3.bf16.xpose.msra.mxu1 %v2893_v59 }
 0xf02   :  { %5332 = vmatprep.subr.msk.bf16.mxu1 %vm523_vm4, %v3012_v43 }
 0xf03   :  { %5159 = vmatpush3.bf16.xpose.msra.mxu0 %v2959_v42 }
 0xf04   :  { %5334 = vmatprep.subr.msk.bf16.mxu0 %vm523_vm4, %v3078_v46 }
 0xf08   :  { %5153 = vmatmul.mubr.msk.bf16.vlgmr.msra.gmra.mrb[80].mxu1 %vm523_vm4, %v6743_v12 }
 0xf09   :  { %5165 = vmatpush3.bf16.xpose.msra.mxu1 %v3022_v39  ;;  %5168 = vmatprep.mubr.msk.bf16.mxu1 %vm523_vm4, %v6751_v15 }
 0xf0a   :  { %5161 = vmatmul.mubr.msk.bf16.vlgmr.msra.gmra.mrb[72].mxu0 %vm523_vm4, %v6745_v31  ;;  %5333 = vmatprep.subr.msk.bf16.mxu1 %vm523_vm4, %v3014_v63 }
 0xf0b   :  { %5173 = vmatpush3.bf16.xpose.msra.mxu0 %v3088_v16  ;;  %5176 = vmatprep.mubr.msk.bf16.mxu0 %vm523_vm4, %v6753_v49 }
 0xf0c   :  { %5335 = vmatprep.subr.msk.bf16.mxu0 %vm523_vm4, %v3080_v19 }
 0xf11   :  { %5167 = vmatpush3.bf16.xpose.msra.mxu1 %v3025_v44 }
 0xf12   :  { %5180 = vmatprep.subr.bf16.mxu1 %v3422_v11 }
 0xf13   :  { %5175 = vmatpush3.bf16.xpose.msra.mxu0 %v3091_v13 }
 0xf14   :  { %5188 = vmatprep.subr.bf16.mxu0 %v3484_v2 }
 0xf18   :  { %5169 = vmatmul.mubr.msk.bf16.vlgmr.msra.gmra.mrb[84].mxu1 %vm523_vm4, %v6761_v21 }
 0xf19   :  { %5181 = vmatpush3.bf16.msra.mxu1 %v3422_v11 }
 0xf1a   :  { %5177 = vmatmul.mubr.msk.bf16.vlgmr.msra.gmra.mrb[76].mxu0 %vm523_vm4, %v6763_v50 }
 0xf1b   :  { %5189 = vmatpush3.bf16.msra.mxu0 %v3484_v2 }
 0xf69   :  { %v6830_v18 = vpop.f32.mrb[72].mxu1 }
 0xf6a   :  { %v6832_v29 = vpop.f32.mrb[73].mxu1  ;;  %v3147_v14 = vsel %vm1053_vm6, %v6830_v18, -inf }
 0xf6b   :  { %3148 = vmax.xlane.f32.xlu0 %v3147_v14  ;;  %v5123_v48 = vpop.f32.mrb[74].mxu1  ;;  %v3141_v32 = vsel %vm1046_vm7, %v6832_v29, -inf }
 0xf6c   :  { %3142 = vmax.xlane.f32.xlu1 %v3141_v32  ;;  %v6838_v22 = vpop.f32.mrb[75].mxu1 }
 0xf6d   :  { %v3144_v53 = vsel %vm1046_vm7, %v6838_v22, -inf }
 0xf6f   :  { %3145 = vmax.xlane.f32.xlu0 %v3144_v53 }
 0xfbd   :  { %v6842_v38 = vpop.f32.mrb[64].mxu0 }
 0xfbe   :  { %v6844_v45 = vpop.f32.mrb[65].mxu0  ;;  %v3156_v9 = vsel %vm1053_vm6, %v6842_v38, -inf }
 0xfbf   :  { %v5131_v41 = vpop.f32.mrb[66].mxu0  ;;  %3157 = vmax.xlane.f32.xlu1 %v3156_v9  ;;  %v3150_v25 = vsel %vm1046_vm7, %v6844_v45, -inf }
 0xfc0   :  { %v6848_v47 = vpop.f32.mrb[67].mxu0 }
 0xfc1   :  { %v3153_v7 = vsel %vm1046_vm7, %v6848_v47, -inf }
 0xfc3   :  { %3151 = vmax.xlane.f32.xlu1 %v3150_v25 }
 0xfcb   :  { %v6852_v58 = vpop.f32.mrb[76].mxu1 }
 0xfcc   :  { %v6854_v23 = vpop.f32.mrb[77].mxu1  ;;  %v3165_v6 = vsel %vm1053_vm6, %v6852_v58, -inf }
 0xfcd   :  { %v6858_v8 = vpop.f32.mrb[68].mxu0  ;;  %3166 = vmax.xlane.f32.xlu0 %v3165_v6  ;;  %v5139_v30 = vpop.f32.mrb[78].mxu1  ;;  %v3159_v33 = vsel %vm1046_vm7, %v6854_v23, -inf }
 0xfce   :  { %v6860_v26 = vpop.f32.mrb[79].mxu1  ;;  %v6862_v51 = vpop.f32.mrb[69].mxu0  ;;  %v3174_v54 = vsel %vm1053_vm6, %v6858_v8, -inf }
 0xfcf   :  { %v5147_v4 = vpop.f32.mrb[70].mxu0  ;;  %v3162_v56 = vsel %vm1046_vm7, %v6860_v26, -inf  ;;  %v3168_v60 = vsel %vm1046_vm7, %v6862_v51, -inf }
 0xfd0   :  { %v6866_v5 = vpop.f32.mrb[71].mxu0  ;;  %3163 = vmax.xlane.f32.xlu1 %v3162_v56 }
 0xfd1   :  { %3160 = vmax.xlane.f32.xlu0 %v3159_v33  ;;  %v3171_v44 = vsel %vm1046_vm7, %v6866_v5, -inf }
 0xfd4   :  { %3175 = vmax.xlane.f32.xlu1 %v3174_v54 }
 0xfd5   :  { %3154 = vmax.xlane.f32.xlu0 %v3153_v7 }
 0xfd8   :  { %3169 = vmax.xlane.f32.xlu1 %v3168_v60 }
 0xfdb   :  { %v6876_v35 = vpop.f32.mrb[80].mxu1 }
 0xfdc   :  { %v6878_v0 = vpop.f32.mrb[81].mxu1  ;;  %v3183_v61 = vsel %vm1053_vm6, %v6876_v35, -inf }
 0xfdd   :  { %v6882_v57 = vpop.f32.mrb[72].mxu0  ;;  %3184 = vmax.xlane.f32.xlu0 %v3183_v61  ;;  %v5155_v59 = vpop.f32.mrb[82].mxu1  ;;  %v3177_v16 = vsel %vm1046_vm7, %v6878_v0, -inf }
 0xfde   :  { %v6884_v43 = vpop.f32.mrb[83].mxu1  ;;  %v6886_v42 = vpop.f32.mrb[73].mxu0  ;;  %v3192_v19 = vsel %vm1053_vm6, %v6882_v57, -inf }
 0xfdf   :  { %v5163_v46 = vpop.f32.mrb[74].mxu0  ;;  %v3180_v39 = vsel %vm1046_vm7, %v6884_v43, -inf  ;;  %v3186_v11 = vsel %vm1046_vm7, %v6886_v42, -inf }
 0xfe0   :  { %v6890_v63 = vpop.f32.mrb[75].mxu0  ;;  %3181 = vmax.xlane.f32.xlu1 %v3180_v39 }
 0xfe1   :  { %3178 = vmax.xlane.f32.xlu0 %v3177_v16  ;;  %v3189_v4 = vsel %vm1046_vm7, %v6890_v63, -inf }
 0xfe4   :  { %3193 = vmax.xlane.f32.xlu1 %v3192_v19 }
 0xfe5   :  { %3172 = vmax.xlane.f32.xlu0 %v3171_v44 }
 0xfe8   :  { %3187 = vmax.xlane.f32.xlu1 %v3186_v11 }
 0xfeb   :  { %v6900_v13 = vpop.f32.mrb[84].mxu1 }
 0xfec   :  { %v6902_v2 = vpop.f32.mrb[85].mxu1  ;;  %v3201_v14 = vsel %vm1053_vm6, %v6900_v13, -inf }
 0xfed   :  { %v6906_v48 = vpop.f32.mrb[76].mxu0  ;;  %3202 = vmax.xlane.f32.xlu0 %v3201_v14  ;;  %v5171_v32 = vpop.f32.mrb[86].mxu1  ;;  %v3195_v30 = vsel %vm1046_vm7, %v6902_v2, -inf }
 0xfee   :  { %v6908_v53 = vpop.f32.mrb[87].mxu1  ;;  %v6910_v9 = vpop.f32.mrb[77].mxu0  ;;  %v3210_v14 = vsel %vm1053_vm6, %v6906_v48, -inf }
 0xfef   :  { %v5179_v41 = vpop.f32.mrb[78].mxu0  ;;  %v3198_v25 = vsel %vm1046_vm7, %v6908_v53, -inf  ;;  %v3204_v32 = vsel %vm1046_vm7, %v6910_v9, -inf }
 0xff0   :  { %v6914_v6 = vpop.f32.mrb[79].mxu0  ;;  %3199 = vmax.xlane.f32.xlu1 %v3198_v25 }
 0xff1   :  { %3196 = vmax.xlane.f32.xlu0 %v3195_v30 }
 0xff5   :  { %3190 = vmax.xlane.f32.xlu0 %v3189_v4 }
 0xff8   :  { %v3149_v56 = vpop.xlane.xlu0 %3148 }
 0xff9   :  { %v3215_v33 = vsub.f32 %v6830_v18, %v3149_v56  ;;  %v3143_v54 = vpop.xlane.xlu1 %3142 }
 0xffa   :  { %v3213_v7 = vsub.f32 %v6832_v29, %v3143_v54 }
 0xffb   :  { %v3241_v60 = vmul.f32 1.442695, %v3215_v33 }
 0xffc   :  { %v3237_v61 = vmul.f32 1.442695, %v3213_v7  ;;  %v3146_v59 = vpop.xlane.xlu0 %3145 }
 0xffd   :  { %5646 = vpow2.f32 %v3241_v60  ;;  %v3214_v46 = vsub.f32 %v6838_v22, %v3146_v59  ;;  %v3207_v22 = vsel %vm1046_vm7, %v6914_v6, -inf }
 0xffe   :  { %5648 = vpow2.f32 %v3237_v61 }
 0xfff   :  { %v3239_v39 = vmul.f32 1.442695, %v3214_v46 }
0x1001   :  { %5650 = vpow2.f32 %v3239_v39 }
0x1007   :  { %v6923_v16 = vpop.eup %5646 }
0x1008   :  { %v3291_v19 = vsel %vm1053_vm6, %v6923_v16, 0.0  ;;  %v6927_v44 = vpop.eup %5648 }
0x1009   :  { %3292 = vadd.xlane.f32.xlu0 %v3291_v19  ;;  %v3285_v29 = vsel %vm1046_vm7, %v6927_v44, 0.0 }
0x100b   :  { %v6929_v18 = vpop.eup %5650 }
0x100c   :  { %v3288_v11 = vsel %vm1046_vm7, %v6929_v18, 0.0 }
0x100d   :  { %3286 = vadd.xlane.f32.xlu0 %v3285_v29  ;;  %3289 = vadd.xlane.f32.xlu1 %v3288_v11 }
0x1011   :  { %3208 = vmax.xlane.f32.xlu0 %v3207_v22  ;;  %3211 = vmax.xlane.f32.xlu1 %v3210_v14 }
0x1015   :  { %3205 = vmax.xlane.f32.xlu1 %v3204_v32 }
0x1026   :  { %3485 = vrot.lane.b32.xlu1 %v6717_v27, %s5795_s28 }
0x1027   :  { %3423 = vrot.lane.b32.xlu0 %v6711_v52, %s5795_s28 }
0x102a   :  { %3545 = vrot.lane.b32.xlu1 %v6723_v55, %s5795_s28 }
0x102e   :  { %3607 = vrot.lane.b32.xlu1 %v6721_v62, %s5795_s28 }
0x1032   :  { %3547 = vrot.lane.b32.xlu1 %v6731_v3, %s5795_s28 }
0x1036   :  { %3609 = vrot.lane.b32.xlu1 %v6727_v17, %s5795_s28 }
0x103a   :  { %3669 = vrot.lane.b32.xlu1 %v6702_v36, %s5795_s28 }
0x103e   :  { %3731 = vrot.lane.b32.xlu1 %v6737_v40, %s5795_s28 }
0x104c   :  { %v3158_v27 = vpop.xlane.xlu1 %3157 }
0x104d   :  { %v3218_v52 = vsub.f32 %v6842_v38, %v3158_v27 }
0x104f   :  { %v3247_v41 = vmul.f32 1.442695, %v3218_v52 }
0x1050   :  { %v3152_v55 = vpop.xlane.xlu1 %3151 }
0x1051   :  { %v3216_v25 = vsub.f32 %v6844_v45, %v3152_v55  ;;  %5652 = vpow2.f32 %v3247_v41 }
0x1053   :  { %v3243_v62 = vmul.f32 1.442695, %v3216_v25 }
0x1055   :  { %5654 = vpow2.f32 %v3243_v62 }
0x105a   :  { %v3167_v3 = vpop.xlane.xlu0 %3166 }
0x105b   :  { %v3221_v30 = vsub.f32 %v6852_v58, %v3167_v3  ;;  %v6960_v56 = vpop.eup %5652 }
0x105c   :  { %v3300_v45 = vsel %vm1053_vm6, %v6960_v56, 0.0 }
0x105d   :  { %v3253_v17 = vmul.f32 1.442695, %v3221_v30  ;;  %v3164_v4 = vpop.xlane.xlu1 %3163 }
0x105e   :  { %v3220_v36 = vsub.f32 %v6860_v26, %v3164_v4  ;;  %v3161_v40 = vpop.xlane.xlu0 %3160 }
0x105f   :  { %5656 = vpow2.f32 %v3253_v17  ;;  %v3219_v38 = vsub.f32 %v6854_v23, %v3161_v40  ;;  %v6966_v60 = vpop.eup %5654 }
0x1060   :  { %v3251_v33 = vmul.f32 1.442695, %v3220_v36  ;;  %v3294_v23 = vsel %vm1046_vm7, %v6966_v60, 0.0 }
0x1061   :  { %v3249_v54 = vmul.f32 1.442695, %v3219_v38  ;;  %v3176_v7 = vpop.xlane.xlu1 %3175 }
0x1062   :  { %5658 = vpow2.f32 %v3251_v33  ;;  %v3224_v58 = vsub.f32 %v6858_v8, %v3176_v7  ;;  %v3155_v61 = vpop.xlane.xlu0 %3154  ;;  %3301 = vadd.xlane.f32.xlu1 %v3300_v45 }
0x1063   :  { %5660 = vpow2.f32 %v3249_v54  ;;  %v3217_v26 = vsub.f32 %v6848_v47, %v3155_v61 }
0x1064   :  { %v3259_v59 = vmul.f32 1.442695, %v3224_v58 }
0x1065   :  { %v3245_v46 = vmul.f32 1.442695, %v3217_v26  ;;  %v3170_v39 = vpop.xlane.xlu1 %3169 }
0x1066   :  { %5662 = vpow2.f32 %v3259_v59  ;;  %v3222_v19 = vsub.f32 %v6862_v51, %v3170_v39  ;;  %3295 = vadd.xlane.f32.xlu1 %v3294_v23 }
0x1067   :  { %5664 = vpow2.f32 %v3245_v46 }
0x1068   :  { %v3255_v29 = vmul.f32 1.442695, %v3222_v19 }
0x1069   :  { %v6973_v11 = vpop.eup %5656 }
0x106a   :  { %5666 = vpow2.f32 %v3255_v29  ;;  %v3185_v8 = vpop.xlane.xlu0 %3184  ;;  %v3309_v22 = vsel %vm1053_vm6, %v6973_v11, 0.0 }
0x106b   :  { %v3227_v47 = vsub.f32 %v6876_v35, %v3185_v8  ;;  %3310 = vadd.xlane.f32.xlu0 %v3309_v22 }
0x106c   :  { %v6978_v14 = vpop.eup %5658 }
0x106d   :  { %v6980_v32 = vpop.eup %5660  ;;  %v3265_v27 = vmul.f32 1.442695, %v3227_v47  ;;  %v3182_v52 = vpop.xlane.xlu1 %3181  ;;  %v3306_v51 = vsel %vm1046_vm7, %v6978_v14, 0.0 }
0x106e   :  { %v3226_v41 = vsub.f32 %v6884_v43, %v3182_v52  ;;  %v3179_v55 = vpop.xlane.xlu0 %3178  ;;  %3307 = vadd.xlane.f32.xlu1 %v3306_v51  ;;  %v3303_v25 = vsel %vm1046_vm7, %v6980_v32, 0.0 }
0x106f   :  { %5668 = vpow2.f32 %v3265_v27  ;;  %v3225_v35 = vsub.f32 %v6878_v0, %v3179_v55  ;;  %3304 = vadd.xlane.f32.xlu0 %v3303_v25 }
0x1070   :  { %v6988_v62 = vpop.eup %5662  ;;  %v3263_v3 = vmul.f32 1.442695, %v3226_v41 }
0x1071   :  { %v6990_v30 = vpop.eup %5664  ;;  %v3261_v17 = vmul.f32 1.442695, %v3225_v35  ;;  %v3194_v4 = vpop.xlane.xlu1 %3193  ;;  %v3318_v36 = vsel %vm1053_vm6, %v6988_v62, 0.0 }
0x1072   :  { %5670 = vpow2.f32 %v3263_v3  ;;  %v3230_v43 = vsub.f32 %v6882_v57, %v3194_v4  ;;  %v3173_v40 = vpop.xlane.xlu0 %3172  ;;  %3319 = vadd.xlane.f32.xlu1 %v3318_v36  ;;  %v3297_v38 = vsel %vm1046_vm7, %v6990_v30, 0.0 }
0x1073   :  { %5672 = vpow2.f32 %v3261_v17  ;;  %v3223_v0 = vsub.f32 %v6866_v5, %v3173_v40  ;;  %3298 = vadd.xlane.f32.xlu0 %v3297_v38 }
0x1074   :  { %v6998_v33 = vpop.eup %5666  ;;  %v3271_v54 = vmul.f32 1.442695, %v3230_v43 }
0x1075   :  { %v3257_v7 = vmul.f32 1.442695, %v3223_v0  ;;  %v3312_v45 = vsel %vm1046_vm7, %v6998_v33, 0.0  ;;  %v3188_v58 = vpop.xlane.xlu1 %3187 }
0x1076   :  { %5674 = vpow2.f32 %v3271_v54  ;;  %3313 = vadd.xlane.f32.xlu1 %v3312_v45  ;;  %v3228_v61 = vsub.f32 %v6886_v42, %v3188_v58 }
0x1077   :  { %5676 = vpow2.f32 %v3257_v7 }
0x1078   :  { %v3267_v23 = vmul.f32 1.442695, %v3228_v61 }
0x1079   :  { %v7002_v57 = vpop.eup %5668 }
0x107a   :  { %v3203_v26 = vpop.xlane.xlu0 %3202  ;;  %v3327_v5 = vsel %vm1053_vm6, %v7002_v57, 0.0 }
0x107b   :  { %v3233_v59 = vsub.f32 %v6900_v13, %v3203_v26  ;;  %3328 = vadd.xlane.f32.xlu0 %v3327_v5 }
0x107c   :  { %v7008_v46 = vpop.eup %5670 }
0x107d   :  { %v7010_v39 = vpop.eup %5672  ;;  %v3277_v19 = vmul.f32 1.442695, %v3233_v59  ;;  %v3324_v29 = vsel %vm1046_vm7, %v7008_v46, 0.0  ;;  %v3200_v8 = vpop.xlane.xlu1 %3199 }
0x107e   :  { %v3197_v22 = vpop.xlane.xlu0 %3196  ;;  %3325 = vadd.xlane.f32.xlu1 %v3324_v29  ;;  %v3321_v42 = vsel %vm1046_vm7, %v7010_v39, 0.0  ;;  %v3232_v52 = vsub.f32 %v6908_v53, %v3200_v8 }
0x107f   :  { %5678 = vpow2.f32 %v3277_v19  ;;  %v3231_v47 = vsub.f32 %v6902_v2, %v3197_v22  ;;  %3322 = vadd.xlane.f32.xlu0 %v3321_v42 }
0x1080   :  { %v7017_v13 = vpop.eup %5674  ;;  %5680 = vpow2.f32 %v3267_v23  ;;  %v3275_v2 = vmul.f32 1.442695, %v3232_v52 }
0x1081   :  { %v7019_v27 = vpop.eup %5676  ;;  %v3273_v51 = vmul.f32 1.442695, %v3231_v47  ;;  %v3336_v41 = vsel %vm1053_vm6, %v7017_v13, 0.0 }
0x1082   :  { %v3191_v55 = vpop.xlane.xlu0 %3190  ;;  %3337 = vadd.xlane.f32.xlu1 %v3336_v41  ;;  %v3315_v25 = vsel %vm1046_vm7, %v7019_v27, 0.0 }
0x1083   :  { %v3229_v35 = vsub.f32 %v6890_v63, %v3191_v55  ;;  %3316 = vadd.xlane.f32.xlu0 %v3315_v25  ;;  %5682 = vpow2.f32 %v3273_v51 }
0x1085   :  { %v3269_v3 = vmul.f32 1.442695, %v3229_v35 }
0x1087   :  { %5684 = vpow2.f32 %v3269_v3 }
0x1088   :  { %5686 = vpow2.f32 %v3275_v2 }
0x1089   :  { %v7027_v17 = vpop.eup %5678 }
0x108a   :  { %v3345_v53 = vsel %vm1053_vm6, %v7027_v17, 0.0  ;;  %v7031_v4 = vpop.eup %5680 }
0x108b   :  { %3346 = vadd.xlane.f32.xlu1 %v3345_v53  ;;  %v3330_v36 = vsel %vm1046_vm7, %v7031_v4, 0.0 }
0x108d   :  { %v7035_v43 = vpop.eup %5682 }
0x108e   :  { %v3339_v38 = vsel %vm1046_vm7, %v7035_v43, 0.0 }
0x108f   :  { %3331 = vadd.xlane.f32.xlu1 %v3330_v36 }
0x1091   :  { %v7037_v63 = vpop.eup %5684 }
0x1092   :  { %v3333_v40 = vsel %vm1046_vm7, %v7037_v63, 0.0  ;;  %v7043_v0 = vpop.eup %5686 }
0x1093   :  { %3334 = vadd.xlane.f32.xlu0 %v3333_v40  ;;  %3340 = vadd.xlane.f32.xlu1 %v3339_v38  ;;  %v3342_v7 = vsel %vm1046_vm7, %v7043_v0, 0.0 }
0x1096   :  { %v3293_v54 = vpop.xlane.xlu0 %3292 }
0x1097   :  { %3343 = vadd.xlane.f32.xlu0 %v3342_v7  ;;  %5688 = vrcp.f32 %v3293_v54 }
0x109a   :  { %v3287_v45 = vpop.xlane.xlu0 %3286  ;;  %v3290_v58 = vpop.xlane.xlu1 %3289 }
0x109b   :  { %5690 = vrcp.f32 %v3287_v45 }
0x109c   :  { %5692 = vrcp.f32 %v3290_v58 }
0x109e   :  { %v3209_v61 = vpop.xlane.xlu0 %3208  ;;  %v3212_v26 = vpop.xlane.xlu1 %3211 }
0x109f   :  { %v3236_v5 = vsub.f32 %v6906_v48, %v3212_v26  ;;  %v3235_v53 = vsub.f32 %v6914_v6, %v3209_v61 }
0x10a1   :  { %v3283_v59 = vmul.f32 1.442695, %v3236_v5  ;;  %v5689_v29 = vpop.eup %5688  ;;  %v3281_v40 = vmul.f32 1.442695, %v3235_v53 }
0x10a2   :  { %v3424_v23 = vpop.permute.xlu0 %3423  ;;  %v3206_v19 = vpop.xlane.xlu1 %3205  ;;  %v3383_v47 = vmul.f32 %v5689_v29, %v6923_v16 }
0x10a3   :  { %v3433_v8 = vand.u32 %v3424_v23, %v6371_v24  ;;  %5694 = vpow2.f32 %v3283_v59  ;;  %v3234_v3 = vsub.f32 %v6910_v9, %v3206_v19 }
0x10a4   :  { %3733 = vrot.lane.b32.xlu1 %v6745_v31, %s5795_s28  ;;  %v3406_v25 = vpack.c.bf16 %v3383_v47, %v3383_v47 }
0x10a5   :  { %v5691_v22 = vpop.eup %5690  ;;  %5182 = vmatprep.subr.bf16.mxu1 %v3433_v8  ;;  %v3279_v36 = vmul.f32 1.442695, %v3234_v3 }
0x10a6   :  { %v5693_v42 = vpop.eup %5692  ;;  %5183 = vmatpush3.bf16.msra.mxu1 %v3433_v8  ;;  %v3486_v52 = vpop.permute.xlu1 %3485  ;;  %v3381_v51 = vmul.f32 %v5691_v22, %v6927_v44 }
0x10a7   :  { %v3495_v48 = vand.u32 %v3486_v52, %v6371_v24  ;;  %v3382_v41 = vmul.f32 %v5693_v42, %v6929_v18  ;;  %5696 = vpow2.f32 %v3279_v36 }
0x10a8   :  { %3793 = vrot.lane.b32.xlu1 %v6751_v15, %s5795_s28  ;;  %5698 = vpow2.f32 %v3281_v40 }
0x10a9   :  { %5190 = vmatprep.subr.bf16.mxu0 %v3495_v48  ;;  %v3405_v55 = vpack.c.bf16 %v3382_v41, %v3381_v51 }
0x10aa   :  { %5191 = vmatpush3.bf16.msra.mxu0 %v3495_v48  ;;  %v3546_v31 = vpop.permute.xlu1 %3545 }
0x10ab   :  { %5184 = vmatprep.mubr.msk.bf16.mxu1 %vm1046_vm7, %v3405_v55  ;;  %5196 = vmatprep.subr.bf16.mxu1 %v3546_v31 }
0x10ac   :  { %5185 = vmatmul.mubr.msk.bf16.vlgmr.msra.gmra.mrb[88].mxu1 %vm1046_vm7, %v3406_v25  ;;  %3855 = vrot.lane.b32.xlu1 %v6753_v49, %s5795_s28 }
0x10ad   :  { %5197 = vmatpush3.bf16.msra.mxu1 %v3546_v31  ;;  %v7061_v16 = vpop.eup %5694 }
0x10ae   :  { %v7063_v44 = vpop.permute.xlu1 %3607  ;;  %v3354_v15 = vsel %vm1053_vm6, %v7061_v16, 0.0 }
0x10af   :  { %5204 = vmatprep.subr.bf16.mxu0 %v7063_v44  ;;  %3355 = vadd.xlane.f32.xlu0 %v3354_v15 }
0x10b0   :  { %3795 = vrot.lane.b32.xlu1 %v6761_v21, %s5795_s28 }
0x10b1   :  { %v7075_v21 = vpop.eup %5696 }
0x10b2   :  { %v3548_v18 = vpop.permute.xlu1 %3547  ;;  %v3348_v38 = vsel %vm1046_vm7, %v7075_v21, 0.0  ;;  %v7079_v54 = vpop.eup %5698 }
0x10b3   :  { %v3557_v35 = vand.u32 %v3548_v18, %v6371_v24  ;;  %v3351_v9 = vsel %vm1046_vm7, %v7079_v54, 0.0 }
0x10b5   :  { %5198 = vmatprep.subr.bf16.mxu1 %v3557_v35 }
0x10b6   :  { %5199 = vmatpush3.bf16.msra.mxu1 %v3557_v35  ;;  %v3610_v49 = vpop.permute.xlu1 %3609 }
0x10ba   :  { %v3670_v2 = vpop.permute.xlu1 %3669 }
0x10bb   :  { %5212 = vmatprep.subr.bf16.mxu1 %v3670_v2 }
0x10be   :  { %v7085_v6 = vpop.permute.xlu1 %3731 }
0x10c5   :  { %3671 = vrot.lane.b32.xlu0 %v6743_v12, %s5795_s28 }
0x10d4   :  { %3349 = vadd.xlane.f32.xlu1 %v3348_v38 }
0x10d8   :  { %3352 = vadd.xlane.f32.xlu1 %v3351_v9 }
0x10e9   :  { %3857 = vrot.lane.b32.xlu1 %v6763_v50, %s5795_s28 }
0x10ef   :  { %v3302_v7 = vpop.xlane.xlu1 %3301 }
0x10f3   :  { %v3296_v12 = vpop.xlane.xlu1 %3295 }
0x10f8   :  { %v3311_v45 = vpop.xlane.xlu0 %3310 }
0x10f9   :  { %5700 = vrcp.f32 %v3311_v45 }
0x10fb   :  { %v3308_v58 = vpop.xlane.xlu1 %3307 }
0x10fc   :  { %5702 = vrcp.f32 %v3308_v58  ;;  %v3305_v61 = vpop.xlane.xlu0 %3304 }
0x10fd   :  { %5704 = vrcp.f32 %v3305_v61 }
0x10fe   :  { %5706 = vrcp.f32 %v3302_v7 }
0x10ff   :  { %5708 = vrcp.f32 %v3296_v12  ;;  %v3320_v5 = vpop.xlane.xlu1 %3319 }
0x1100   :  { %v3299_v26 = vpop.xlane.xlu0 %3298 }
0x1101   :  { %5710 = vrcp.f32 %v3299_v26 }
0x1103   :  { %v5701_v59 = vpop.eup %5700  ;;  %v3314_v29 = vpop.xlane.xlu1 %3313 }
0x1104   :  { %v3389_v50 = vmul.f32 %v5701_v59, %v6973_v11 }
0x1106   :  { %v5703_v23 = vpop.eup %5702  ;;  %v3410_v31 = vpack.c.bf16 %v3389_v50, %v3389_v50 }
0x1107   :  { %v5705_v19 = vpop.eup %5704  ;;  %v3388_v8 = vmul.f32 %v5703_v23, %v6978_v14 }
0x1108   :  { %v5707_v22 = vpop.eup %5706  ;;  %v7089_v42 = vpop.xlane.xlu0 %3328  ;;  %v3387_v47 = vmul.f32 %v5705_v19, %v6980_v32 }
0x1109   :  { %v5709_v52 = vpop.eup %5708  ;;  %v3386_v41 = vmul.f32 %v5707_v22, %v6960_v56  ;;  %v3619_v56 = vand.u32 %v3610_v49, %v6371_v24 }
0x110a   :  { %v3409_v51 = vpack.c.bf16 %v3388_v8, %v3387_v47  ;;  %v3384_v11 = vmul.f32 %v5709_v52, %v6966_v60 }
0x110b   :  { %v5711_v48 = vpop.eup %5710  ;;  %v3326_v55 = vpop.xlane.xlu1 %3325  ;;  %v3408_v15 = vpack.c.bf16 %v3386_v41, %v3386_v41 }
0x110c   :  { %5712 = vrcp.f32 %v3326_v55  ;;  %v3323_v25 = vpop.xlane.xlu0 %3322  ;;  %5200 = vmatprep.mubr.msk.bf16.mxu1 %vm1046_vm7, %v3409_v51  ;;  %v3385_v14 = vmul.f32 %v5711_v48, %v6990_v30 }
0x110d   :  { %5714 = vrcp.f32 %v3323_v25  ;;  %5201 = vmatmul.mubr.msk.bf16.vlgmr.msra.gmra.mrb[92].mxu1 %vm1046_vm7, %v3410_v31 }
0x110e   :  { %5716 = vrcp.f32 %v3320_v5  ;;  %5213 = vmatpush3.bf16.msra.mxu1 %v3670_v2  ;;  %v3407_v32 = vpack.c.bf16 %v3385_v14, %v3384_v11 }
0x110f   :  { %5718 = vrcp.f32 %v3314_v29  ;;  %v3338_v60 = vpop.xlane.xlu1 %3337 }
0x1110   :  { %v3317_v18 = vpop.xlane.xlu0 %3316  ;;  %5192 = vmatprep.mubr.msk.bf16.mxu0 %vm1046_vm7, %v3407_v32 }
0x1111   :  { %5720 = vrcp.f32 %v3317_v18  ;;  %5193 = vmatmul.mubr.msk.bf16.vlgmr.msra.gmra.mrb[80].mxu0 %vm1046_vm7, %v3408_v15 }
0x1112   :  { %5205 = vmatpush3.bf16.msra.mxu0 %v7063_v44  ;;  %5722 = vrcp.f32 %v3338_v60 }
0x1113   :  { %5206 = vmatprep.subr.bf16.mxu0 %v3619_v56 }
0x1116   :  { %v5713_v30 = vpop.eup %5712  ;;  %5207 = vmatpush3.bf16.msra.mxu0 %v3619_v56 }
0x1117   :  { %v5715_v35 = vpop.eup %5714  ;;  %5220 = vmatprep.subr.bf16.mxu0 %v7085_v6  ;;  %v3394_v2 = vmul.f32 %v5713_v30, %v7008_v46 }
0x1118   :  { %v5717_v3 = vpop.eup %5716  ;;  %v3347_v53 = vpop.xlane.xlu1 %3346  ;;  %v3393_v36 = vmul.f32 %v5715_v35, %v7010_v39 }
0x1119   :  { %v5719_v40 = vpop.eup %5718  ;;  %v3392_v9 = vmul.f32 %v5717_v3, %v6988_v62 }
0x111a   :  { %v3413_v49 = vpack.c.bf16 %v3394_v2, %v3393_v36  ;;  %v3390_v7 = vmul.f32 %v5719_v40, %v6998_v33 }
0x111b   :  { %v5721_v38 = vpop.eup %5720  ;;  %v3412_v46 = vpack.c.bf16 %v3392_v9, %v3392_v9 }
0x111c   :  { %5216 = vmatprep.mubr.msk.bf16.mxu1 %vm1046_vm7, %v3413_v49  ;;  %v3332_v44 = vpop.xlane.xlu1 %3331  ;;  %v3391_v12 = vmul.f32 %v5721_v38, %v7019_v27  ;;  %v5723_v33 = vpop.eup %5722 }
0x111d   :  { %5724 = vrcp.f32 %v3332_v44  ;;  %v3398_v59 = vmul.f32 %v5723_v33, %v7017_v13 }
0x111e   :  { %v3411_v45 = vpack.c.bf16 %v3391_v12, %v3390_v7 }
0x111f   :  { %v3416_v8 = vpack.c.bf16 %v3398_v59, %v3398_v59 }
0x1120   :  { %v3335_v58 = vpop.xlane.xlu0 %3334  ;;  %5208 = vmatprep.mubr.msk.bf16.mxu0 %vm1046_vm7, %v3411_v45  ;;  %v3341_v39 = vpop.xlane.xlu1 %3340 }
0x1121   :  { %5726 = vrcp.f32 %v3335_v58  ;;  %5209 = vmatmul.mubr.msk.bf16.vlgmr.msra.gmra.mrb[84].mxu0 %vm1046_vm7, %v3412_v46  ;;  %v5501_v58 = vld [vmem:[%s7353_s6 + $0x18] sm:$0xff]  }
0x1122   :  { %5221 = vmatpush3.bf16.msra.mxu0 %v7085_v6  ;;  %5728 = vrcp.f32 %v7089_v42 }
0x1124   :  { %v3734_v62 = vpop.permute.xlu1 %3733  ;;  %v3344_v6 = vpop.xlane.xlu0 %3343 }
0x1125   :  { %v3743_v61 = vand.u32 %v3734_v62, %v6371_v24  ;;  %5730 = vrcp.f32 %v3344_v6 }
0x1126   :  { %5732 = vrcp.f32 %v3341_v39 }
0x1127   :  { %5222 = vmatprep.subr.bf16.mxu0 %v3743_v61  ;;  %v5725_v26 = vpop.eup %5724  ;;  %5734 = vrcp.f32 %v3347_v53 }
0x1128   :  { %5223 = vmatpush3.bf16.msra.mxu0 %v3743_v61  ;;  %v3794_v27 = vpop.permute.xlu1 %3793  ;;  %v3396_v19 = vmul.f32 %v5725_v26, %v7031_v4 }
0x112b   :  { %v5727_v5 = vpop.eup %5726 }
0x112c   :  { %v3856_v23 = vpop.permute.xlu1 %3855  ;;  %v3397_v50 = vmul.f32 %v5727_v5, %v7037_v63  ;;  %v5729_v22 = vpop.eup %5728 }
0x112d   :  { %5236 = vmatprep.subr.bf16.mxu0 %v3856_v23  ;;  %v3395_v63 = vmul.f32 %v5729_v22, %v7002_v57 }
0x112e   :  { %v3415_v29 = vpack.c.bf16 %v3397_v50, %v3396_v19 }
0x112f   :  { %v5731_v47 = vpop.eup %5730  ;;  %v3414_v42 = vpack.c.bf16 %v3395_v63, %v3395_v63 }
0x1130   :  { %5224 = vmatprep.mubr.msk.bf16.mxu0 %vm1046_vm7, %v3415_v29  ;;  %v5733_v52 = vpop.eup %5732  ;;  %v3400_v48 = vmul.f32 %v5731_v47, %v7043_v0  ;;  %v3796_v41 = vpop.permute.xlu1 %3795 }
0x1131   :  { %5225 = vmatmul.mubr.msk.bf16.vlgmr.msra.gmra.mrb[88].mxu0 %vm1046_vm7, %v3416_v8  ;;  %v3399_v55 = vmul.f32 %v5733_v52, %v7035_v43  ;;  %v5735_v31 = vpop.eup %5734  ;;  %v3805_v11 = vand.u32 %v3796_v41, %v6371_v24 }
0x1132   :  { %5237 = vmatpush3.bf16.msra.mxu0 %v3856_v23  ;;  %v3401_v57 = vmul.f32 %v5735_v31, %v7027_v17 }
0x1133   :  { %v3417_v25 = vpack.c.bf16 %v3400_v48, %v3399_v55 }
0x1134   :  { %v3418_v0 = vpack.c.bf16 %v3401_v57, %v3401_v57 }
0x113c   :  { %v3356_v13 = vpop.xlane.xlu0 %3355 }
0x113d   :  { %5736 = vrcp.f32 %v3356_v13 }
0x1140   :  { %v3672_v4 = vpop.permute.xlu0 %3671 }
0x1141   :  { %v3681_v51 = vand.u32 %v3672_v4, %v6371_v24 }
0x1143   :  { %5214 = vmatprep.subr.bf16.mxu1 %v3681_v51 }
0x1144   :  { %5215 = vmatpush3.bf16.msra.mxu1 %v3681_v51 }
0x1145   :  { %5228 = vmatprep.subr.bf16.mxu1 %v3794_v27 }
0x1147   :  { %5217 = vmatmul.mubr.msk.bf16.vlgmr.msra.gmra.mrb[96].mxu1 %vm1046_vm7, %v3414_v42  ;;  %v5737_v17 = vpop.eup %5736 }
0x1148   :  { %5229 = vmatpush3.bf16.msra.mxu1 %v3794_v27  ;;  %5232 = vmatprep.mubr.msk.bf16.mxu1 %vm1046_vm7, %v3417_v25  ;;  %v3404_v60 = vmul.f32 %v5737_v17, %v7061_v16  ;;  %v5500_v16 = vld [vmem:[%s7353_s6 + $0x10] sm:$0xff]  }
0x1149   :  { %5230 = vmatprep.subr.bf16.mxu1 %v3805_v11 }
0x114a   :  { %v3420_v3 = vpack.c.bf16 %v3404_v60, %v3404_v60 }
0x114c   :  { %5231 = vmatpush3.bf16.msra.mxu1 %v3805_v11 }
0x114d   :  { %5244 = vmatprep.subr.bf16.mxu1 %v5789_v10 }
0x114f   :  { %5233 = vmatmul.mubr.msk.bf16.vlgmr.msra.gmra.mrb[100].mxu1 %vm1046_vm7, %v3418_v0 }
0x1150   :  { %5248 = vmatprep.mubr.msk.bf16.mxu1 %vm5790_vm3, %v5789_v10  ;;  %5245 = vmatpush3.bf16.msra.mxu1 %v5500_v16 }
0x1151   :  { %5246 = vmatprep.subr.bf16.mxu1 %v5789_v10 }
0x1154   :  { %5247 = vmatpush3.bf16.msra.mxu1 %v5501_v58 }
0x1155   :  { %5276 = vmatprep.subr.bf16.mxu1 %v5789_v10 }
0x1161   :  { %v3350_v43 = vpop.xlane.xlu1 %3349 }
0x1162   :  { %5738 = vrcp.f32 %v3350_v43 }
0x1165   :  { %v3353_v14 = vpop.xlane.xlu1 %3352 }
0x1166   :  { %5740 = vrcp.f32 %v3353_v14 }
0x1169   :  { %v3858_v32 = vpop.permute.xlu1 %3857 }
0x116a   :  { %v3867_v15 = vand.u32 %v3858_v32, %v6371_v24 }
0x116c   :  { %5238 = vmatprep.subr.bf16.mxu0 %v3867_v15  ;;  %v5739_v18 = vpop.eup %5738 }
0x116d   :  { %5239 = vmatpush3.bf16.msra.mxu0 %v3867_v15  ;;  %v3402_v30 = vmul.f32 %v5739_v18, %v7075_v21 }
0x116e   :  { %5260 = vmatprep.subr.bf16.mxu0 %v5789_v10 }
0x1170   :  { %v5741_v56 = vpop.eup %5740 }
0x1171   :  { %v3403_v35 = vmul.f32 %v5741_v56, %v7079_v54 }
0x1173   :  { %v3419_v2 = vpack.c.bf16 %v3403_v35, %v3402_v30 }
0x1175   :  { %5240 = vmatprep.mubr.msk.bf16.mxu0 %vm1046_vm7, %v3419_v2 }
0x1176   :  { %5241 = vmatmul.mubr.msk.bf16.vlgmr.msra.gmra.mrb[92].mxu0 %vm1046_vm7, %v3420_v3 }
0x1177   :  { %5264 = vmatprep.mubr.msk.bf16.mxu0 %vm5790_vm3, %v5789_v10 }
0x117f   :  { %v5186_v24 = vpop.f32.mrb[88].mxu1 }
0x1180   :  { %v3469_v53 = vpop.f32.mrb[89].mxu1 }
0x1181   :  { %v5187_v36 = vpop.f32.mrb[90].mxu1 }
0x1182   :  { %v3472_v40 = vpop.f32.mrb[91].mxu1 }
0x11e0   :  { %v5202_v21 = vpop.f32.mrb[92].mxu1 }
0x11e1   :  { %v3593_v49 = vpop.f32.mrb[93].mxu1 }
0x11e2   :  { %v5203_v54 = vpop.f32.mrb[94].mxu1 }
0x11e3   :  { %v3596_v38 = vpop.f32.mrb[95].mxu1 }
0x11e4   :  { %v5443_v9 = vpack.i.bf16 %v3596_v38, %v3593_v49  ;;  %v5194_v44 = vpop.f32.mrb[80].mxu0 }
0x11e5   :  { %3924 = vrot.lane.b32.xlu1 %v5194_v44, %s5796_s30  ;;  %v3531_v7 = vpop.f32.mrb[81].mxu0 }
0x11e6   :  { %v5195_v12 = vpop.f32.mrb[82].mxu0 }
0x11e7   :  { %v3534_v45 = vpop.f32.mrb[83].mxu0 }
0x11e8   :  { %v5438_v46 = vpack.i.bf16 %v3534_v45, %v3531_v7 }
0x11e9   :  { %5444 = vrot.lane.b32.xlu1 %v5443_v9, %s5798_s21 }
0x11ea   :  { %5439 = vrot.lane.b32.xlu0 %v5438_v46, %s5796_s30 }
0x11f4   :  { %v5210_v39 = vpop.f32.mrb[84].mxu0 }
0x11f5   :  { %v3655_v62 = vpop.f32.mrb[85].mxu0 }
0x11f6   :  { %v5211_v61 = vpop.f32.mrb[86].mxu0 }
0x11f7   :  { %v3658_v33 = vpop.f32.mrb[87].mxu0 }
0x11f8   :  { %v5448_v27 = vpack.i.bf16 %v3658_v33, %v3655_v62 }
0x11fa   :  { %5449 = vrot.lane.b32.xlu0 %v5448_v27, %s7377_s26 }
0x1204   :  { %v7151_v26 = vpop.f32.mrb[88].mxu0 }
0x1205   :  { %v3779_v5 = vpop.f32.mrb[89].mxu0 }
0x1206   :  { %v5227_v59 = vpop.f32.mrb[90].mxu0 }
0x1207   :  { %v3782_v23 = vpop.f32.mrb[91].mxu0 }
0x1208   :  { %v5453_v19 = vpack.i.bf16 %v3782_v23, %v3779_v5 }
0x120a   :  { %5454 = vrot.lane.b32.xlu1 %v5453_v19, %s5796_s30 }
0x120e   :  { %3936 = vrot.lane.b32.xlu1 %v5202_v21, %s5798_s21 }
0x121a   :  { %v7155_v50 = vpop.f32.mrb[96].mxu1 }
0x121b   :  { %v3717_v29 = vpop.f32.mrb[97].mxu1 }
0x121c   :  { %v5219_v8 = vpop.f32.mrb[98].mxu1 }
0x121d   :  { %v3720_v6 = vpop.f32.mrb[99].mxu1 }
0x1222   :  { %v7157_v13 = vpop.f32.mrb[100].mxu1 }
0x1223   :  { %v3841_v22 = vpop.f32.mrb[101].mxu1 }
0x1224   :  { %v5235_v47 = vpop.f32.mrb[102].mxu1 }
0x1225   :  { %v3844_v4 = vpop.f32.mrb[103].mxu1 }
0x1226   :  { %v5458_v52 = vpack.i.bf16 %v3844_v4, %v3841_v22 }
0x1228   :  { %5459 = vrot.lane.b32.xlu0 %v5458_v52, %s5798_s21 }
0x1249   :  { %v7160_v63 = vpop.f32.mrb[92].mxu0 }
0x124a   :  { %v3903_v51 = vpop.f32.mrb[93].mxu0 }
0x124b   :  { %v5243_v48 = vpop.f32.mrb[94].mxu0 }
0x124c   :  { %v3906_v41 = vpop.f32.mrb[95].mxu0 }
0x124d   :  { %v5463_v55 = vpack.i.bf16 %v3906_v41, %v3903_v51 }
0x124f   :  { %5464 = vrot.lane.b32.xlu0 %v5463_v55, %s7377_s26 }
0x1253   :  { %3948 = vrot.lane.b32.xlu0 %v5210_v39, %s7377_s26 }
0x1257   :  { %v3925_v42 = vpop.permute.xlu1 %3924 }
0x1258   :  { %v3955_v31 = vsel %vm523_vm4, %v5186_v24, %v3925_v42 }
0x125b   :  { %v5445_v0 = vpop.permute.xlu1 %5444 }
0x125c   :  { %v5440_v25 = vpop.permute.xlu0 %5439  ;;  %v5447_v32 = vunpack.i.h.bf16 %v5445_v0  ;;  %v5446_v15 = vunpack.i.l.bf16 %v5445_v0 }
0x125d   :  { %v5442_v11 = vunpack.i.h.bf16 %v5440_v25  ;;  %v5441_v57 = vunpack.i.l.bf16 %v5440_v25 }
0x125f   :  { %v3954_v43 = vsel %vm523_vm4, %v3472_v40, %v5442_v11  ;;  %v3953_v14 = vsel %vm523_vm4, %v3469_v53, %v5441_v57 }
0x1260   :  { %v3956_v60 = vsel %vm1866_vm9, %v3953_v14, %v5446_v15  ;;  %v3957_v30 = vsel %vm1866_vm9, %v3954_v43, %v5447_v32 }
0x126c   :  { %v5450_v17 = vpop.permute.xlu0 %5449 }
0x126d   :  { %v5452_v18 = vunpack.i.h.bf16 %v5450_v17  ;;  %v5451_v56 = vunpack.i.l.bf16 %v5450_v17 }
0x126f   :  { %v3959_v35 = vsel %vm1870_vm10, %v3956_v60, %v5451_v56  ;;  %v3960_v2 = vsel %vm1870_vm10, %v3957_v30, %v5452_v18 }
0x1270   :  { %v4019_v3 = vpack.c.bf16 %v3960_v2, %v3959_v35  ;;  %v5502_v35 = vld [vmem:[%s7357_s10 + $0x10] sm:$0xff]   ;;  %v5503_v2 = vld [vmem:[%s7357_s10 + $0x18] sm:$0xff]  }
0x1271   :  { %5261 = vmatpush3.bf16.msra.mxu0 %v5502_v35 }
0x1272   :  { %5249 = vmatmul.mubr.msk.bf16.vlgmr.msra.gmra.mrb[104].mxu1 %vm259_vm1, %v4019_v3  ;;  %5262 = vmatprep.subr.bf16.mxu0 %v5789_v10 }
0x1273   :  { %5252 = vmatprep.mubr.msk.bf16.mxu1 %vm5790_vm3, %v5789_v10 }
0x1275   :  { %5263 = vmatpush3.bf16.msra.mxu0 %v5503_v2 }
0x1276   :  { %5296 = vmatprep.subr.bf16.mxu0 %v5789_v10 }
0x127c   :  { %v5455_v24 = vpop.permute.xlu1 %5454 }
0x127d   :  { %v5457_v36 = vunpack.i.h.bf16 %v5455_v24  ;;  %v5456_v40 = vunpack.i.l.bf16 %v5455_v24 }
0x127f   :  { %v3999_v54 = vsel %vm523_vm4, %v3720_v6, %v5457_v36  ;;  %v3998_v38 = vsel %vm523_vm4, %v3717_v29, %v5456_v40  ;;  %v7195_v29 = vld [vmem:[%s7354_s7 + $0x1] ss:$0 sm:$0xff] }
0x1280   :  { %v3937_v9 = vpop.permute.xlu1 %3936 }
0x1281   :  { %v3958_v39 = vsel %vm1866_vm9, %v3955_v31, %v3937_v9 }
0x129a   :  { %v5460_v53 = vpop.permute.xlu0 %5459 }
0x129b   :  { %v5462_v16 = vunpack.i.h.bf16 %v5460_v53  ;;  %v5461_v21 = vunpack.i.l.bf16 %v5460_v53 }
0x129d   :  { %v4001_v12 = vsel %vm1866_vm9, %v3998_v38, %v5461_v21  ;;  %v4002_v45 = vsel %vm1866_vm9, %v3999_v54, %v5462_v16 }
0x12c1   :  { %v5465_v49 = vpop.permute.xlu0 %5464 }
0x12c2   :  { %v5467_v44 = vunpack.i.h.bf16 %v5465_v49  ;;  %v5466_v7 = vunpack.i.l.bf16 %v5465_v49 }
0x12c4   :  { %v4004_v46 = vsel %vm1870_vm10, %v4001_v12, %v5466_v7  ;;  %v7180_v58 = vsel %vm1870_vm10, %v4002_v45, %v5467_v44 }
0x12c5   :  { %v4010_v62 = vrot.slane %v4004_v46, 7  ;;  %v4011_v61 = vrot.slane %v7180_v58, 7  ;;  %v3949_v33 = vpop.permute.xlu0 %3948 }
0x12c6   :  { %v3961_v27 = vsel %vm1870_vm10, %v3958_v39, %v3949_v33  ;;  %v7238_v39 = vld [vmem:[%s7355_s8 + $0x1] ss:$0 sm:$0xff] }
0x12c7   :  { %v4012_v5 = vsel %vm1339_vm8, %v4010_v62, %v4011_v61  ;;  %v4018_v59 = vsel %vm1339_vm8, %v3961_v27, %v4010_v62 }
0x12c8   :  { %v4020_v23 = vpack.c.bf16 %v4012_v5, %v4018_v59 }
0x12ca   :  { %5253 = vmatmul.mubr.msk.bf16.gmra.mrb[108].mxu1 %vm259_vm1, %v4020_v23 }
0x12cb   :  { %5256 = vmatprep.mubr.msk.bf16.mxu1 %vm5790_vm3, %v5789_v10 }
0x1345   :  { %v4082_v19 = vpop.f32.mrb[104].mxu1 }
0x1346   :  { %v4104_v8 = vadd.f32 %v4082_v19, %v6635_v28  ;;  %v5250_v6 = vpop.f32.mrb[105].mxu1 }
0x1347   :  { %v4085_v22 = vpop.f32.mrb[106].mxu1 }
0x1348   :  { %v7199_v47 = vadd.f32 %v7195_v29, %v4104_v8  ;;  %v4105_v4 = vadd.f32 %v4085_v22, %v6638_v1  ;;  %v5251_v52 = vpop.f32.mrb[107].mxu1 }
0x134a   :  { %v4118_v51 = vadd.f32 %v7195_v29, %v4105_v4  ;;  %v4126_v48 = vsel %vm259_vm1, %v7199_v47, 0.0 }
0x134b   :  { %4127 = vadd.xlane.f32.xlu1 %v4126_v48 }
0x134c   :  { %v4129_v41 = vsel %vm259_vm1, %v4118_v51, 0.0 }
0x134d   :  { %4130 = vadd.xlane.f32.xlu0 %v4129_v41 }
0x139d   :  { %v4090_v55 = vpop.f32.mrb[108].mxu1 }
0x139e   :  { %v4106_v28 = vadd.f32 %v4090_v55, %v6645_v37  ;;  %v5254_v42 = vpop.f32.mrb[109].mxu1 }
0x139f   :  { %v4093_v31 = vpop.f32.mrb[110].mxu1 }
0x13a0   :  { %v7208_v25 = vadd.f32 %v7195_v29, %v4106_v28  ;;  %v4107_v1 = vadd.f32 %v4093_v31, %v6648_v34  ;;  %v5255_v11 = vpop.f32.mrb[111].mxu1 }
0x13a2   :  { %v4120_v57 = vadd.f32 %v7195_v29, %v4107_v1  ;;  %v4132_v0 = vsel %vm259_vm1, %v7208_v25, 0.0 }
0x13a3   :  { %4133 = vadd.xlane.f32.xlu0 %v4132_v0 }
0x13a4   :  { %v4135_v43 = vsel %vm259_vm1, %v4120_v57, 0.0 }
0x13a5   :  { %4136 = vadd.xlane.f32.xlu1 %v4135_v43 }
0x13d8   :  { %v4128_v14 = vpop.xlane.xlu1 %4127 }
0x13d9   :  { %v4141_v32 = vmul.f32 0.03125, %v4128_v14 }
0x13da   :  { %v4131_v37 = vpop.xlane.xlu0 %4130 }
0x13db   :  { %v4146_v15 = vsub.f32 %v7199_v47, %v4141_v32  ;;  %v4142_v17 = vmul.f32 0.03125, %v4131_v37 }
0x13dd   :  { %v4147_v18 = vsub.f32 %v4118_v51, %v4142_v17  ;;  %v4151_v56 = vmul.f32 %v4146_v15, %v4146_v15 }
0x13df   :  { %v4156_v34 = vsel %vm259_vm1, %v4151_v56, 0.0  ;;  %v4152_v60 = vmul.f32 %v4147_v18, %v4147_v18  ;;  %v5506_v56 = vld [vmem:[%s7359_s12 + $0x30] sm:$0xff]  }
0x13e0   :  { %4157 = vadd.xlane.f32.xlu0 %v4156_v34  ;;  %v5507_v34 = vld [vmem:[%s7359_s12 + $0x38] sm:$0xff]  }
0x13e1   :  { %v4159_v30 = vsel %vm259_vm1, %v4152_v60, 0.0  ;;  %v7287_v60 = vld [vmem:[%s7358_s11 + $0x1] ss:$0 sm:$0xff] }
0x13e2   :  { %4160 = vadd.xlane.f32.xlu1 %v4159_v30 }
0x13f3   :  { %3981 = vrot.lane.b32.xlu1 %v7157_v13, %s5798_s21 }
0x1430   :  { %v4134_v3 = vpop.xlane.xlu0 %4133 }
0x1431   :  { %v4143_v24 = vmul.f32 0.03125, %v4134_v3 }
0x1432   :  { %v4137_v53 = vpop.xlane.xlu1 %4136 }
0x1433   :  { %v4148_v36 = vsub.f32 %v7208_v25, %v4143_v24  ;;  %v4144_v13 = vmul.f32 0.03125, %v4137_v53 }
0x1435   :  { %v4149_v40 = vsub.f32 %v4120_v57, %v4144_v13  ;;  %v4153_v16 = vmul.f32 %v4148_v36, %v4148_v36 }
0x1437   :  { %v4162_v21 = vsel %vm259_vm1, %v4153_v16, 0.0  ;;  %v4154_v49 = vmul.f32 %v4149_v40, %v4149_v40 }
0x1438   :  { %4163 = vadd.xlane.f32.xlu0 %v4162_v21 }
0x1439   :  { %v4165_v54 = vsel %vm259_vm1, %v4154_v49, 0.0 }
0x143a   :  { %4166 = vadd.xlane.f32.xlu1 %v4165_v54 }
0x144b   :  { %3993 = vrot.lane.b32.xlu1 %v7160_v63, %s7377_s26 }
0x144e   :  { %3969 = vrot.lane.b32.xlu0 %v7151_v26, %s5796_s30  ;;  %v7244_v26 = vld [vmem:[%s7356_s9 + $0x1] ss:$0 sm:$0xff] }
0x146d   :  { %v4158_v38 = vpop.xlane.xlu0 %4157 }
0x146e   :  { %v4171_v9 = vmul.f32 0.03125, %v4158_v38 }
0x146f   :  { %v4161_v44 = vpop.xlane.xlu1 %4160 }
0x1470   :  { %v4176_v7 = vadd.f32 1e-05, %v4171_v9  ;;  %v4172_v12 = vmul.f32 0.03125, %v4161_v44 }
0x1472   :  { %5742 = vrsqrt.f32 %v4176_v7  ;;  %v4177_v45 = vadd.f32 1e-05, %v4172_v12 }
0x1473   :  { %v3982_v8 = vpop.permute.xlu1 %3981 }
0x1474   :  { %5744 = vrsqrt.f32 %v4177_v45 }
0x147c   :  { %v5743_v46 = vpop.eup %5742 }
0x147d   :  { %v4186_v62 = vmul.f32 %v5743_v46, %v4146_v15 }
0x147e   :  { %v5745_v33 = vpop.eup %5744 }
0x147f   :  { %v4197_v63 = vmul.f32 %v7238_v39, %v4186_v62  ;;  %v4187_v27 = vmul.f32 %v5745_v33, %v4147_v18  ;;  %v5505_v18 = vld [vmem:[%s7359_s12 + $0x28] sm:$0xff]  }
0x1481   :  { %v4198_v5 = vmul.f32 %v7238_v39, %v4187_v27  ;;  %v4208_v59 = vadd.f32 %v7244_v26, %v4197_v63 }
0x1483   :  { %v4209_v23 = vadd.f32 %v7244_v26, %v4198_v5 }
0x1485   :  { %v4213_v19 = vpack.c.bf16 %v4209_v23, %v4208_v59 }
0x1487   :  { %5265 = vmatmul.mubr.msk.bf16.vlgmr.msra.gmra.mrb[96].mxu0 %vm259_vm1, %v4213_v19 }
0x1488   :  { %5268 = vmatprep.mubr.msk.bf16.mxu0 %vm5790_vm3, %v5789_v10 }
0x14c5   :  { %v4164_v6 = vpop.xlane.xlu0 %4163 }
0x14c6   :  { %v4173_v22 = vmul.f32 0.03125, %v4164_v6 }
0x14c7   :  { %v4167_v4 = vpop.xlane.xlu1 %4166 }
0x14c8   :  { %v4178_v52 = vadd.f32 1e-05, %v4173_v22  ;;  %v4174_v51 = vmul.f32 0.03125, %v4167_v4 }
0x14c9   :  { %v3970_v48 = vpop.permute.xlu0 %3969 }
0x14ca   :  { %5746 = vrsqrt.f32 %v4178_v52  ;;  %v4179_v41 = vadd.f32 1e-05, %v4174_v51  ;;  %v4000_v55 = vsel %vm523_vm4, %v7155_v50, %v3970_v48 }
0x14cb   :  { %v4003_v28 = vsel %vm1866_vm9, %v4000_v55, %v3982_v8  ;;  %v3994_v42 = vpop.permute.xlu1 %3993 }
0x14cc   :  { %5748 = vrsqrt.f32 %v4179_v41  ;;  %v4006_v31 = vsel %vm1870_vm10, %v4003_v28, %v3994_v42 }
0x14cd   :  { %v4013_v1 = vrot.slane %v4006_v31, 7 }
0x14cf   :  { %v4014_v11 = vsel %vm1339_vm8, %v4011_v61, %v4013_v1  ;;  %v5504_v61 = vld [vmem:[%s7359_s12 + $0x20] sm:$0xff]  }
0x14d0   :  { %v4021_v57 = vpack.c.bf16 %v4014_v11, %v4014_v11  ;;  %5277 = vmatpush3.bf16.msra.mxu1 %v5504_v61 }
0x14d1   :  { %5278 = vmatprep.subr.bf16.mxu1 %v5789_v10 }
0x14d2   :  { %5257 = vmatmul.mubr.msk.bf16.gmra.mrb[112].mxu1 %vm259_vm1, %v4021_v57 }
0x14d3   :  { %5284 = vmatprep.mubr.msk.bf16.mxu1 %vm5790_vm3, %v5789_v10 }
0x14d4   :  { %v5747_v0 = vpop.eup %5746  ;;  %5279 = vmatpush3.bf16.msra.mxu1 %v5505_v18 }
0x14d5   :  { %v4188_v43 = vmul.f32 %v5747_v0, %v4148_v36  ;;  %5280 = vmatprep.subr.bf16.mxu1 %v5789_v10 }
0x14d6   :  { %v5749_v50 = vpop.eup %5748 }
0x14d7   :  { %v4189_v14 = vmul.f32 %v5749_v50, %v4149_v40  ;;  %v4199_v32 = vmul.f32 %v7238_v39, %v4188_v43 }
0x14d8   :  { %5281 = vmatpush3.bf16.msra.mxu1 %v5506_v56 }
0x14d9   :  { %v4200_v37 = vmul.f32 %v7238_v39, %v4189_v14  ;;  %v4210_v15 = vadd.f32 %v7244_v26, %v4199_v32  ;;  %5282 = vmatprep.subr.bf16.mxu1 %v5789_v10 }
0x14db   :  { %v4211_v58 = vadd.f32 %v7244_v26, %v4200_v37 }
0x14dc   :  { %5283 = vmatpush3.bf16.msra.mxu1 %v5507_v34 }
0x14dd   :  { %v4214_v17 = vpack.c.bf16 %v4211_v58, %v4210_v15  ;;  %v4722_v15 = vld [vmem:[%s7360_s13 + $0x1] ss:$0 sm:$0xff] }
0x14df   :  { %5269 = vmatmul.mubr.msk.bf16.gmra.mrb[100].mxu0 %vm259_vm1, %v4214_v17 }
0x14e0   :  { %5272 = vmatprep.mubr.msk.bf16.mxu0 %vm5790_vm3, %v5789_v10 }
0x155a   :  { %v4284_v30 = vpop.f32.mrb[96].mxu0 }
0x155b   :  { %v4285_v35 = vadd.f32 %v7287_v60, %v4284_v30  ;;  %v5266_v2 = vpop.f32.mrb[97].mxu0 }
0x155c   :  { %v4287_v3 = vpop.f32.mrb[98].mxu0 }
0x155d   :  { %v4311_v24 = vmul.f32 0.70710677, %v4285_v35  ;;  %v4288_v53 = vadd.f32 %v7287_v60, %v4287_v3  ;;  %v5267_v36 = vpop.f32.mrb[99].mxu0  ;;  %v4306_v49 = vmul.f32 0.5, %v4285_v35 }
0x155f   :  { %5750 = verf.f32 %v4311_v24  ;;  %v4312_v13 = vmul.f32 0.70710677, %v4288_v53  ;;  %v4307_v54 = vmul.f32 0.5, %v4288_v53 }
0x1561   :  { %5752 = verf.f32 %v4312_v13 }
0x1569   :  { %v5751_v40 = vpop.eup %5750 }
0x156a   :  { %v4321_v16 = vadd.f32 1.0, %v5751_v40 }
0x156b   :  { %v5753_v21 = vpop.eup %5752 }
0x156c   :  { %v4322_v38 = vadd.f32 1.0, %v5753_v21  ;;  %v4326_v9 = vmul.f32 %v4321_v16, %v4306_v49 }
0x156e   :  { %v4327_v44 = vmul.f32 %v4322_v38, %v4307_v54 }
0x1570   :  { %v4331_v7 = vpack.c.bf16 %v4327_v44, %v4326_v9  ;;  %v5508_v9 = vld [vmem:[%s7363_s16] sm:$0xff]  }
0x1571   :  { %5297 = vmatpush3.bf16.msra.mxu0 %v5508_v9 }
0x1572   :  { %5285 = vmatmul.mubr.msk.bf16.vlgmr.msra.gmra.mrb[116].mxu1 %vm191_vm0, %v4331_v7  ;;  %5298 = vmatprep.subr.bf16.mxu0 %v5789_v10 }
0x1573   :  { %5288 = vmatprep.mubr.msk.bf16.mxu1 %vm5790_vm3, %v5789_v10 }
0x15a5   :  { %v4098_v12 = vpop.f32.mrb[112].mxu1 }
0x15a6   :  { %v4108_v45 = vadd.f32 %v4098_v12, %v6655_v20  ;;  %v5258_v46 = vpop.f32.mrb[113].mxu1 }
0x15a7   :  { %v4101_v62 = vpop.f32.mrb[114].mxu1 }
0x15a8   :  { %v4121_v33 = vadd.f32 %v7195_v29, %v4108_v45  ;;  %v5259_v63 = vpop.f32.mrb[115].mxu1 }
0x15aa   :  { %v4138_v27 = vsel %vm272_vm2, %v4121_v33, 0.0 }
0x15ab   :  { %4139 = vadd.xlane.f32.xlu0 %v4138_v27 }
0x15b2   :  { %v4292_v5 = vpop.f32.mrb[100].mxu0 }
0x15b3   :  { %v4293_v59 = vadd.f32 %v7287_v60, %v4292_v5  ;;  %v5270_v23 = vpop.f32.mrb[101].mxu0 }
0x15b4   :  { %v4295_v19 = vpop.f32.mrb[102].mxu0 }
0x15b5   :  { %v4313_v8 = vmul.f32 0.70710677, %v4293_v59  ;;  %v4296_v6 = vadd.f32 %v7287_v60, %v4295_v19  ;;  %v5271_v22 = vpop.f32.mrb[103].mxu0  ;;  %v4308_v29 = vmul.f32 0.5, %v4293_v59 }
0x15b7   :  { %5754 = verf.f32 %v4313_v8  ;;  %v4314_v4 = vmul.f32 0.70710677, %v4296_v6  ;;  %v4309_v48 = vmul.f32 0.5, %v4296_v6  ;;  %v4724_v6 = vld [vmem:[%s7362_s15] ss:$0 sm:$0xff] }
0x15b9   :  { %5756 = verf.f32 %v4314_v4 }
0x15c1   :  { %v5755_v20 = vpop.eup %5754 }
0x15c2   :  { %v4323_v52 = vadd.f32 1.0, %v5755_v20 }
0x15c3   :  { %v5757_v51 = vpop.eup %5756 }
0x15c4   :  { %v4324_v41 = vadd.f32 1.0, %v5757_v51  ;;  %v4328_v55 = vmul.f32 %v4323_v52, %v4308_v29 }
0x15c6   :  { %v4329_v28 = vmul.f32 %v4324_v41, %v4309_v48  ;;  %v4725_v41 = vld [vmem:[%s7364_s17] ss:$0 sm:$0xff] }
0x15c8   :  { %v4332_v42 = vpack.c.bf16 %v4329_v28, %v4328_v55 }
0x15ca   :  { %5289 = vmatmul.mubr.msk.bf16.gmra.mrb[120].mxu1 %vm191_vm0, %v4332_v42 }
0x15cb   :  { %5292 = vmatprep.mubr.msk.bf16.mxu1 %vm5790_vm3, %v5789_v10 }
0x1638   :  { %v4140_v31 = vpop.xlane.xlu0 %4139 }
0x1639   :  { %v4145_v1 = vmul.f32 0.03125, %v4140_v31 }
0x163b   :  { %v4150_v11 = vsub.f32 %v4121_v33, %v4145_v1 }
0x163d   :  { %v4155_v57 = vmul.f32 %v4150_v11, %v4150_v11 }
0x163f   :  { %v4168_v0 = vsel %vm272_vm2, %v4155_v57, 0.0 }
0x1640   :  { %4169 = vadd.xlane.f32.xlu1 %v4168_v0 }
0x1645   :  { %v4410_v43 = vpop.f32.mrb[116].mxu1 }
0x1646   :  { %v5286_v50 = vpop.f32.mrb[117].mxu1  ;;  %v4429_v37 = vadd.f32 %v4410_v43, %v7199_v47 }
0x1647   :  { %v4413_v14 = vpop.f32.mrb[118].mxu1 }
0x1648   :  { %v5287_v32 = vpop.f32.mrb[119].mxu1  ;;  %v4439_v56 = vadd.f32 %v4722_v15, %v4429_v37 }
0x169d   :  { %v4417_v58 = vpop.f32.mrb[120].mxu1 }
0x169e   :  { %v4430_v17 = vadd.f32 %v4417_v58, %v7208_v25  ;;  %v5290_v61 = vpop.f32.mrb[121].mxu1 }
0x169f   :  { %v4420_v18 = vpop.f32.mrb[122].mxu1 }
0x16a0   :  { %v4440_v34 = vadd.f32 %v4722_v15, %v4430_v17  ;;  %v5291_v30 = vpop.f32.mrb[123].mxu1 }
0x16a2   :  { %v4441_v35 = vsel %vm1339_vm8, %v4439_v56, %v4440_v34 }
0x16a3   :  { %v4444_v2 = vsel %vm272_vm2, %v4441_v35, 0.0 }
0x16a4   :  { %4445 = vadd.xlane.f32.xlu0 %v4444_v2 }
0x16cd   :  { %v4170_v3 = vpop.xlane.xlu1 %4169 }
0x16ce   :  { %v4175_v24 = vmul.f32 0.03125, %v4170_v3 }
0x16d0   :  { %v4180_v47 = vadd.f32 1e-05, %v4175_v24 }
0x16d2   :  { %5758 = vrsqrt.f32 %v4180_v47 }
0x16dc   :  { %v5759_v53 = vpop.eup %5758 }
0x16dd   :  { %v4190_v36 = vmul.f32 %v5759_v53, %v4150_v11 }
0x16df   :  { %v4201_v13 = vmul.f32 %v7238_v39, %v4190_v36  ;;  %v5509_v39 = vld [vmem:[%s7363_s16 + $0x8] sm:$0xff]  }
0x16e0   :  { %5299 = vmatpush3.bf16.msra.mxu0 %v5509_v39 }
0x16e1   :  { %v4212_v25 = vadd.f32 %v7244_v26, %v4201_v13 }
0x16e3   :  { %v4215_v40 = vpack.c.bf16 %v4212_v25, %v4212_v25 }
0x16e5   :  { %5273 = vmatmul.mubr.msk.bf16.gmra.mrb[104].mxu0 %vm259_vm1, %v4215_v40 }
0x16e6   :  { %5300 = vmatprep.mubr.msk.bf16.mxu0 %vm5790_vm3, %v5789_v10 }
0x1731   :  { %v4446_v16 = vpop.xlane.xlu0 %4445 }
0x1732   :  { %v4447_v21 = vmul.f32 0.03125, %v4446_v16 }
0x1734   :  { %v4448_v49 = vsub.f32 %v4441_v35, %v4447_v21 }
0x1736   :  { %v4449_v54 = vmul.f32 %v4448_v49, %v4448_v49 }
0x1738   :  { %v4450_v38 = vsel %vm272_vm2, %v4449_v54, 0.0 }
0x1739   :  { %4451 = vadd.xlane.f32.xlu0 %v4450_v38 }
0x17b8   :  { %v4300_v26 = vpop.f32.mrb[104].mxu0 }
0x17b9   :  { %v4301_v44 = vadd.f32 %v7287_v60, %v4300_v26  ;;  %v5274_v7 = vpop.f32.mrb[105].mxu0  ;;  %v4723_v60 = vld [vmem:[%s7361_s14] ss:$0 sm:$0xff]  ;;  %s4545_s14 = sshll.u32 %s5799_s20, 4  ;;  %s4546_s14 = int_to_ptr.vmem [resolvable:$true] %s4545_s14 }
0x17ba   :  { %v4303_v12 = vpop.f32.mrb[106].mxu0  ;;  %s5764_s15 = scalar_lea.vmem %s4546_s14, 32  ;;  %p5769_p1 = scmp.lt.s32.totalorder %s4546_s14, %s4546_s14 }
0x17bb   :  { %v4315_v45 = vmul.f32 0.70710677, %v4301_v44  ;;  %v5275_v46 = vpop.f32.mrb[107].mxu0  ;;  %v4310_v27 = vmul.f32 0.5, %v4301_v44  ;;  %p5765_p0 = scmp.ne.s32.totalorder %s4546_s14, %s5764_s15  ;;  %p5770_p2 = scmp.lt.s32.totalorder %s5764_s15, %s5764_s15 }
0x17bd   :  { %5760 = verf.f32 %v4315_v45  ;;  %p5771_p3 = por %p5770_p2, %p5769_p1 }
0x17bf   :  { %p5772_p4 = pnand %p5771_p3, %p5765_p0 }
0x17c6   :  { %v4452_v62 = vpop.xlane.xlu0 %4451 }
0x17c7   :  { %v5761_v33 = vpop.eup %5760  ;;  %v4453_v63 = vmul.f32 0.03125, %v4452_v62 }
0x17c8   :  { %v4325_v5 = vadd.f32 1.0, %v5761_v33 }
0x17c9   :  { %v4454_v59 = vadd.f32 1e-05, %v4453_v63 }
0x17ca   :  { %v4330_v10 = vmul.f32 %v4325_v5, %v4310_v27 }
0x17cb   :  { %5762 = vrsqrt.f32 %v4454_v59 }
0x17cc   :  { %v4333_v23 = vpack.c.bf16 %v4330_v10, %v4330_v10 }
0x17ce   :  { %5293 = vmatmul.mubr.msk.bf16.gmra.mrb[124].mxu1 %vm191_vm0, %v4333_v23 }
0x17d5   :  { %v5763_v19 = vpop.eup %5762 }
0x17d6   :  { %v4456_v8 = vmul.f32 %v5763_v19, %v4448_v49 }
0x17d8   :  { %v4463_v22 = vmul.f32 %v4723_v60, %v4456_v8 }
0x17da   :  { %v4470_v4 = vadd.f32 %v4724_v6, %v4463_v22 }
0x17dc   :  { %v4471_v20 = vpack.c.bf16 %v4470_v4, %v4470_v4 }
0x17de   :  { %5301 = vmatmul.mubr.msk.bf16.vlgmr.msra.gmra.mrb[108].mxu0 %vm259_vm1, %v4471_v20 }
0x18a1   :  { %v4424_v52 = vpop.f32.mrb[124].mxu1 }
0x18a2   :  { %v5294_v51 = vpop.f32.mrb[125].mxu1 }
0x18a3   :  { %v4426_v29 = vpop.f32.mrb[126].mxu1 }
0x18a4   :  { %v5295_v48 = vpop.f32.mrb[127].mxu1 }
0x18b1   :  { %v4532_v55 = vpop.f32.mrb[108].mxu0 }
0x18b2   :  { %v4533_v28 = vadd.f32 %v4725_v41, %v4532_v55  ;;  %v5302_v42 = vpop.f32.mrb[109].mxu0 }
0x18b3   :  { %v4535_v31 = vpop.f32.mrb[110].mxu0 }
0x18b4   :  { %4538 = vst [vmem:[#allocation2] sm:$0x3] %v4533_v28  ;;  %v5303_v1 = vpop.f32.mrb[111].mxu0 }
0x18b5   :  { %5775 = shalt.err (!%p5772_p4)
}
0x18b6   :  { %s5776_s17 = scalar_lea.hbm %s7365_s18, 32 }
0x18b7   :  { %p5777_p5 = scmp.ne.s32.totalorder %s7365_s18, %s5776_s17  ;;  %p5780_p6 = scmp.lt.u32.totalorder %s5776_s17, %s7365_s18 }
0x18b9   :  { %p5782_p7 = pnand %p5780_p6, %p5777_p5 }
0x18bb   :  { %5785 = shalt.err (!%p5782_p7)
}
0x18bc   :  { %4548 = dma.vmem_to_hbm [thread:$0]  %s4546_s14, 32, %s7365_s18, [#allocation3]  }
0x18bd   :  { %5786 = dma.done.wait [#allocation3], 32  }
0x18be   :  { %5787 = vsyncadd [#allocation3], 4294967264 }
0x18bf   :  { %4552 = vsyncpa [#allocation3], 1 }

</bundles_post_ra>
